<compile_context>
chip_gen: v5e
topology: v5e:2x2
jax: 0.10.0
libtpu: 0.0.40
codegen_flags: <defaults>
</compile_context>

<pallas_src>
import functools

import numpy as np

import jax
import jax.numpy as jnp
from jax.experimental import pallas as pl
from jax.experimental.pallas import tpu as pltpu


# ----------------------------------------------------------------------------
# helpers
# ----------------------------------------------------------------------------
def _ceil8(n):
    return ((n + 7) // 8) * 8


def _conv_gather_np(h_in, w_in, h_out, w_out, s_in_pad, s_out_pad):
    """Batch-independent tap-gather matrix for a 3x3 / stride-2 / pad-1 conv.

    P[t * s_out_pad + (ho * w_out + wo), hi * w_in + wi] = 1
    with t = kh*3 + kw, hi = 2*ho + kh - 1, wi = 2*wo + kw - 1.
    Zero padding of the conv and row/column padding to sublane multiples are
    simply zero entries.
    """
    P = np.zeros((9 * s_out_pad, s_in_pad), np.float32)
    for t in range(9):
        kh, kw = divmod(t, 3)
        for ho in range(h_out):
            for wo in range(w_out):
                hi = 2 * ho + kh - 1
                wi = 2 * wo + kw - 1
                if 0 <= hi < h_in and 0 <= wi < w_in:
                    P[t * s_out_pad + ho * w_out + wo, hi * w_in + wi] = 1.0
    return P


# ----------------------------------------------------------------------------
# fused dynamics kernel (grid axis = timestep)
# ----------------------------------------------------------------------------
def _dynamics_kernel(*refs, B, hd, cc, s3, soutps, has_mem, neg_slope):
    refs = list(refs)
    c_scr = refs.pop()
    h_scr = refs.pop()
    out_ref = refs.pop()
    it = iter(refs)

    x_ref = next(it)                     # (1, B, Cin, S0)  natural NCHW frame
    az_ref = next(it)                    # (1, B, A+Z)
    h0_ref = next(it)                    # (B, hd)
    c0_ref = next(it)                    # (B, hd)
    m_ref = next(it) if has_mem else None
    p_refs = [next(it) for _ in range(3)]    # bf16 (9*S_out_pad, S_in_pad)
    w_refs = [next(it) for _ in range(3)]    # (9, C_in_l, cc)
    fcw_ref = next(it)                   # (S3, cc, hd)
    bias_ref = next(it)                  # (8, >=128) packed biases
    ew1_ref = next(it)                   # (A+Z, 2*hd)
    ew2_ref = next(it)                   # (2*hd, 2*hd)
    wall_ref = next(it)                  # (2*hd + concat_dim, 4*hd)

    ns = neg_slope

    def leaky(v):
        return jnp.where(v >= 0.0, v, ns * v)

    t_idx = pl.program_id(0)

    @pl.when(t_idx == 0)
    def _():
        h_scr[...] = h0_ref[...]
        c_scr[...] = c0_ref[...]

    h_prev = h_scr[...]
    c_prev = c_scr[...]

    # packed biases: row slice + leading-lane slice only
    conv_b = [bias_ref[li:li + 1, :cc] for li in range(3)]
    fcb = bias_ref[3:4, :hd]
    eb1 = bias_ref[4:5, :2 * hd]
    eb2 = bias_ref[5:6, :2 * hd]
    ball = bias_ref[6:7, :4 * hd]

    fcw = fcw_ref[...]                   # (S3, cc, hd)
    x_blk = x_ref[...]                   # (1, B, Cin, S0)

    # ---- C(x): per-sample conv trunk, (spatial rows, channel lanes) -------
    s_rows = []
    for b in range(B):
        act = x_blk[0, b].T              # (S0, Cin) f32, tiny in-kernel transpose
        for li in range(3):
            sp = soutps[li]
            # ONE gather matmul per layer (bf16 MXU, f32 accumulation)
            g = jnp.dot(p_refs[li][...], act.astype(jnp.bfloat16),
                        preferred_element_type=jnp.float32)      # (9*sp, C_in_l)
            w_l = w_refs[li][...]                                 # (9, C_in_l, cc)
            y = None
            for tap in range(9):
                contrib = jnp.dot(g[tap * sp:(tap + 1) * sp, :], w_l[tap],
                                  preferred_element_type=jnp.float32)
                y = contrib if y is None else y + contrib
            act = leaky(y + conv_b[li])                           # (sp, cc) f32
        # fc (NCHW-flatten permutation folded into fcw); padded rows o>=S3
        # are never read.
        s_b = None
        for o in range(s3):
            term = jnp.dot(act[o:o + 1, :], fcw[o],
                           preferred_element_type=jnp.float32)    # (1, hd)
            s_b = term if s_b is None else s_b + term
        s_rows.append(s_b)
    s_feat = leaky(jnp.concatenate(s_rows, axis=0) + fcb)         # (B, hd)

    # ---- H(a, z): fused block-diagonal embedding MLP -----------------------
    az = az_ref[...][0]                                           # (B, A+Z)
    e1 = leaky(jnp.dot(az, ew1_ref[...],
                       preferred_element_type=jnp.float32) + eb1)
    emb = jnp.dot(e1, ew2_ref[...],
                  preferred_element_type=jnp.float32) + eb2       # (B, 2*hd)

    # ---- ActionLSTM: single fused gate matmul [h | v | s] @ W_all ----------
    parts = [h_prev, emb]
    if has_mem:
        parts.append(m_ref[...][0])
    parts.append(s_feat)
    xg = jnp.concatenate(parts, axis=1)                           # value concat
    gates = jnp.dot(xg, wall_ref[...],
                    preferred_element_type=jnp.float32) + ball    # (B, 4*hd)
    i_g = jax.nn.sigmoid(gates[:, 0 * hd:1 * hd])
    f_g = jax.nn.sigmoid(gates[:, 1 * hd:2 * hd])
    o_g = jax.nn.sigmoid(gates[:, 2 * hd:3 * hd])
    g_g = jnp.tanh(gates[:, 3 * hd:4 * hd])
    c_t = f_g * c_prev + i_g * g_g
    h_t = o_g * jnp.tanh(c_t)

    h_scr[...] = h_t
    c_scr[...] = c_t
    out_ref[...] = jnp.concatenate([h_t, c_t], axis=1)[None]      # one dense store


# ----------------------------------------------------------------------------
# DynamicsEngine
# ----------------------------------------------------------------------------
class DynamicsEngine:
    CONV_CH = 16  # base channels of the C encoder

    def __init__(self, z_dim, hidden_dim, num_a_space, neg_slope,
                 img_size, num_inp_channels, memory_dim=None, seed=0):
        assert img_size % 8 == 0, "three stride-2 convs require img_size % 8 == 0"
        self.z_dim = z_dim
        self.hidden_dim = hidden_dim
        self.num_a_space = num_a_space
        self.neg_slope = neg_slope
        self.img_size = img_size
        self.num_inp_channels = num_inp_channels
        self.memory_dim = memory_dim
        self.concat_dim = 2 * hidden_dim + (memory_dim if memory_dim is not None else 0)

        cc = self.CONV_CH
        H0, H1, H2, H3 = img_size, img_size // 2, img_size // 4, img_size // 8
        S0, S1, S2, S3 = H0 * H0, H1 * H1, H2 * H2, H3 * H3
        S1p, S2p, S3p = _ceil8(S1), _ceil8(S2), _ceil8(S3)
        self.S0, self.S3 = S0, S3
        self.soutps = (S1p, S2p, S3p)
        flat_dim = cc * S3

        key = jax.random.PRNGKey(seed)
        ks = iter(jax.random.split(key, 32))

        def w(shape, scale=0.1):
            return (scale * jax.random.normal(next(ks), shape)).astype(jnp.float32)

        hd, G = hidden_dim, 4 * hidden_dim
        A, Z = num_a_space, z_dim
        # raw PyTorch-layout parameters (used by the pure-JAX reference)
        self.p = {
            "a_w1": w((A, hd)), "a_b1": w((hd,)),
            "a_w2": w((hd, hd)), "a_b2": w((hd,)),
            "z_w1": w((Z, hd)), "z_b1": w((hd,)),
            "z_w2": w((hd, hd)), "z_b2": w((hd,)),
            "c1_w": w((cc, num_inp_channels, 3, 3)), "c1_b": w((cc,)),
            "c2_w": w((cc, cc, 3, 3)),               "c2_b": w((cc,)),
            "c3_w": w((cc, cc, 3, 3)),               "c3_b": w((cc,)),
            "fc_w": w((flat_dim, hd)),               "fc_b": w((hd,)),
            "ws_w": w((hd, G)),              "ws_b": w((G,)),
            "wh_w": w((hd, G)),              "wh_b": w((G,)),
            "wv_w": w((self.concat_dim, G)), "wv_b": w((G,)),
        }

        # ------ derived, kernel-ready parameters (hoisted out of forward) ----
        p = self.p
        d = {}
        # batch-independent tap-gather matrices (bf16: exact 0/1)
        d["p1"] = jnp.asarray(_conv_gather_np(H0, H0, H1, H1, S0, S1p), jnp.bfloat16)
        d["p2"] = jnp.asarray(_conv_gather_np(H1, H1, H2, H2, S1p, S2p), jnp.bfloat16)
        d["p3"] = jnp.asarray(_conv_gather_np(H2, H2, H3, H3, S2p, S3p), jnp.bfloat16)
        cins = (num_inp_channels, cc, cc)
        for li in range(3):
            cw = p[f"c{li + 1}_w"]
            d[f"w{li + 1}"] = jnp.transpose(cw, (2, 3, 1, 0)).reshape(9, cins[li], cc)
        # fc weight permuted from NCHW-flat rows (c*S3 + o) to [o, c, :]
        d["fcw"] = p["fc_w"].reshape(cc, S3, hd).transpose(1, 0, 2)
        # packed small biases (one input instead of seven)
        BW = max(128, 4 * hd)
        bias = np.zeros((8, BW), np.float32)
        bias[0, :cc] = np.asarray(p["c1_b"])
        bias[1, :cc] = np.asarray(p["c2_b"])
        bias[2, :cc] = np.asarray(p["c3_b"])
        bias[3, :hd] = np.asarray(p["fc_b"])
        bias[4, :2 * hd] = np.concatenate([np.asarray(p["a_b1"]), np.asarray(p["z_b1"])])
        bias[5, :2 * hd] = np.concatenate([np.asarray(p["a_b2"]), np.asarray(p["z_b2"])])
        bias[6, :4 * hd] = np.asarray(p["wh_b"] + p["wv_b"] + p["ws_b"])
        d["bias"] = jnp.asarray(bias)
        # fused (block-diagonal) a/z embedding MLP
        ew1 = jnp.zeros((A + Z, 2 * hd), jnp.float32)
        ew1 = ew1.at[:A, :hd].set(p["a_w1"]).at[A:, hd:].set(p["z_w1"])
        ew2 = jnp.zeros((2 * hd, 2 * hd), jnp.float32)
        ew2 = ew2.at[:hd, :hd].set(p["a_w2"]).at[hd:, hd:].set(p["z_w2"])
        d["ew1"], d["ew2"] = ew1, ew2
        # stacked gate weights: rows [h | v | s]
        cd = self.concat_dim
        wall = jnp.zeros((2 * hd + cd, G), jnp.float32)
        wall = (wall.at[:hd].set(p["wh_w"])
                    .at[hd:hd + cd].set(p["wv_w"])
                    .at[hd + cd:].set(p["ws_w"]))
        d["wall"] = wall
        self.d = d

        self._call_cache = {}

    def init_hidden_state_and_cell(self, batch_size):
        return (jnp.zeros((batch_size, self.hidden_dim), jnp.float32),
                jnp.zeros((batch_size, self.hidden_dim), jnp.float32))

    # --- fused time-grid kernel builder (per (T, B, has_mem)) --------------
    def _build_call(self, T, B, has_mem):
        d = self.d
        hd, cc = self.hidden_dim, self.CONV_CH
        cin, S0 = self.num_inp_channels, self.S0
        AZ = self.num_a_space + self.z_dim

        statics = [d["p1"], d["p2"], d["p3"], d["w1"], d["w2"], d["w3"],
                   d["fcw"], d["bias"], d["ew1"], d["ew2"], d["wall"]]

        kernel = functools.partial(
            _dynamics_kernel, B=B, hd=hd, cc=cc, s3=self.S3,
            soutps=self.soutps, has_mem=has_mem, neg_slope=self.neg_slope)

        def const_spec(arr):
            nd = arr.ndim
            return pl.BlockSpec(arr.shape, lambda t, _nd=nd: (0,) * _nd)

        in_specs = [
            pl.BlockSpec((1, B, cin, S0), lambda t: (t, 0, 0, 0)),   # frame(t)
            pl.BlockSpec((1, B, AZ), lambda t: (t, 0, 0)),           # [a|z](t)
            pl.BlockSpec((B, hd), lambda t: (0, 0)),                 # h0
            pl.BlockSpec((B, hd), lambda t: (0, 0)),                 # c0
        ]
        if has_mem:
            in_specs.append(pl.BlockSpec((1, B, self.memory_dim),
                                         lambda t: (t, 0, 0)))       # m(t)
        in_specs += [const_spec(a) for a in statics]                 # resident weights

        call = pl.pallas_call(
            kernel,
            out_shape=jax.ShapeDtypeStruct((T, B, 2 * hd), jnp.float32),
            grid=(T,),
            in_specs=in_specs,
            out_specs=pl.BlockSpec((1, B, 2 * hd), lambda t: (t, 0, 0)),
            scratch_shapes=[pltpu.VMEM((B, hd), jnp.float32),        # h carry
                            pltpu.VMEM((B, hd), jnp.float32)],       # c carry
            compiler_params=pltpu.CompilerParams(
                dimension_semantics=("arbitrary",),
                vmem_limit_bytes=32 * 1024 * 1024),
        )

        def run(h0, c0, x_seq, a_seq, z_seq, m_seq=None):
            x2 = x_seq.reshape(T, B, cin, S0)                 # free reshape (stays NCHW)
            az = jnp.concatenate([a_seq, z_seq], axis=-1)     # (T, B, A+Z)
            dyn = [x2, az, h0, c0]
            if has_mem:
                dyn.append(m_seq)
            out = call(*(dyn + statics))                      # (T, B, 2*hd)
            return out[..., :hd], out[..., hd:]

        return jax.jit(run)

    def _get_call(self, T, B, has_mem):
        key = (T, B, has_mem)
        if key not in self._call_cache:
            self._call_cache[key] = self._build_call(T, B, has_mem)
        return self._call_cache[key]

    def _check_mem(self, has_mem):
        if has_mem and self.memory_dim is None:
            raise ValueError("m given but memory_dim is None")
        if (not has_mem) and self.memory_dim is not None:
            raise ValueError("memory_dim set but m not provided")

    # --- single-step forward (matches the PyTorch module) -------------------
    def forward(self, h, c, x, a, z, m_vec_prev=None):
        has_mem = m_vec_prev is not None
        self._check_mem(has_mem)
        B = x.shape[0]
        fn = self._get_call(1, B, has_mem)
        if has_mem:
            h_seq, c_seq = fn(h, c, x[None], a[None], z[None], m_vec_prev[None])
        else:
            h_seq, c_seq = fn(h, c, x[None], a[None], z[None])
        return h_seq[0], c_seq[0]

    __call__ = forward

    # --- multi-step rollout: one pallas_call, weights stay VMEM-resident ----
    def forward_sequence(self, h0, c0, x_seq, a_seq, z_seq, m_seq=None):
        has_mem = m_seq is not None
        self._check_mem(has_mem)
        T, B = x_seq.shape[0], x_seq.shape[1]
        fn = self._get_call(T, B, has_mem)
        if has_mem:
            return fn(h0, c0, x_seq, a_seq, z_seq, m_seq)
        return fn(h0, c0, x_seq, a_seq, z_seq)


# ----------------------------------------------------------------------------
# pure-JAX reference (same synthetic parameters) for correctness checks
# ----------------------------------------------------------------------------
def _reference_forward(engine, h, c, x, a, z, m=None):
    p, ns, hd = engine.p, engine.neg_slope, engine.hidden_dim
    hi = jax.lax.Precision.HIGHEST

    def leaky(v):
        return jnp.where(v >= 0.0, v, ns * v)

    def lin(v, w, b):
        return jnp.dot(v, w, precision=hi) + b

    a_emb = lin(leaky(lin(a, p["a_w1"], p["a_b1"])), p["a_w2"], p["a_b2"])
    z_emb = lin(leaky(lin(z, p["z_w1"], p["z_b1"])), p["z_w2"], p["z_b2"])
    parts = [a_emb, z_emb] + ([m] if m is not None else [])
    v = jnp.concatenate(parts, axis=1)

    y = x
    for wk, bk in (("c1_w", "c1_b"), ("c2_w", "c2_b"), ("c3_w", "c3_b")):
        y = jax.lax.conv_general_dilated(
            y, p[wk], (2, 2), ((1, 1), (1, 1)),
            dimension_numbers=("NCHW", "OIHW", "NCHW"), precision=hi)
        y = leaky(y + p[bk].reshape(1, -1, 1, 1))
    flat = y.reshape(y.shape[0], -1)                      # NCHW flatten
    s = leaky(lin(flat, p["fc_w"], p["fc_b"]))

    gates = (lin(h, p["wh_w"], p["wh_b"]) + lin(v, p["wv_w"], p["wv_b"])
             + lin(s, p["ws_w"], p["ws_b"]))
    i = jax.nn.sigmoid(gates[:, :hd])
    f = jax.nn.sigmoid(gates[:, hd:2 * hd])
    o = jax.nn.sigmoid(gates[:, 2 * hd:3 * hd])
    g = jnp.tanh(gates[:, 3 * hd:])
    c_t = f * c + i * g
    h_t = o * jnp.tanh(c_t)
    return h_t, c_t


# ----------------------------------------------------------------------------
if __name__ == "__main__":
    B, T = 2, 4
    z_dim, hidden_dim, num_a_space = 16, 32, 8
    neg_slope, img_size, num_inp_channels = 0.2, 16, 4
    RTOL = ATOL = 2e-2   # bf16 gather path

    key = jax.random.PRNGKey(0)
    kx, ka, kz, kxs, kas, kzs, km = jax.random.split(key, 7)

    engine = DynamicsEngine(z_dim, hidden_dim, num_a_space, neg_slope,
                            img_size, num_inp_channels, memory_dim=None, seed=0)

    x = jax.random.normal(kx, (B, num_inp_channels, img_size, img_size), jnp.float32)
    a = jax.random.normal(ka, (B, num_a_space), jnp.float32)
    z = jax.random.normal(kz, (B, z_dim), jnp.float32)
    h0, c0 = engine.init_hidden_state_and_cell(B)

    # --- single-step forward --------------------------------------------
    h_t, c_t = engine(h0, c0, x, a, z)
    jax.block_until_ready((h_t, c_t))
    assert h_t.shape == (B, hidden_dim) and c_t.shape == (B, hidden_dim)
    assert jnp.all(jnp.isfinite(h_t)) and jnp.all(jnp.isfinite(c_t))
    h_ref, c_ref = _reference_forward(engine, h0, c0, x, a, z)
    assert jnp.allclose(h_t, h_ref, rtol=RTOL, atol=ATOL), \
        float(jnp.max(jnp.abs(h_t - h_ref)))
    assert jnp.allclose(c_t, c_ref, rtol=RTOL, atol=ATOL), \
        float(jnp.max(jnp.abs(c_t - c_ref)))

    # --- multi-step rollout: one pallas_call, grid over T -----------------
    x_seq = jax.random.normal(kxs, (T, B, num_inp_channels, img_size, img_size),
                              jnp.float32)
    a_seq = jax.random.normal(kas, (T, B, num_a_space), jnp.float32)
    z_seq = jax.random.normal(kzs, (T, B, z_dim), jnp.float32)
    h_seq, c_seq = engine.forward_sequence(h0, c0, x_seq, a_seq, z_seq)
    jax.block_until_ready((h_seq, c_seq))
    hr, cr = h0, c0
    for t in range(T):
        hr, cr = _reference_forward(engine, hr, cr, x_seq[t], a_seq[t], z_seq[t])
        assert jnp.allclose(h_seq[t], hr, rtol=RTOL, atol=ATOL), (t, "h")
        assert jnp.allclose(c_seq[t], cr, rtol=RTOL, atol=ATOL), (t, "c")

    # --- memory-conditioned branch (m_vec_prev path) -----------------------
    mem_dim = 16
    engine_m = DynamicsEngine(z_dim, hidden_dim, num_a_space, neg_slope,
                              img_size, num_inp_channels, memory_dim=mem_dim, seed=1)
    m = jax.random.normal(km, (B, mem_dim), jnp.float32)
    h_m, c_m = engine_m(h0, c0, x, a, z, m_vec_prev=m)
    jax.block_until_ready((h_m, c_m))
    h_mr, c_mr = _reference_forward(engine_m, h0, c0, x, a, z, m)
    assert jnp.allclose(h_m, h_mr, rtol=RTOL, atol=ATOL)
    assert jnp.allclose(c_m, c_mr, rtol=RTOL, atol=ATOL)

    print("KERNEL_OK")
</pallas_src>

<mosaic_0001>
module attributes {stable_mosaic.version = 11 : i64} {
  func.func @_dynamics_kernel(%arg0: i32, %arg1: memref<1x2x4x256xf32, #tpu.memory_space<vmem>>, %arg2: memref<1x2x24xf32, #tpu.memory_space<vmem>>, %arg3: memref<2x32xf32, #tpu.memory_space<vmem>>, %arg4: memref<2x32xf32, #tpu.memory_space<vmem>>, %arg5: memref<576x256xbf16, #tpu.memory_space<vmem>>, %arg6: memref<144x64xbf16, #tpu.memory_space<vmem>>, %arg7: memref<72x16xbf16, #tpu.memory_space<vmem>>, %arg8: memref<9x4x16xf32, #tpu.memory_space<vmem>>, %arg9: memref<9x16x16xf32, #tpu.memory_space<vmem>>, %arg10: memref<9x16x16xf32, #tpu.memory_space<vmem>>, %arg11: memref<4x16x32xf32, #tpu.memory_space<vmem>>, %arg12: memref<8x128xf32, #tpu.memory_space<vmem>>, %arg13: memref<24x64xf32, #tpu.memory_space<vmem>>, %arg14: memref<64x64xf32, #tpu.memory_space<vmem>>, %arg15: memref<128x128xf32, #tpu.memory_space<vmem>>, %arg16: memref<1x2x64xf32, #tpu.memory_space<vmem>>, %arg17: memref<2x32xf32, #tpu.memory_space<vmem>>, %arg18: memref<2x32xf32, #tpu.memory_space<vmem>>) attributes {dimension_semantics = [#tpu.dimension_semantics<arbitrary>], iteration_bounds = array<i64: 1>, scalar_prefetch = 0 : i64, scratch_operands = 2 : i64, tpu.core_type = #tpu.core_type<tc>, window_params = [{transform_indices = @transform_0, window_bounds = array<i64: 1, 2, 4, 256>}, {transform_indices = @transform_1, window_bounds = array<i64: 1, 2, 24>}, {pipeline_mode = #tpu.pipeline_mode<synchronous>, transform_indices = @transform_2, window_bounds = array<i64: 2, 32>}, {pipeline_mode = #tpu.pipeline_mode<synchronous>, transform_indices = @transform_3, window_bounds = array<i64: 2, 32>}, {pipeline_mode = #tpu.pipeline_mode<synchronous>, transform_indices = @transform_4, window_bounds = array<i64: 576, 256>}, {pipeline_mode = #tpu.pipeline_mode<synchronous>, transform_indices = @transform_5, window_bounds = array<i64: 144, 64>}, {pipeline_mode = #tpu.pipeline_mode<synchronous>, transform_indices = @transform_6, window_bounds = array<i64: 72, 16>}, {pipeline_mode = #tpu.pipeline_mode<synchronous>, transform_indices = @transform_7, window_bounds = array<i64: 9, 4, 16>}, {pipeline_mode = #tpu.pipeline_mode<synchronous>, transform_indices = @transform_8, window_bounds = array<i64: 9, 16, 16>}, {pipeline_mode = #tpu.pipeline_mode<synchronous>, transform_indices = @transform_9, window_bounds = array<i64: 9, 16, 16>}, {pipeline_mode = #tpu.pipeline_mode<synchronous>, transform_indices = @transform_10, window_bounds = array<i64: 4, 16, 32>}, {pipeline_mode = #tpu.pipeline_mode<synchronous>, transform_indices = @transform_11, window_bounds = array<i64: 8, 128>}, {pipeline_mode = #tpu.pipeline_mode<synchronous>, transform_indices = @transform_12, window_bounds = array<i64: 24, 64>}, {pipeline_mode = #tpu.pipeline_mode<synchronous>, transform_indices = @transform_13, window_bounds = array<i64: 64, 64>}, {pipeline_mode = #tpu.pipeline_mode<synchronous>, transform_indices = @transform_14, window_bounds = array<i64: 128, 128>}, {transform_indices = @transform_15, window_bounds = array<i64: 1, 2, 64>}]} {
    %c0_i32 = arith.constant 0 : i32
    %0 = arith.cmpi eq, %arg0, %c0_i32 : i32
    %1 = arith.extui %0 : i1 to i32
    %c0_i32_0 = arith.constant 0 : i32
    %2 = arith.cmpi ne, %1, %c0_i32_0 : i32
    scf.if %2 {
      %c0_154 = arith.constant 0 : index
      %c0_155 = arith.constant 0 : index
      %446 = vector.load %arg3[%c0_154, %c0_155] : memref<2x32xf32, #tpu.memory_space<vmem>>, vector<2x32xf32>
      %c0_156 = arith.constant 0 : index
      %c0_157 = arith.constant 0 : index
      %447 = vector.load %arg17[%c0_156, %c0_157] : memref<2x32xf32, #tpu.memory_space<vmem>>, vector<2x32xf32>
      tpu.vector_store %arg17[%c0_156, %c0_157], %446 {strides = array<i32>} : memref<2x32xf32, #tpu.memory_space<vmem>>, vector<2x32xf32>,
      %c0_158 = arith.constant 0 : index
      %c0_159 = arith.constant 0 : index
      %448 = vector.load %arg4[%c0_158, %c0_159] : memref<2x32xf32, #tpu.memory_space<vmem>>, vector<2x32xf32>
      %c0_160 = arith.constant 0 : index
      %c0_161 = arith.constant 0 : index
      %449 = vector.load %arg18[%c0_160, %c0_161] : memref<2x32xf32, #tpu.memory_space<vmem>>, vector<2x32xf32>
      tpu.vector_store %arg18[%c0_160, %c0_161], %448 {strides = array<i32>} : memref<2x32xf32, #tpu.memory_space<vmem>>, vector<2x32xf32>,
    } else {
    }
    %c0 = arith.constant 0 : index
    %c0_1 = arith.constant 0 : index
    %3 = vector.load %arg17[%c0, %c0_1] : memref<2x32xf32, #tpu.memory_space<vmem>>, vector<2x32xf32>
    %c0_2 = arith.constant 0 : index
    %c0_3 = arith.constant 0 : index
    %4 = vector.load %arg18[%c0_2, %c0_3] : memref<2x32xf32, #tpu.memory_space<vmem>>, vector<2x32xf32>
    %c0_4 = arith.constant 0 : index
    %c0_5 = arith.constant 0 : index
    %5 = vector.load %arg12[%c0_4, %c0_5] : memref<8x128xf32, #tpu.memory_space<vmem>>, vector<1x16xf32>
    %c1 = arith.constant 1 : index
    %c0_6 = arith.constant 0 : index
    %6 = vector.load %arg12[%c1, %c0_6] : memref<8x128xf32, #tpu.memory_space<vmem>>, vector<1x16xf32>
    %c2 = arith.constant 2 : index
    %c0_7 = arith.constant 0 : index
    %7 = vector.load %arg12[%c2, %c0_7] : memref<8x128xf32, #tpu.memory_space<vmem>>, vector<1x16xf32>
    %c3 = arith.constant 3 : index
    %c0_8 = arith.constant 0 : index
    %8 = vector.load %arg12[%c3, %c0_8] : memref<8x128xf32, #tpu.memory_space<vmem>>, vector<1x32xf32>
    %c4 = arith.constant 4 : index
    %c0_9 = arith.constant 0 : index
    %9 = vector.load %arg12[%c4, %c0_9] : memref<8x128xf32, #tpu.memory_space<vmem>>, vector<1x64xf32>
    %c5 = arith.constant 5 : index
    %c0_10 = arith.constant 0 : index
    %10 = vector.load %arg12[%c5, %c0_10] : memref<8x128xf32, #tpu.memory_space<vmem>>, vector<1x64xf32>
    %c6 = arith.constant 6 : index
    %c0_11 = arith.constant 0 : index
    %11 = vector.load %arg12[%c6, %c0_11] : memref<8x128xf32, #tpu.memory_space<vmem>>, vector<1x128xf32>
    %c0_12 = arith.constant 0 : index
    %c0_13 = arith.constant 0 : index
    %c0_14 = arith.constant 0 : index
    %12 = vector.load %arg11[%c0_12, %c0_13, %c0_14] : memref<4x16x32xf32, #tpu.memory_space<vmem>>, vector<4x16x32xf32>
    %c0_15 = arith.constant 0 : index
    %c0_16 = arith.constant 0 : index
    %c0_17 = arith.constant 0 : index
    %c0_18 = arith.constant 0 : index
    %13 = vector.load %arg1[%c0_15, %c0_16, %c0_17, %c0_18] : memref<1x2x4x256xf32, #tpu.memory_space<vmem>>, vector<1x2x4x256xf32>
    %14 = vector.extract_strided_slice %13 {offsets = [0, 0, 0, 0], sizes = [1, 1, 4, 256], strides = [1, 1, 1, 1]} : vector<1x2x4x256xf32> to vector<1x1x4x256xf32>
    %15 = vector.shape_cast %14 : vector<1x1x4x256xf32> to vector<4x256xf32>
    %16 = tpu.transpose %15, [1, 0] : vector<4x256xf32> -> vector<256x4xf32>
    %c0_19 = arith.constant 0 : index
    %c0_20 = arith.constant 0 : index
    %17 = vector.load %arg5[%c0_19, %c0_20] : memref<576x256xbf16, #tpu.memory_space<vmem>>, vector<576x256xbf16>
    %18 = arith.truncf %16 : vector<256x4xf32> to vector<256x4xbf16>
    %cst = arith.constant dense<0.000000e+00> : vector<576x4xf32>
    %19 = tpu.matmul %17, %18, %cst {dimension_numbers = #tpu.dot_dimension_numbers<[1], [0], [0], [1], [0, 0, 1, 1], [], []>} : vector<576x256xbf16>, vector<256x4xbf16>, vector<576x4xf32> -> vector<576x4xf32>
    %c0_21 = arith.constant 0 : index
    %c0_22 = arith.constant 0 : index
    %c0_23 = arith.constant 0 : index
    %20 = vector.load %arg8[%c0_21, %c0_22, %c0_23] : memref<9x4x16xf32, #tpu.memory_space<vmem>>, vector<9x4x16xf32>
    %21 = vector.extract_strided_slice %19 {offsets = [0, 0], sizes = [64, 4], strides = [1, 1]} : vector<576x4xf32> to vector<64x4xf32>
    %22 = vector.extract_strided_slice %20 {offsets = [0, 0, 0], sizes = [1, 4, 16], strides = [1, 1, 1]} : vector<9x4x16xf32> to vector<1x4x16xf32>
    %23 = vector.shape_cast %22 : vector<1x4x16xf32> to vector<4x16xf32>
    %cst_24 = arith.constant dense<0.000000e+00> : vector<64x16xf32>
    %24 = tpu.matmul %21, %23, %cst_24 {dimension_numbers = #tpu.dot_dimension_numbers<[1], [0], [0], [1], [0, 0, 1, 1], [], []>} : vector<64x4xf32>, vector<4x16xf32>, vector<64x16xf32> -> vector<64x16xf32>
    %25 = vector.extract_strided_slice %19 {offsets = [64, 0], sizes = [64, 4], strides = [1, 1]} : vector<576x4xf32> to vector<64x4xf32>
    %26 = vector.extract_strided_slice %20 {offsets = [1, 0, 0], sizes = [1, 4, 16], strides = [1, 1, 1]} : vector<9x4x16xf32> to vector<1x4x16xf32>
    %27 = vector.shape_cast %26 : vector<1x4x16xf32> to vector<4x16xf32>
    %cst_25 = arith.constant dense<0.000000e+00> : vector<64x16xf32>
    %28 = tpu.matmul %25, %27, %cst_25 {dimension_numbers = #tpu.dot_dimension_numbers<[1], [0], [0], [1], [0, 0, 1, 1], [], []>} : vector<64x4xf32>, vector<4x16xf32>, vector<64x16xf32> -> vector<64x16xf32>
    %29 = arith.addf %24, %28 : vector<64x16xf32>
    %30 = vector.extract_strided_slice %19 {offsets = [128, 0], sizes = [64, 4], strides = [1, 1]} : vector<576x4xf32> to vector<64x4xf32>
    %31 = vector.extract_strided_slice %20 {offsets = [2, 0, 0], sizes = [1, 4, 16], strides = [1, 1, 1]} : vector<9x4x16xf32> to vector<1x4x16xf32>
    %32 = vector.shape_cast %31 : vector<1x4x16xf32> to vector<4x16xf32>
    %cst_26 = arith.constant dense<0.000000e+00> : vector<64x16xf32>
    %33 = tpu.matmul %30, %32, %cst_26 {dimension_numbers = #tpu.dot_dimension_numbers<[1], [0], [0], [1], [0, 0, 1, 1], [], []>} : vector<64x4xf32>, vector<4x16xf32>, vector<64x16xf32> -> vector<64x16xf32>
    %34 = arith.addf %29, %33 : vector<64x16xf32>
    %35 = vector.extract_strided_slice %19 {offsets = [192, 0], sizes = [64, 4], strides = [1, 1]} : vector<576x4xf32> to vector<64x4xf32>
    %36 = vector.extract_strided_slice %20 {offsets = [3, 0, 0], sizes = [1, 4, 16], strides = [1, 1, 1]} : vector<9x4x16xf32> to vector<1x4x16xf32>
    %37 = vector.shape_cast %36 : vector<1x4x16xf32> to vector<4x16xf32>
    %cst_27 = arith.constant dense<0.000000e+00> : vector<64x16xf32>
    %38 = tpu.matmul %35, %37, %cst_27 {dimension_numbers = #tpu.dot_dimension_numbers<[1], [0], [0], [1], [0, 0, 1, 1], [], []>} : vector<64x4xf32>, vector<4x16xf32>, vector<64x16xf32> -> vector<64x16xf32>
    %39 = arith.addf %34, %38 : vector<64x16xf32>
    %40 = vector.extract_strided_slice %19 {offsets = [256, 0], sizes = [64, 4], strides = [1, 1]} : vector<576x4xf32> to vector<64x4xf32>
    %41 = vector.extract_strided_slice %20 {offsets = [4, 0, 0], sizes = [1, 4, 16], strides = [1, 1, 1]} : vector<9x4x16xf32> to vector<1x4x16xf32>
    %42 = vector.shape_cast %41 : vector<1x4x16xf32> to vector<4x16xf32>
    %cst_28 = arith.constant dense<0.000000e+00> : vector<64x16xf32>
    %43 = tpu.matmul %40, %42, %cst_28 {dimension_numbers = #tpu.dot_dimension_numbers<[1], [0], [0], [1], [0, 0, 1, 1], [], []>} : vector<64x4xf32>, vector<4x16xf32>, vector<64x16xf32> -> vector<64x16xf32>
    %44 = arith.addf %39, %43 : vector<64x16xf32>
    %45 = vector.extract_strided_slice %19 {offsets = [320, 0], sizes = [64, 4], strides = [1, 1]} : vector<576x4xf32> to vector<64x4xf32>
    %46 = vector.extract_strided_slice %20 {offsets = [5, 0, 0], sizes = [1, 4, 16], strides = [1, 1, 1]} : vector<9x4x16xf32> to vector<1x4x16xf32>
    %47 = vector.shape_cast %46 : vector<1x4x16xf32> to vector<4x16xf32>
    %cst_29 = arith.constant dense<0.000000e+00> : vector<64x16xf32>
    %48 = tpu.matmul %45, %47, %cst_29 {dimension_numbers = #tpu.dot_dimension_numbers<[1], [0], [0], [1], [0, 0, 1, 1], [], []>} : vector<64x4xf32>, vector<4x16xf32>, vector<64x16xf32> -> vector<64x16xf32>
    %49 = arith.addf %44, %48 : vector<64x16xf32>
    %50 = vector.extract_strided_slice %19 {offsets = [384, 0], sizes = [64, 4], strides = [1, 1]} : vector<576x4xf32> to vector<64x4xf32>
    %51 = vector.extract_strided_slice %20 {offsets = [6, 0, 0], sizes = [1, 4, 16], strides = [1, 1, 1]} : vector<9x4x16xf32> to vector<1x4x16xf32>
    %52 = vector.shape_cast %51 : vector<1x4x16xf32> to vector<4x16xf32>
    %cst_30 = arith.constant dense<0.000000e+00> : vector<64x16xf32>
    %53 = tpu.matmul %50, %52, %cst_30 {dimension_numbers = #tpu.dot_dimension_numbers<[1], [0], [0], [1], [0, 0, 1, 1], [], []>} : vector<64x4xf32>, vector<4x16xf32>, vector<64x16xf32> -> vector<64x16xf32>
    %54 = arith.addf %49, %53 : vector<64x16xf32>
    %55 = vector.extract_strided_slice %19 {offsets = [448, 0], sizes = [64, 4], strides = [1, 1]} : vector<576x4xf32> to vector<64x4xf32>
    %56 = vector.extract_strided_slice %20 {offsets = [7, 0, 0], sizes = [1, 4, 16], strides = [1, 1, 1]} : vector<9x4x16xf32> to vector<1x4x16xf32>
    %57 = vector.shape_cast %56 : vector<1x4x16xf32> to vector<4x16xf32>
    %cst_31 = arith.constant dense<0.000000e+00> : vector<64x16xf32>
    %58 = tpu.matmul %55, %57, %cst_31 {dimension_numbers = #tpu.dot_dimension_numbers<[1], [0], [0], [1], [0, 0, 1, 1], [], []>} : vector<64x4xf32>, vector<4x16xf32>, vector<64x16xf32> -> vector<64x16xf32>
    %59 = arith.addf %54, %58 : vector<64x16xf32>
    %60 = vector.extract_strided_slice %19 {offsets = [512, 0], sizes = [64, 4], strides = [1, 1]} : vector<576x4xf32> to vector<64x4xf32>
    %61 = vector.extract_strided_slice %20 {offsets = [8, 0, 0], sizes = [1, 4, 16], strides = [1, 1, 1]} : vector<9x4x16xf32> to vector<1x4x16xf32>
    %62 = vector.shape_cast %61 : vector<1x4x16xf32> to vector<4x16xf32>
    %cst_32 = arith.constant dense<0.000000e+00> : vector<64x16xf32>
    %63 = tpu.matmul %60, %62, %cst_32 {dimension_numbers = #tpu.dot_dimension_numbers<[1], [0], [0], [1], [0, 0, 1, 1], [], []>} : vector<64x4xf32>, vector<4x16xf32>, vector<64x16xf32> -> vector<64x16xf32>
    %64 = arith.addf %59, %63 : vector<64x16xf32>
    %65 = vector.broadcast %5 : vector<1x16xf32> to vector<64x16xf32>
    %66 = arith.addf %64, %65 : vector<64x16xf32>
    %cst_33 = arith.constant 0.000000e+00 : f32
    %67 = vector.broadcast %cst_33 : f32 to vector<64x16xf32>
    %68 = arith.cmpf oge, %66, %67 : vector<64x16xf32>
    %cst_34 = arith.constant 2.000000e-01 : f32
    %69 = vector.broadcast %cst_34 : f32 to vector<64x16xf32>
    %70 = arith.mulf %69, %66 : vector<64x16xf32>
    %71 = arith.select %68, %66, %70 : vector<64x16xi1>, vector<64x16xf32>
    %c0_35 = arith.constant 0 : index
    %c0_36 = arith.constant 0 : index
    %72 = vector.load %arg6[%c0_35, %c0_36] : memref<144x64xbf16, #tpu.memory_space<vmem>>, vector<144x64xbf16>
    %73 = arith.truncf %71 : vector<64x16xf32> to vector<64x16xbf16>
    %cst_37 = arith.constant dense<0.000000e+00> : vector<144x16xf32>
    %74 = tpu.matmul %72, %73, %cst_37 {dimension_numbers = #tpu.dot_dimension_numbers<[1], [0], [0], [1], [0, 0, 1, 1], [], []>} : vector<144x64xbf16>, vector<64x16xbf16>, vector<144x16xf32> -> vector<144x16xf32>
    %c0_38 = arith.constant 0 : index
    %c0_39 = arith.constant 0 : index
    %c0_40 = arith.constant 0 : index
    %75 = vector.load %arg9[%c0_38, %c0_39, %c0_40] : memref<9x16x16xf32, #tpu.memory_space<vmem>>, vector<9x16x16xf32>
    %76 = vector.extract_strided_slice %74 {offsets = [0, 0], sizes = [16, 16], strides = [1, 1]} : vector<144x16xf32> to vector<16x16xf32>
    %77 = vector.extract_strided_slice %75 {offsets = [0, 0, 0], sizes = [1, 16, 16], strides = [1, 1, 1]} : vector<9x16x16xf32> to vector<1x16x16xf32>
    %78 = vector.shape_cast %77 : vector<1x16x16xf32> to vector<16x16xf32>
    %cst_41 = arith.constant dense<0.000000e+00> : vector<16x16xf32>
    %79 = tpu.matmul %76, %78, %cst_41 {dimension_numbers = #tpu.dot_dimension_numbers<[1], [0], [0], [1], [0, 0, 1, 1], [], []>} : vector<16x16xf32>, vector<16x16xf32>, vector<16x16xf32> -> vector<16x16xf32>
    %80 = vector.extract_strided_slice %74 {offsets = [16, 0], sizes = [16, 16], strides = [1, 1]} : vector<144x16xf32> to vector<16x16xf32>
    %81 = vector.extract_strided_slice %75 {offsets = [1, 0, 0], sizes = [1, 16, 16], strides = [1, 1, 1]} : vector<9x16x16xf32> to vector<1x16x16xf32>
    %82 = vector.shape_cast %81 : vector<1x16x16xf32> to vector<16x16xf32>
    %cst_42 = arith.constant dense<0.000000e+00> : vector<16x16xf32>
    %83 = tpu.matmul %80, %82, %cst_42 {dimension_numbers = #tpu.dot_dimension_numbers<[1], [0], [0], [1], [0, 0, 1, 1], [], []>} : vector<16x16xf32>, vector<16x16xf32>, vector<16x16xf32> -> vector<16x16xf32>
    %84 = arith.addf %79, %83 : vector<16x16xf32>
    %85 = vector.extract_strided_slice %74 {offsets = [32, 0], sizes = [16, 16], strides = [1, 1]} : vector<144x16xf32> to vector<16x16xf32>
    %86 = vector.extract_strided_slice %75 {offsets = [2, 0, 0], sizes = [1, 16, 16], strides = [1, 1, 1]} : vector<9x16x16xf32> to vector<1x16x16xf32>
    %87 = vector.shape_cast %86 : vector<1x16x16xf32> to vector<16x16xf32>
    %cst_43 = arith.constant dense<0.000000e+00> : vector<16x16xf32>
    %88 = tpu.matmul %85, %87, %cst_43 {dimension_numbers = #tpu.dot_dimension_numbers<[1], [0], [0], [1], [0, 0, 1, 1], [], []>} : vector<16x16xf32>, vector<16x16xf32>, vector<16x16xf32> -> vector<16x16xf32>
    %89 = arith.addf %84, %88 : vector<16x16xf32>
    %90 = vector.extract_strided_slice %74 {offsets = [48, 0], sizes = [16, 16], strides = [1, 1]} : vector<144x16xf32> to vector<16x16xf32>
    %91 = vector.extract_strided_slice %75 {offsets = [3, 0, 0], sizes = [1, 16, 16], strides = [1, 1, 1]} : vector<9x16x16xf32> to vector<1x16x16xf32>
    %92 = vector.shape_cast %91 : vector<1x16x16xf32> to vector<16x16xf32>
    %cst_44 = arith.constant dense<0.000000e+00> : vector<16x16xf32>
    %93 = tpu.matmul %90, %92, %cst_44 {dimension_numbers = #tpu.dot_dimension_numbers<[1], [0], [0], [1], [0, 0, 1, 1], [], []>} : vector<16x16xf32>, vector<16x16xf32>, vector<16x16xf32> -> vector<16x16xf32>
    %94 = arith.addf %89, %93 : vector<16x16xf32>
    %95 = vector.extract_strided_slice %74 {offsets = [64, 0], sizes = [16, 16], strides = [1, 1]} : vector<144x16xf32> to vector<16x16xf32>
    %96 = vector.extract_strided_slice %75 {offsets = [4, 0, 0], sizes = [1, 16, 16], strides = [1, 1, 1]} : vector<9x16x16xf32> to vector<1x16x16xf32>
    %97 = vector.shape_cast %96 : vector<1x16x16xf32> to vector<16x16xf32>
    %cst_45 = arith.constant dense<0.000000e+00> : vector<16x16xf32>
    %98 = tpu.matmul %95, %97, %cst_45 {dimension_numbers = #tpu.dot_dimension_numbers<[1], [0], [0], [1], [0, 0, 1, 1], [], []>} : vector<16x16xf32>, vector<16x16xf32>, vector<16x16xf32> -> vector<16x16xf32>
    %99 = arith.addf %94, %98 : vector<16x16xf32>
    %100 = vector.extract_strided_slice %74 {offsets = [80, 0], sizes = [16, 16], strides = [1, 1]} : vector<144x16xf32> to vector<16x16xf32>
    %101 = vector.extract_strided_slice %75 {offsets = [5, 0, 0], sizes = [1, 16, 16], strides = [1, 1, 1]} : vector<9x16x16xf32> to vector<1x16x16xf32>
    %102 = vector.shape_cast %101 : vector<1x16x16xf32> to vector<16x16xf32>
    %cst_46 = arith.constant dense<0.000000e+00> : vector<16x16xf32>
    %103 = tpu.matmul %100, %102, %cst_46 {dimension_numbers = #tpu.dot_dimension_numbers<[1], [0], [0], [1], [0, 0, 1, 1], [], []>} : vector<16x16xf32>, vector<16x16xf32>, vector<16x16xf32> -> vector<16x16xf32>
    %104 = arith.addf %99, %103 : vector<16x16xf32>
    %105 = vector.extract_strided_slice %74 {offsets = [96, 0], sizes = [16, 16], strides = [1, 1]} : vector<144x16xf32> to vector<16x16xf32>
    %106 = vector.extract_strided_slice %75 {offsets = [6, 0, 0], sizes = [1, 16, 16], strides = [1, 1, 1]} : vector<9x16x16xf32> to vector<1x16x16xf32>
    %107 = vector.shape_cast %106 : vector<1x16x16xf32> to vector<16x16xf32>
    %cst_47 = arith.constant dense<0.000000e+00> : vector<16x16xf32>
    %108 = tpu.matmul %105, %107, %cst_47 {dimension_numbers = #tpu.dot_dimension_numbers<[1], [0], [0], [1], [0, 0, 1, 1], [], []>} : vector<16x16xf32>, vector<16x16xf32>, vector<16x16xf32> -> vector<16x16xf32>
    %109 = arith.addf %104, %108 : vector<16x16xf32>
    %110 = vector.extract_strided_slice %74 {offsets = [112, 0], sizes = [16, 16], strides = [1, 1]} : vector<144x16xf32> to vector<16x16xf32>
    %111 = vector.extract_strided_slice %75 {offsets = [7, 0, 0], sizes = [1, 16, 16], strides = [1, 1, 1]} : vector<9x16x16xf32> to vector<1x16x16xf32>
    %112 = vector.shape_cast %111 : vector<1x16x16xf32> to vector<16x16xf32>
    %cst_48 = arith.constant dense<0.000000e+00> : vector<16x16xf32>
    %113 = tpu.matmul %110, %112, %cst_48 {dimension_numbers = #tpu.dot_dimension_numbers<[1], [0], [0], [1], [0, 0, 1, 1], [], []>} : vector<16x16xf32>, vector<16x16xf32>, vector<16x16xf32> -> vector<16x16xf32>
    %114 = arith.addf %109, %113 : vector<16x16xf32>
    %115 = vector.extract_strided_slice %74 {offsets = [128, 0], sizes = [16, 16], strides = [1, 1]} : vector<144x16xf32> to vector<16x16xf32>
    %116 = vector.extract_strided_slice %75 {offsets = [8, 0, 0], sizes = [1, 16, 16], strides = [1, 1, 1]} : vector<9x16x16xf32> to vector<1x16x16xf32>
    %117 = vector.shape_cast %116 : vector<1x16x16xf32> to vector<16x16xf32>
    %cst_49 = arith.constant dense<0.000000e+00> : vector<16x16xf32>
    %118 = tpu.matmul %115, %117, %cst_49 {dimension_numbers = #tpu.dot_dimension_numbers<[1], [0], [0], [1], [0, 0, 1, 1], [], []>} : vector<16x16xf32>, vector<16x16xf32>, vector<16x16xf32> -> vector<16x16xf32>
    %119 = arith.addf %114, %118 : vector<16x16xf32>
    %120 = vector.broadcast %6 : vector<1x16xf32> to vector<16x16xf32>
    %121 = arith.addf %119, %120 : vector<16x16xf32>
    %cst_50 = arith.constant 0.000000e+00 : f32
    %122 = vector.broadcast %cst_50 : f32 to vector<16x16xf32>
    %123 = arith.cmpf oge, %121, %122 : vector<16x16xf32>
    %cst_51 = arith.constant 2.000000e-01 : f32
    %124 = vector.broadcast %cst_51 : f32 to vector<16x16xf32>
    %125 = arith.mulf %124, %121 : vector<16x16xf32>
    %126 = arith.select %123, %121, %125 : vector<16x16xi1>, vector<16x16xf32>
    %c0_52 = arith.constant 0 : index
    %c0_53 = arith.constant 0 : index
    %127 = vector.load %arg7[%c0_52, %c0_53] : memref<72x16xbf16, #tpu.memory_space<vmem>>, vector<72x16xbf16>
    %128 = arith.truncf %126 : vector<16x16xf32> to vector<16x16xbf16>
    %cst_54 = arith.constant dense<0.000000e+00> : vector<72x16xf32>
    %129 = tpu.matmul %127, %128, %cst_54 {dimension_numbers = #tpu.dot_dimension_numbers<[1], [0], [0], [1], [0, 0, 1, 1], [], []>} : vector<72x16xbf16>, vector<16x16xbf16>, vector<72x16xf32> -> vector<72x16xf32>
    %c0_55 = arith.constant 0 : index
    %c0_56 = arith.constant 0 : index
    %c0_57 = arith.constant 0 : index
    %130 = vector.load %arg10[%c0_55, %c0_56, %c0_57] : memref<9x16x16xf32, #tpu.memory_space<vmem>>, vector<9x16x16xf32>
    %131 = vector.extract_strided_slice %129 {offsets = [0, 0], sizes = [8, 16], strides = [1, 1]} : vector<72x16xf32> to vector<8x16xf32>
    %132 = vector.extract_strided_slice %130 {offsets = [0, 0, 0], sizes = [1, 16, 16], strides = [1, 1, 1]} : vector<9x16x16xf32> to vector<1x16x16xf32>
    %133 = vector.shape_cast %132 : vector<1x16x16xf32> to vector<16x16xf32>
    %cst_58 = arith.constant dense<0.000000e+00> : vector<8x16xf32>
    %134 = tpu.matmul %131, %133, %cst_58 {dimension_numbers = #tpu.dot_dimension_numbers<[1], [0], [0], [1], [0, 0, 1, 1], [], []>} : vector<8x16xf32>, vector<16x16xf32>, vector<8x16xf32> -> vector<8x16xf32>
    %135 = vector.extract_strided_slice %129 {offsets = [8, 0], sizes = [8, 16], strides = [1, 1]} : vector<72x16xf32> to vector<8x16xf32>
    %136 = vector.extract_strided_slice %130 {offsets = [1, 0, 0], sizes = [1, 16, 16], strides = [1, 1, 1]} : vector<9x16x16xf32> to vector<1x16x16xf32>
    %137 = vector.shape_cast %136 : vector<1x16x16xf32> to vector<16x16xf32>
    %cst_59 = arith.constant dense<0.000000e+00> : vector<8x16xf32>
    %138 = tpu.matmul %135, %137, %cst_59 {dimension_numbers = #tpu.dot_dimension_numbers<[1], [0], [0], [1], [0, 0, 1, 1], [], []>} : vector<8x16xf32>, vector<16x16xf32>, vector<8x16xf32> -> vector<8x16xf32>
    %139 = arith.addf %134, %138 : vector<8x16xf32>
    %140 = vector.extract_strided_slice %129 {offsets = [16, 0], sizes = [8, 16], strides = [1, 1]} : vector<72x16xf32> to vector<8x16xf32>
    %141 = vector.extract_strided_slice %130 {offsets = [2, 0, 0], sizes = [1, 16, 16], strides = [1, 1, 1]} : vector<9x16x16xf32> to vector<1x16x16xf32>
    %142 = vector.shape_cast %141 : vector<1x16x16xf32> to vector<16x16xf32>
    %cst_60 = arith.constant dense<0.000000e+00> : vector<8x16xf32>
    %143 = tpu.matmul %140, %142, %cst_60 {dimension_numbers = #tpu.dot_dimension_numbers<[1], [0], [0], [1], [0, 0, 1, 1], [], []>} : vector<8x16xf32>, vector<16x16xf32>, vector<8x16xf32> -> vector<8x16xf32>
    %144 = arith.addf %139, %143 : vector<8x16xf32>
    %145 = vector.extract_strided_slice %129 {offsets = [24, 0], sizes = [8, 16], strides = [1, 1]} : vector<72x16xf32> to vector<8x16xf32>
    %146 = vector.extract_strided_slice %130 {offsets = [3, 0, 0], sizes = [1, 16, 16], strides = [1, 1, 1]} : vector<9x16x16xf32> to vector<1x16x16xf32>
    %147 = vector.shape_cast %146 : vector<1x16x16xf32> to vector<16x16xf32>
    %cst_61 = arith.constant dense<0.000000e+00> : vector<8x16xf32>
    %148 = tpu.matmul %145, %147, %cst_61 {dimension_numbers = #tpu.dot_dimension_numbers<[1], [0], [0], [1], [0, 0, 1, 1], [], []>} : vector<8x16xf32>, vector<16x16xf32>, vector<8x16xf32> -> vector<8x16xf32>
    %149 = arith.addf %144, %148 : vector<8x16xf32>
    %150 = vector.extract_strided_slice %129 {offsets = [32, 0], sizes = [8, 16], strides = [1, 1]} : vector<72x16xf32> to vector<8x16xf32>
    %151 = vector.extract_strided_slice %130 {offsets = [4, 0, 0], sizes = [1, 16, 16], strides = [1, 1, 1]} : vector<9x16x16xf32> to vector<1x16x16xf32>
    %152 = vector.shape_cast %151 : vector<1x16x16xf32> to vector<16x16xf32>
    %cst_62 = arith.constant dense<0.000000e+00> : vector<8x16xf32>
    %153 = tpu.matmul %150, %152, %cst_62 {dimension_numbers = #tpu.dot_dimension_numbers<[1], [0], [0], [1], [0, 0, 1, 1], [], []>} : vector<8x16xf32>, vector<16x16xf32>, vector<8x16xf32> -> vector<8x16xf32>
    %154 = arith.addf %149, %153 : vector<8x16xf32>
    %155 = vector.extract_strided_slice %129 {offsets = [40, 0], sizes = [8, 16], strides = [1, 1]} : vector<72x16xf32> to vector<8x16xf32>
    %156 = vector.extract_strided_slice %130 {offsets = [5, 0, 0], sizes = [1, 16, 16], strides = [1, 1, 1]} : vector<9x16x16xf32> to vector<1x16x16xf32>
    %157 = vector.shape_cast %156 : vector<1x16x16xf32> to vector<16x16xf32>
    %cst_63 = arith.constant dense<0.000000e+00> : vector<8x16xf32>
    %158 = tpu.matmul %155, %157, %cst_63 {dimension_numbers = #tpu.dot_dimension_numbers<[1], [0], [0], [1], [0, 0, 1, 1], [], []>} : vector<8x16xf32>, vector<16x16xf32>, vector<8x16xf32> -> vector<8x16xf32>
    %159 = arith.addf %154, %158 : vector<8x16xf32>
    %160 = vector.extract_strided_slice %129 {offsets = [48, 0], sizes = [8, 16], strides = [1, 1]} : vector<72x16xf32> to vector<8x16xf32>
    %161 = vector.extract_strided_slice %130 {offsets = [6, 0, 0], sizes = [1, 16, 16], strides = [1, 1, 1]} : vector<9x16x16xf32> to vector<1x16x16xf32>
    %162 = vector.shape_cast %161 : vector<1x16x16xf32> to vector<16x16xf32>
    %cst_64 = arith.constant dense<0.000000e+00> : vector<8x16xf32>
    %163 = tpu.matmul %160, %162, %cst_64 {dimension_numbers = #tpu.dot_dimension_numbers<[1], [0], [0], [1], [0, 0, 1, 1], [], []>} : vector<8x16xf32>, vector<16x16xf32>, vector<8x16xf32> -> vector<8x16xf32>
    %164 = arith.addf %159, %163 : vector<8x16xf32>
    %165 = vector.extract_strided_slice %129 {offsets = [56, 0], sizes = [8, 16], strides = [1, 1]} : vector<72x16xf32> to vector<8x16xf32>
    %166 = vector.extract_strided_slice %130 {offsets = [7, 0, 0], sizes = [1, 16, 16], strides = [1, 1, 1]} : vector<9x16x16xf32> to vector<1x16x16xf32>
    %167 = vector.shape_cast %166 : vector<1x16x16xf32> to vector<16x16xf32>
    %cst_65 = arith.constant dense<0.000000e+00> : vector<8x16xf32>
    %168 = tpu.matmul %165, %167, %cst_65 {dimension_numbers = #tpu.dot_dimension_numbers<[1], [0], [0], [1], [0, 0, 1, 1], [], []>} : vector<8x16xf32>, vector<16x16xf32>, vector<8x16xf32> -> vector<8x16xf32>
    %169 = arith.addf %164, %168 : vector<8x16xf32>
    %170 = vector.extract_strided_slice %129 {offsets = [64, 0], sizes = [8, 16], strides = [1, 1]} : vector<72x16xf32> to vector<8x16xf32>
    %171 = vector.extract_strided_slice %130 {offsets = [8, 0, 0], sizes = [1, 16, 16], strides = [1, 1, 1]} : vector<9x16x16xf32> to vector<1x16x16xf32>
    %172 = vector.shape_cast %171 : vector<1x16x16xf32> to vector<16x16xf32>
    %cst_66 = arith.constant dense<0.000000e+00> : vector<8x16xf32>
    %173 = tpu.matmul %170, %172, %cst_66 {dimension_numbers = #tpu.dot_dimension_numbers<[1], [0], [0], [1], [0, 0, 1, 1], [], []>} : vector<8x16xf32>, vector<16x16xf32>, vector<8x16xf32> -> vector<8x16xf32>
    %174 = arith.addf %169, %173 : vector<8x16xf32>
    %175 = vector.broadcast %7 : vector<1x16xf32> to vector<8x16xf32>
    %176 = arith.addf %174, %175 : vector<8x16xf32>
    %cst_67 = arith.constant 0.000000e+00 : f32
    %177 = vector.broadcast %cst_67 : f32 to vector<8x16xf32>
    %178 = arith.cmpf oge, %176, %177 : vector<8x16xf32>
    %cst_68 = arith.constant 2.000000e-01 : f32
    %179 = vector.broadcast %cst_68 : f32 to vector<8x16xf32>
    %180 = arith.mulf %179, %176 : vector<8x16xf32>
    %181 = arith.select %178, %176, %180 : vector<8x16xi1>, vector<8x16xf32>
    %182 = vector.extract_strided_slice %181 {offsets = [0, 0], sizes = [1, 16], strides = [1, 1]} : vector<8x16xf32> to vector<1x16xf32>
    %183 = vector.extract_strided_slice %12 {offsets = [0, 0, 0], sizes = [1, 16, 32], strides = [1, 1, 1]} : vector<4x16x32xf32> to vector<1x16x32xf32>
    %184 = vector.shape_cast %183 : vector<1x16x32xf32> to vector<16x32xf32>
    %cst_69 = arith.constant dense<0.000000e+00> : vector<1x32xf32>
    %185 = tpu.matmul %182, %184, %cst_69 {dimension_numbers = #tpu.dot_dimension_numbers<[1], [0], [0], [1], [0, 0, 1, 1], [], []>} : vector<1x16xf32>, vector<16x32xf32>, vector<1x32xf32> -> vector<1x32xf32>
    %186 = vector.extract_strided_slice %181 {offsets = [1, 0], sizes = [1, 16], strides = [1, 1]} : vector<8x16xf32> to vector<1x16xf32>
    %187 = vector.extract_strided_slice %12 {offsets = [1, 0, 0], sizes = [1, 16, 32], strides = [1, 1, 1]} : vector<4x16x32xf32> to vector<1x16x32xf32>
    %188 = vector.shape_cast %187 : vector<1x16x32xf32> to vector<16x32xf32>
    %cst_70 = arith.constant dense<0.000000e+00> : vector<1x32xf32>
    %189 = tpu.matmul %186, %188, %cst_70 {dimension_numbers = #tpu.dot_dimension_numbers<[1], [0], [0], [1], [0, 0, 1, 1], [], []>} : vector<1x16xf32>, vector<16x32xf32>, vector<1x32xf32> -> vector<1x32xf32>
    %190 = arith.addf %185, %189 : vector<1x32xf32>
    %191 = vector.extract_strided_slice %181 {offsets = [2, 0], sizes = [1, 16], strides = [1, 1]} : vector<8x16xf32> to vector<1x16xf32>
    %192 = vector.extract_strided_slice %12 {offsets = [2, 0, 0], sizes = [1, 16, 32], strides = [1, 1, 1]} : vector<4x16x32xf32> to vector<1x16x32xf32>
    %193 = vector.shape_cast %192 : vector<1x16x32xf32> to vector<16x32xf32>
    %cst_71 = arith.constant dense<0.000000e+00> : vector<1x32xf32>
    %194 = tpu.matmul %191, %193, %cst_71 {dimension_numbers = #tpu.dot_dimension_numbers<[1], [0], [0], [1], [0, 0, 1, 1], [], []>} : vector<1x16xf32>, vector<16x32xf32>, vector<1x32xf32> -> vector<1x32xf32>
    %195 = arith.addf %190, %194 : vector<1x32xf32>
    %196 = vector.extract_strided_slice %181 {offsets = [3, 0], sizes = [1, 16], strides = [1, 1]} : vector<8x16xf32> to vector<1x16xf32>
    %197 = vector.extract_strided_slice %12 {offsets = [3, 0, 0], sizes = [1, 16, 32], strides = [1, 1, 1]} : vector<4x16x32xf32> to vector<1x16x32xf32>
    %198 = vector.shape_cast %197 : vector<1x16x32xf32> to vector<16x32xf32>
    %cst_72 = arith.constant dense<0.000000e+00> : vector<1x32xf32>
    %199 = tpu.matmul %196, %198, %cst_72 {dimension_numbers = #tpu.dot_dimension_numbers<[1], [0], [0], [1], [0, 0, 1, 1], [], []>} : vector<1x16xf32>, vector<16x32xf32>, vector<1x32xf32> -> vector<1x32xf32>
    %200 = arith.addf %195, %199 : vector<1x32xf32>
    %201 = vector.extract_strided_slice %13 {offsets = [0, 1, 0, 0], sizes = [1, 1, 4, 256], strides = [1, 1, 1, 1]} : vector<1x2x4x256xf32> to vector<1x1x4x256xf32>
    %202 = vector.shape_cast %201 : vector<1x1x4x256xf32> to vector<4x256xf32>
    %203 = tpu.transpose %202, [1, 0] : vector<4x256xf32> -> vector<256x4xf32>
    %c0_73 = arith.constant 0 : index
    %c0_74 = arith.constant 0 : index
    %204 = vector.load %arg5[%c0_73, %c0_74] : memref<576x256xbf16, #tpu.memory_space<vmem>>, vector<576x256xbf16>
    %205 = arith.truncf %203 : vector<256x4xf32> to vector<256x4xbf16>
    %cst_75 = arith.constant dense<0.000000e+00> : vector<576x4xf32>
    %206 = tpu.matmul %204, %205, %cst_75 {dimension_numbers = #tpu.dot_dimension_numbers<[1], [0], [0], [1], [0, 0, 1, 1], [], []>} : vector<576x256xbf16>, vector<256x4xbf16>, vector<576x4xf32> -> vector<576x4xf32>
    %c0_76 = arith.constant 0 : index
    %c0_77 = arith.constant 0 : index
    %c0_78 = arith.constant 0 : index
    %207 = vector.load %arg8[%c0_76, %c0_77, %c0_78] : memref<9x4x16xf32, #tpu.memory_space<vmem>>, vector<9x4x16xf32>
    %208 = vector.extract_strided_slice %206 {offsets = [0, 0], sizes = [64, 4], strides = [1, 1]} : vector<576x4xf32> to vector<64x4xf32>
    %209 = vector.extract_strided_slice %207 {offsets = [0, 0, 0], sizes = [1, 4, 16], strides = [1, 1, 1]} : vector<9x4x16xf32> to vector<1x4x16xf32>
    %210 = vector.shape_cast %209 : vector<1x4x16xf32> to vector<4x16xf32>
    %cst_79 = arith.constant dense<0.000000e+00> : vector<64x16xf32>
    %211 = tpu.matmul %208, %210, %cst_79 {dimension_numbers = #tpu.dot_dimension_numbers<[1], [0], [0], [1], [0, 0, 1, 1], [], []>} : vector<64x4xf32>, vector<4x16xf32>, vector<64x16xf32> -> vector<64x16xf32>
    %212 = vector.extract_strided_slice %206 {offsets = [64, 0], sizes = [64, 4], strides = [1, 1]} : vector<576x4xf32> to vector<64x4xf32>
    %213 = vector.extract_strided_slice %207 {offsets = [1, 0, 0], sizes = [1, 4, 16], strides = [1, 1, 1]} : vector<9x4x16xf32> to vector<1x4x16xf32>
    %214 = vector.shape_cast %213 : vector<1x4x16xf32> to vector<4x16xf32>
    %cst_80 = arith.constant dense<0.000000e+00> : vector<64x16xf32>
    %215 = tpu.matmul %212, %214, %cst_80 {dimension_numbers = #tpu.dot_dimension_numbers<[1], [0], [0], [1], [0, 0, 1, 1], [], []>} : vector<64x4xf32>, vector<4x16xf32>, vector<64x16xf32> -> vector<64x16xf32>
    %216 = arith.addf %211, %215 : vector<64x16xf32>
    %217 = vector.extract_strided_slice %206 {offsets = [128, 0], sizes = [64, 4], strides = [1, 1]} : vector<576x4xf32> to vector<64x4xf32>
    %218 = vector.extract_strided_slice %207 {offsets = [2, 0, 0], sizes = [1, 4, 16], strides = [1, 1, 1]} : vector<9x4x16xf32> to vector<1x4x16xf32>
    %219 = vector.shape_cast %218 : vector<1x4x16xf32> to vector<4x16xf32>
    %cst_81 = arith.constant dense<0.000000e+00> : vector<64x16xf32>
    %220 = tpu.matmul %217, %219, %cst_81 {dimension_numbers = #tpu.dot_dimension_numbers<[1], [0], [0], [1], [0, 0, 1, 1], [], []>} : vector<64x4xf32>, vector<4x16xf32>, vector<64x16xf32> -> vector<64x16xf32>
    %221 = arith.addf %216, %220 : vector<64x16xf32>
    %222 = vector.extract_strided_slice %206 {offsets = [192, 0], sizes = [64, 4], strides = [1, 1]} : vector<576x4xf32> to vector<64x4xf32>
    %223 = vector.extract_strided_slice %207 {offsets = [3, 0, 0], sizes = [1, 4, 16], strides = [1, 1, 1]} : vector<9x4x16xf32> to vector<1x4x16xf32>
    %224 = vector.shape_cast %223 : vector<1x4x16xf32> to vector<4x16xf32>
    %cst_82 = arith.constant dense<0.000000e+00> : vector<64x16xf32>
    %225 = tpu.matmul %222, %224, %cst_82 {dimension_numbers = #tpu.dot_dimension_numbers<[1], [0], [0], [1], [0, 0, 1, 1], [], []>} : vector<64x4xf32>, vector<4x16xf32>, vector<64x16xf32> -> vector<64x16xf32>
    %226 = arith.addf %221, %225 : vector<64x16xf32>
    %227 = vector.extract_strided_slice %206 {offsets = [256, 0], sizes = [64, 4], strides = [1, 1]} : vector<576x4xf32> to vector<64x4xf32>
    %228 = vector.extract_strided_slice %207 {offsets = [4, 0, 0], sizes = [1, 4, 16], strides = [1, 1, 1]} : vector<9x4x16xf32> to vector<1x4x16xf32>
    %229 = vector.shape_cast %228 : vector<1x4x16xf32> to vector<4x16xf32>
    %cst_83 = arith.constant dense<0.000000e+00> : vector<64x16xf32>
    %230 = tpu.matmul %227, %229, %cst_83 {dimension_numbers = #tpu.dot_dimension_numbers<[1], [0], [0], [1], [0, 0, 1, 1], [], []>} : vector<64x4xf32>, vector<4x16xf32>, vector<64x16xf32> -> vector<64x16xf32>
    %231 = arith.addf %226, %230 : vector<64x16xf32>
    %232 = vector.extract_strided_slice %206 {offsets = [320, 0], sizes = [64, 4], strides = [1, 1]} : vector<576x4xf32> to vector<64x4xf32>
    %233 = vector.extract_strided_slice %207 {offsets = [5, 0, 0], sizes = [1, 4, 16], strides = [1, 1, 1]} : vector<9x4x16xf32> to vector<1x4x16xf32>
    %234 = vector.shape_cast %233 : vector<1x4x16xf32> to vector<4x16xf32>
    %cst_84 = arith.constant dense<0.000000e+00> : vector<64x16xf32>
    %235 = tpu.matmul %232, %234, %cst_84 {dimension_numbers = #tpu.dot_dimension_numbers<[1], [0], [0], [1], [0, 0, 1, 1], [], []>} : vector<64x4xf32>, vector<4x16xf32>, vector<64x16xf32> -> vector<64x16xf32>
    %236 = arith.addf %231, %235 : vector<64x16xf32>
    %237 = vector.extract_strided_slice %206 {offsets = [384, 0], sizes = [64, 4], strides = [1, 1]} : vector<576x4xf32> to vector<64x4xf32>
    %238 = vector.extract_strided_slice %207 {offsets = [6, 0, 0], sizes = [1, 4, 16], strides = [1, 1, 1]} : vector<9x4x16xf32> to vector<1x4x16xf32>
    %239 = vector.shape_cast %238 : vector<1x4x16xf32> to vector<4x16xf32>
    %cst_85 = arith.constant dense<0.000000e+00> : vector<64x16xf32>
    %240 = tpu.matmul %237, %239, %cst_85 {dimension_numbers = #tpu.dot_dimension_numbers<[1], [0], [0], [1], [0, 0, 1, 1], [], []>} : vector<64x4xf32>, vector<4x16xf32>, vector<64x16xf32> -> vector<64x16xf32>
    %241 = arith.addf %236, %240 : vector<64x16xf32>
    %242 = vector.extract_strided_slice %206 {offsets = [448, 0], sizes = [64, 4], strides = [1, 1]} : vector<576x4xf32> to vector<64x4xf32>
    %243 = vector.extract_strided_slice %207 {offsets = [7, 0, 0], sizes = [1, 4, 16], strides = [1, 1, 1]} : vector<9x4x16xf32> to vector<1x4x16xf32>
    %244 = vector.shape_cast %243 : vector<1x4x16xf32> to vector<4x16xf32>
    %cst_86 = arith.constant dense<0.000000e+00> : vector<64x16xf32>
    %245 = tpu.matmul %242, %244, %cst_86 {dimension_numbers = #tpu.dot_dimension_numbers<[1], [0], [0], [1], [0, 0, 1, 1], [], []>} : vector<64x4xf32>, vector<4x16xf32>, vector<64x16xf32> -> vector<64x16xf32>
    %246 = arith.addf %241, %245 : vector<64x16xf32>
    %247 = vector.extract_strided_slice %206 {offsets = [512, 0], sizes = [64, 4], strides = [1, 1]} : vector<576x4xf32> to vector<64x4xf32>
    %248 = vector.extract_strided_slice %207 {offsets = [8, 0, 0], sizes = [1, 4, 16], strides = [1, 1, 1]} : vector<9x4x16xf32> to vector<1x4x16xf32>
    %249 = vector.shape_cast %248 : vector<1x4x16xf32> to vector<4x16xf32>
    %cst_87 = arith.constant dense<0.000000e+00> : vector<64x16xf32>
    %250 = tpu.matmul %247, %249, %cst_87 {dimension_numbers = #tpu.dot_dimension_numbers<[1], [0], [0], [1], [0, 0, 1, 1], [], []>} : vector<64x4xf32>, vector<4x16xf32>, vector<64x16xf32> -> vector<64x16xf32>
    %251 = arith.addf %246, %250 : vector<64x16xf32>
    %252 = vector.broadcast %5 : vector<1x16xf32> to vector<64x16xf32>
    %253 = arith.addf %251, %252 : vector<64x16xf32>
    %cst_88 = arith.constant 0.000000e+00 : f32
    %254 = vector.broadcast %cst_88 : f32 to vector<64x16xf32>
    %255 = arith.cmpf oge, %253, %254 : vector<64x16xf32>
    %cst_89 = arith.constant 2.000000e-01 : f32
    %256 = vector.broadcast %cst_89 : f32 to vector<64x16xf32>
    %257 = arith.mulf %256, %253 : vector<64x16xf32>
    %258 = arith.select %255, %253, %257 : vector<64x16xi1>, vector<64x16xf32>
    %c0_90 = arith.constant 0 : index
    %c0_91 = arith.constant 0 : index
    %259 = vector.load %arg6[%c0_90, %c0_91] : memref<144x64xbf16, #tpu.memory_space<vmem>>, vector<144x64xbf16>
    %260 = arith.truncf %258 : vector<64x16xf32> to vector<64x16xbf16>
    %cst_92 = arith.constant dense<0.000000e+00> : vector<144x16xf32>
    %261 = tpu.matmul %259, %260, %cst_92 {dimension_numbers = #tpu.dot_dimension_numbers<[1], [0], [0], [1], [0, 0, 1, 1], [], []>} : vector<144x64xbf16>, vector<64x16xbf16>, vector<144x16xf32> -> vector<144x16xf32>
    %c0_93 = arith.constant 0 : index
    %c0_94 = arith.constant 0 : index
    %c0_95 = arith.constant 0 : index
    %262 = vector.load %arg9[%c0_93, %c0_94, %c0_95] : memref<9x16x16xf32, #tpu.memory_space<vmem>>, vector<9x16x16xf32>
    %263 = vector.extract_strided_slice %261 {offsets = [0, 0], sizes = [16, 16], strides = [1, 1]} : vector<144x16xf32> to vector<16x16xf32>
    %264 = vector.extract_strided_slice %262 {offsets = [0, 0, 0], sizes = [1, 16, 16], strides = [1, 1, 1]} : vector<9x16x16xf32> to vector<1x16x16xf32>
    %265 = vector.shape_cast %264 : vector<1x16x16xf32> to vector<16x16xf32>
    %cst_96 = arith.constant dense<0.000000e+00> : vector<16x16xf32>
    %266 = tpu.matmul %263, %265, %cst_96 {dimension_numbers = #tpu.dot_dimension_numbers<[1], [0], [0], [1], [0, 0, 1, 1], [], []>} : vector<16x16xf32>, vector<16x16xf32>, vector<16x16xf32> -> vector<16x16xf32>
    %267 = vector.extract_strided_slice %261 {offsets = [16, 0], sizes = [16, 16], strides = [1, 1]} : vector<144x16xf32> to vector<16x16xf32>
    %268 = vector.extract_strided_slice %262 {offsets = [1, 0, 0], sizes = [1, 16, 16], strides = [1, 1, 1]} : vector<9x16x16xf32> to vector<1x16x16xf32>
    %269 = vector.shape_cast %268 : vector<1x16x16xf32> to vector<16x16xf32>
    %cst_97 = arith.constant dense<0.000000e+00> : vector<16x16xf32>
    %270 = tpu.matmul %267, %269, %cst_97 {dimension_numbers = #tpu.dot_dimension_numbers<[1], [0], [0], [1], [0, 0, 1, 1], [], []>} : vector<16x16xf32>, vector<16x16xf32>, vector<16x16xf32> -> vector<16x16xf32>
    %271 = arith.addf %266, %270 : vector<16x16xf32>
    %272 = vector.extract_strided_slice %261 {offsets = [32, 0], sizes = [16, 16], strides = [1, 1]} : vector<144x16xf32> to vector<16x16xf32>
    %273 = vector.extract_strided_slice %262 {offsets = [2, 0, 0], sizes = [1, 16, 16], strides = [1, 1, 1]} : vector<9x16x16xf32> to vector<1x16x16xf32>
    %274 = vector.shape_cast %273 : vector<1x16x16xf32> to vector<16x16xf32>
    %cst_98 = arith.constant dense<0.000000e+00> : vector<16x16xf32>
    %275 = tpu.matmul %272, %274, %cst_98 {dimension_numbers = #tpu.dot_dimension_numbers<[1], [0], [0], [1], [0, 0, 1, 1], [], []>} : vector<16x16xf32>, vector<16x16xf32>, vector<16x16xf32> -> vector<16x16xf32>
    %276 = arith.addf %271, %275 : vector<16x16xf32>
    %277 = vector.extract_strided_slice %261 {offsets = [48, 0], sizes = [16, 16], strides = [1, 1]} : vector<144x16xf32> to vector<16x16xf32>
    %278 = vector.extract_strided_slice %262 {offsets = [3, 0, 0], sizes = [1, 16, 16], strides = [1, 1, 1]} : vector<9x16x16xf32> to vector<1x16x16xf32>
    %279 = vector.shape_cast %278 : vector<1x16x16xf32> to vector<16x16xf32>
    %cst_99 = arith.constant dense<0.000000e+00> : vector<16x16xf32>
    %280 = tpu.matmul %277, %279, %cst_99 {dimension_numbers = #tpu.dot_dimension_numbers<[1], [0], [0], [1], [0, 0, 1, 1], [], []>} : vector<16x16xf32>, vector<16x16xf32>, vector<16x16xf32> -> vector<16x16xf32>
    %281 = arith.addf %276, %280 : vector<16x16xf32>
    %282 = vector.extract_strided_slice %261 {offsets = [64, 0], sizes = [16, 16], strides = [1, 1]} : vector<144x16xf32> to vector<16x16xf32>
    %283 = vector.extract_strided_slice %262 {offsets = [4, 0, 0], sizes = [1, 16, 16], strides = [1, 1, 1]} : vector<9x16x16xf32> to vector<1x16x16xf32>
    %284 = vector.shape_cast %283 : vector<1x16x16xf32> to vector<16x16xf32>
    %cst_100 = arith.constant dense<0.000000e+00> : vector<16x16xf32>
    %285 = tpu.matmul %282, %284, %cst_100 {dimension_numbers = #tpu.dot_dimension_numbers<[1], [0], [0], [1], [0, 0, 1, 1], [], []>} : vector<16x16xf32>, vector<16x16xf32>, vector<16x16xf32> -> vector<16x16xf32>
    %286 = arith.addf %281, %285 : vector<16x16xf32>
    %287 = vector.extract_strided_slice %261 {offsets = [80, 0], sizes = [16, 16], strides = [1, 1]} : vector<144x16xf32> to vector<16x16xf32>
    %288 = vector.extract_strided_slice %262 {offsets = [5, 0, 0], sizes = [1, 16, 16], strides = [1, 1, 1]} : vector<9x16x16xf32> to vector<1x16x16xf32>
    %289 = vector.shape_cast %288 : vector<1x16x16xf32> to vector<16x16xf32>
    %cst_101 = arith.constant dense<0.000000e+00> : vector<16x16xf32>
    %290 = tpu.matmul %287, %289, %cst_101 {dimension_numbers = #tpu.dot_dimension_numbers<[1], [0], [0], [1], [0, 0, 1, 1], [], []>} : vector<16x16xf32>, vector<16x16xf32>, vector<16x16xf32> -> vector<16x16xf32>
    %291 = arith.addf %286, %290 : vector<16x16xf32>
    %292 = vector.extract_strided_slice %261 {offsets = [96, 0], sizes = [16, 16], strides = [1, 1]} : vector<144x16xf32> to vector<16x16xf32>
    %293 = vector.extract_strided_slice %262 {offsets = [6, 0, 0], sizes = [1, 16, 16], strides = [1, 1, 1]} : vector<9x16x16xf32> to vector<1x16x16xf32>
    %294 = vector.shape_cast %293 : vector<1x16x16xf32> to vector<16x16xf32>
    %cst_102 = arith.constant dense<0.000000e+00> : vector<16x16xf32>
    %295 = tpu.matmul %292, %294, %cst_102 {dimension_numbers = #tpu.dot_dimension_numbers<[1], [0], [0], [1], [0, 0, 1, 1], [], []>} : vector<16x16xf32>, vector<16x16xf32>, vector<16x16xf32> -> vector<16x16xf32>
    %296 = arith.addf %291, %295 : vector<16x16xf32>
    %297 = vector.extract_strided_slice %261 {offsets = [112, 0], sizes = [16, 16], strides = [1, 1]} : vector<144x16xf32> to vector<16x16xf32>
    %298 = vector.extract_strided_slice %262 {offsets = [7, 0, 0], sizes = [1, 16, 16], strides = [1, 1, 1]} : vector<9x16x16xf32> to vector<1x16x16xf32>
    %299 = vector.shape_cast %298 : vector<1x16x16xf32> to vector<16x16xf32>
    %cst_103 = arith.constant dense<0.000000e+00> : vector<16x16xf32>
    %300 = tpu.matmul %297, %299, %cst_103 {dimension_numbers = #tpu.dot_dimension_numbers<[1], [0], [0], [1], [0, 0, 1, 1], [], []>} : vector<16x16xf32>, vector<16x16xf32>, vector<16x16xf32> -> vector<16x16xf32>
    %301 = arith.addf %296, %300 : vector<16x16xf32>
    %302 = vector.extract_strided_slice %261 {offsets = [128, 0], sizes = [16, 16], strides = [1, 1]} : vector<144x16xf32> to vector<16x16xf32>
    %303 = vector.extract_strided_slice %262 {offsets = [8, 0, 0], sizes = [1, 16, 16], strides = [1, 1, 1]} : vector<9x16x16xf32> to vector<1x16x16xf32>
    %304 = vector.shape_cast %303 : vector<1x16x16xf32> to vector<16x16xf32>
    %cst_104 = arith.constant dense<0.000000e+00> : vector<16x16xf32>
    %305 = tpu.matmul %302, %304, %cst_104 {dimension_numbers = #tpu.dot_dimension_numbers<[1], [0], [0], [1], [0, 0, 1, 1], [], []>} : vector<16x16xf32>, vector<16x16xf32>, vector<16x16xf32> -> vector<16x16xf32>
    %306 = arith.addf %301, %305 : vector<16x16xf32>
    %307 = vector.broadcast %6 : vector<1x16xf32> to vector<16x16xf32>
    %308 = arith.addf %306, %307 : vector<16x16xf32>
    %cst_105 = arith.constant 0.000000e+00 : f32
    %309 = vector.broadcast %cst_105 : f32 to vector<16x16xf32>
    %310 = arith.cmpf oge, %308, %309 : vector<16x16xf32>
    %cst_106 = arith.constant 2.000000e-01 : f32
    %311 = vector.broadcast %cst_106 : f32 to vector<16x16xf32>
    %312 = arith.mulf %311, %308 : vector<16x16xf32>
    %313 = arith.select %310, %308, %312 : vector<16x16xi1>, vector<16x16xf32>
    %c0_107 = arith.constant 0 : index
    %c0_108 = arith.constant 0 : index
    %314 = vector.load %arg7[%c0_107, %c0_108] : memref<72x16xbf16, #tpu.memory_space<vmem>>, vector<72x16xbf16>
    %315 = arith.truncf %313 : vector<16x16xf32> to vector<16x16xbf16>
    %cst_109 = arith.constant dense<0.000000e+00> : vector<72x16xf32>
    %316 = tpu.matmul %314, %315, %cst_109 {dimension_numbers = #tpu.dot_dimension_numbers<[1], [0], [0], [1], [0, 0, 1, 1], [], []>} : vector<72x16xbf16>, vector<16x16xbf16>, vector<72x16xf32> -> vector<72x16xf32>
    %c0_110 = arith.constant 0 : index
    %c0_111 = arith.constant 0 : index
    %c0_112 = arith.constant 0 : index
    %317 = vector.load %arg10[%c0_110, %c0_111, %c0_112] : memref<9x16x16xf32, #tpu.memory_space<vmem>>, vector<9x16x16xf32>
    %318 = vector.extract_strided_slice %316 {offsets = [0, 0], sizes = [8, 16], strides = [1, 1]} : vector<72x16xf32> to vector<8x16xf32>
    %319 = vector.extract_strided_slice %317 {offsets = [0, 0, 0], sizes = [1, 16, 16], strides = [1, 1, 1]} : vector<9x16x16xf32> to vector<1x16x16xf32>
    %320 = vector.shape_cast %319 : vector<1x16x16xf32> to vector<16x16xf32>
    %cst_113 = arith.constant dense<0.000000e+00> : vector<8x16xf32>
    %321 = tpu.matmul %318, %320, %cst_113 {dimension_numbers = #tpu.dot_dimension_numbers<[1], [0], [0], [1], [0, 0, 1, 1], [], []>} : vector<8x16xf32>, vector<16x16xf32>, vector<8x16xf32> -> vector<8x16xf32>
    %322 = vector.extract_strided_slice %316 {offsets = [8, 0], sizes = [8, 16], strides = [1, 1]} : vector<72x16xf32> to vector<8x16xf32>
    %323 = vector.extract_strided_slice %317 {offsets = [1, 0, 0], sizes = [1, 16, 16], strides = [1, 1, 1]} : vector<9x16x16xf32> to vector<1x16x16xf32>
    %324 = vector.shape_cast %323 : vector<1x16x16xf32> to vector<16x16xf32>
    %cst_114 = arith.constant dense<0.000000e+00> : vector<8x16xf32>
    %325 = tpu.matmul %322, %324, %cst_114 {dimension_numbers = #tpu.dot_dimension_numbers<[1], [0], [0], [1], [0, 0, 1, 1], [], []>} : vector<8x16xf32>, vector<16x16xf32>, vector<8x16xf32> -> vector<8x16xf32>
    %326 = arith.addf %321, %325 : vector<8x16xf32>
    %327 = vector.extract_strided_slice %316 {offsets = [16, 0], sizes = [8, 16], strides = [1, 1]} : vector<72x16xf32> to vector<8x16xf32>
    %328 = vector.extract_strided_slice %317 {offsets = [2, 0, 0], sizes = [1, 16, 16], strides = [1, 1, 1]} : vector<9x16x16xf32> to vector<1x16x16xf32>
    %329 = vector.shape_cast %328 : vector<1x16x16xf32> to vector<16x16xf32>
    %cst_115 = arith.constant dense<0.000000e+00> : vector<8x16xf32>
    %330 = tpu.matmul %327, %329, %cst_115 {dimension_numbers = #tpu.dot_dimension_numbers<[1], [0], [0], [1], [0, 0, 1, 1], [], []>} : vector<8x16xf32>, vector<16x16xf32>, vector<8x16xf32> -> vector<8x16xf32>
    %331 = arith.addf %326, %330 : vector<8x16xf32>
    %332 = vector.extract_strided_slice %316 {offsets = [24, 0], sizes = [8, 16], strides = [1, 1]} : vector<72x16xf32> to vector<8x16xf32>
    %333 = vector.extract_strided_slice %317 {offsets = [3, 0, 0], sizes = [1, 16, 16], strides = [1, 1, 1]} : vector<9x16x16xf32> to vector<1x16x16xf32>
    %334 = vector.shape_cast %333 : vector<1x16x16xf32> to vector<16x16xf32>
    %cst_116 = arith.constant dense<0.000000e+00> : vector<8x16xf32>
    %335 = tpu.matmul %332, %334, %cst_116 {dimension_numbers = #tpu.dot_dimension_numbers<[1], [0], [0], [1], [0, 0, 1, 1], [], []>} : vector<8x16xf32>, vector<16x16xf32>, vector<8x16xf32> -> vector<8x16xf32>
    %336 = arith.addf %331, %335 : vector<8x16xf32>
    %337 = vector.extract_strided_slice %316 {offsets = [32, 0], sizes = [8, 16], strides = [1, 1]} : vector<72x16xf32> to vector<8x16xf32>
    %338 = vector.extract_strided_slice %317 {offsets = [4, 0, 0], sizes = [1, 16, 16], strides = [1, 1, 1]} : vector<9x16x16xf32> to vector<1x16x16xf32>
    %339 = vector.shape_cast %338 : vector<1x16x16xf32> to vector<16x16xf32>
    %cst_117 = arith.constant dense<0.000000e+00> : vector<8x16xf32>
    %340 = tpu.matmul %337, %339, %cst_117 {dimension_numbers = #tpu.dot_dimension_numbers<[1], [0], [0], [1], [0, 0, 1, 1], [], []>} : vector<8x16xf32>, vector<16x16xf32>, vector<8x16xf32> -> vector<8x16xf32>
    %341 = arith.addf %336, %340 : vector<8x16xf32>
    %342 = vector.extract_strided_slice %316 {offsets = [40, 0], sizes = [8, 16], strides = [1, 1]} : vector<72x16xf32> to vector<8x16xf32>
    %343 = vector.extract_strided_slice %317 {offsets = [5, 0, 0], sizes = [1, 16, 16], strides = [1, 1, 1]} : vector<9x16x16xf32> to vector<1x16x16xf32>
    %344 = vector.shape_cast %343 : vector<1x16x16xf32> to vector<16x16xf32>
    %cst_118 = arith.constant dense<0.000000e+00> : vector<8x16xf32>
    %345 = tpu.matmul %342, %344, %cst_118 {dimension_numbers = #tpu.dot_dimension_numbers<[1], [0], [0], [1], [0, 0, 1, 1], [], []>} : vector<8x16xf32>, vector<16x16xf32>, vector<8x16xf32> -> vector<8x16xf32>
    %346 = arith.addf %341, %345 : vector<8x16xf32>
    %347 = vector.extract_strided_slice %316 {offsets = [48, 0], sizes = [8, 16], strides = [1, 1]} : vector<72x16xf32> to vector<8x16xf32>
    %348 = vector.extract_strided_slice %317 {offsets = [6, 0, 0], sizes = [1, 16, 16], strides = [1, 1, 1]} : vector<9x16x16xf32> to vector<1x16x16xf32>
    %349 = vector.shape_cast %348 : vector<1x16x16xf32> to vector<16x16xf32>
    %cst_119 = arith.constant dense<0.000000e+00> : vector<8x16xf32>
    %350 = tpu.matmul %347, %349, %cst_119 {dimension_numbers = #tpu.dot_dimension_numbers<[1], [0], [0], [1], [0, 0, 1, 1], [], []>} : vector<8x16xf32>, vector<16x16xf32>, vector<8x16xf32> -> vector<8x16xf32>
    %351 = arith.addf %346, %350 : vector<8x16xf32>
    %352 = vector.extract_strided_slice %316 {offsets = [56, 0], sizes = [8, 16], strides = [1, 1]} : vector<72x16xf32> to vector<8x16xf32>
    %353 = vector.extract_strided_slice %317 {offsets = [7, 0, 0], sizes = [1, 16, 16], strides = [1, 1, 1]} : vector<9x16x16xf32> to vector<1x16x16xf32>
    %354 = vector.shape_cast %353 : vector<1x16x16xf32> to vector<16x16xf32>
    %cst_120 = arith.constant dense<0.000000e+00> : vector<8x16xf32>
    %355 = tpu.matmul %352, %354, %cst_120 {dimension_numbers = #tpu.dot_dimension_numbers<[1], [0], [0], [1], [0, 0, 1, 1], [], []>} : vector<8x16xf32>, vector<16x16xf32>, vector<8x16xf32> -> vector<8x16xf32>
    %356 = arith.addf %351, %355 : vector<8x16xf32>
    %357 = vector.extract_strided_slice %316 {offsets = [64, 0], sizes = [8, 16], strides = [1, 1]} : vector<72x16xf32> to vector<8x16xf32>
    %358 = vector.extract_strided_slice %317 {offsets = [8, 0, 0], sizes = [1, 16, 16], strides = [1, 1, 1]} : vector<9x16x16xf32> to vector<1x16x16xf32>
    %359 = vector.shape_cast %358 : vector<1x16x16xf32> to vector<16x16xf32>
    %cst_121 = arith.constant dense<0.000000e+00> : vector<8x16xf32>
    %360 = tpu.matmul %357, %359, %cst_121 {dimension_numbers = #tpu.dot_dimension_numbers<[1], [0], [0], [1], [0, 0, 1, 1], [], []>} : vector<8x16xf32>, vector<16x16xf32>, vector<8x16xf32> -> vector<8x16xf32>
    %361 = arith.addf %356, %360 : vector<8x16xf32>
    %362 = vector.broadcast %7 : vector<1x16xf32> to vector<8x16xf32>
    %363 = arith.addf %361, %362 : vector<8x16xf32>
    %cst_122 = arith.constant 0.000000e+00 : f32
    %364 = vector.broadcast %cst_122 : f32 to vector<8x16xf32>
    %365 = arith.cmpf oge, %363, %364 : vector<8x16xf32>
    %cst_123 = arith.constant 2.000000e-01 : f32
    %366 = vector.broadcast %cst_123 : f32 to vector<8x16xf32>
    %367 = arith.mulf %366, %363 : vector<8x16xf32>
    %368 = arith.select %365, %363, %367 : vector<8x16xi1>, vector<8x16xf32>
    %369 = vector.extract_strided_slice %368 {offsets = [0, 0], sizes = [1, 16], strides = [1, 1]} : vector<8x16xf32> to vector<1x16xf32>
    %370 = vector.extract_strided_slice %12 {offsets = [0, 0, 0], sizes = [1, 16, 32], strides = [1, 1, 1]} : vector<4x16x32xf32> to vector<1x16x32xf32>
    %371 = vector.shape_cast %370 : vector<1x16x32xf32> to vector<16x32xf32>
    %cst_124 = arith.constant dense<0.000000e+00> : vector<1x32xf32>
    %372 = tpu.matmul %369, %371, %cst_124 {dimension_numbers = #tpu.dot_dimension_numbers<[1], [0], [0], [1], [0, 0, 1, 1], [], []>} : vector<1x16xf32>, vector<16x32xf32>, vector<1x32xf32> -> vector<1x32xf32>
    %373 = vector.extract_strided_slice %368 {offsets = [1, 0], sizes = [1, 16], strides = [1, 1]} : vector<8x16xf32> to vector<1x16xf32>
    %374 = vector.extract_strided_slice %12 {offsets = [1, 0, 0], sizes = [1, 16, 32], strides = [1, 1, 1]} : vector<4x16x32xf32> to vector<1x16x32xf32>
    %375 = vector.shape_cast %374 : vector<1x16x32xf32> to vector<16x32xf32>
    %cst_125 = arith.constant dense<0.000000e+00> : vector<1x32xf32>
    %376 = tpu.matmul %373, %375, %cst_125 {dimension_numbers = #tpu.dot_dimension_numbers<[1], [0], [0], [1], [0, 0, 1, 1], [], []>} : vector<1x16xf32>, vector<16x32xf32>, vector<1x32xf32> -> vector<1x32xf32>
    %377 = arith.addf %372, %376 : vector<1x32xf32>
    %378 = vector.extract_strided_slice %368 {offsets = [2, 0], sizes = [1, 16], strides = [1, 1]} : vector<8x16xf32> to vector<1x16xf32>
    %379 = vector.extract_strided_slice %12 {offsets = [2, 0, 0], sizes = [1, 16, 32], strides = [1, 1, 1]} : vector<4x16x32xf32> to vector<1x16x32xf32>
    %380 = vector.shape_cast %379 : vector<1x16x32xf32> to vector<16x32xf32>
    %cst_126 = arith.constant dense<0.000000e+00> : vector<1x32xf32>
    %381 = tpu.matmul %378, %380, %cst_126 {dimension_numbers = #tpu.dot_dimension_numbers<[1], [0], [0], [1], [0, 0, 1, 1], [], []>} : vector<1x16xf32>, vector<16x32xf32>, vector<1x32xf32> -> vector<1x32xf32>
    %382 = arith.addf %377, %381 : vector<1x32xf32>
    %383 = vector.extract_strided_slice %368 {offsets = [3, 0], sizes = [1, 16], strides = [1, 1]} : vector<8x16xf32> to vector<1x16xf32>
    %384 = vector.extract_strided_slice %12 {offsets = [3, 0, 0], sizes = [1, 16, 32], strides = [1, 1, 1]} : vector<4x16x32xf32> to vector<1x16x32xf32>
    %385 = vector.shape_cast %384 : vector<1x16x32xf32> to vector<16x32xf32>
    %cst_127 = arith.constant dense<0.000000e+00> : vector<1x32xf32>
    %386 = tpu.matmul %383, %385, %cst_127 {dimension_numbers = #tpu.dot_dimension_numbers<[1], [0], [0], [1], [0, 0, 1, 1], [], []>} : vector<1x16xf32>, vector<16x32xf32>, vector<1x32xf32> -> vector<1x32xf32>
    %387 = arith.addf %382, %386 : vector<1x32xf32>
    %388 = tpu.concatenate %200, %387 in 0 : vector<1x32xf32>, vector<1x32xf32> -> vector<2x32xf32>
    %389 = vector.broadcast %8 : vector<1x32xf32> to vector<2x32xf32>
    %390 = arith.addf %388, %389 : vector<2x32xf32>
    %cst_128 = arith.constant 0.000000e+00 : f32
    %391 = vector.broadcast %cst_128 : f32 to vector<2x32xf32>
    %392 = arith.cmpf oge, %390, %391 : vector<2x32xf32>
    %cst_129 = arith.constant 2.000000e-01 : f32
    %393 = vector.broadcast %cst_129 : f32 to vector<2x32xf32>
    %394 = arith.mulf %393, %390 : vector<2x32xf32>
    %395 = arith.select %392, %390, %394 : vector<2x32xi1>, vector<2x32xf32>
    %c0_130 = arith.constant 0 : index
    %c0_131 = arith.constant 0 : index
    %c0_132 = arith.constant 0 : index
    %396 = vector.load %arg2[%c0_130, %c0_131, %c0_132] : memref<1x2x24xf32, #tpu.memory_space<vmem>>, vector<1x2x24xf32>
    %397 = vector.shape_cast %396 : vector<1x2x24xf32> to vector<2x24xf32>
    %c0_133 = arith.constant 0 : index
    %c0_134 = arith.constant 0 : index
    %398 = vector.load %arg13[%c0_133, %c0_134] : memref<24x64xf32, #tpu.memory_space<vmem>>, vector<24x64xf32>
    %cst_135 = arith.constant dense<0.000000e+00> : vector<2x64xf32>
    %399 = tpu.matmul %397, %398, %cst_135 {dimension_numbers = #tpu.dot_dimension_numbers<[1], [0], [0], [1], [0, 0, 1, 1], [], []>} : vector<2x24xf32>, vector<24x64xf32>, vector<2x64xf32> -> vector<2x64xf32>
    %400 = vector.broadcast %9 : vector<1x64xf32> to vector<2x64xf32>
    %401 = arith.addf %399, %400 : vector<2x64xf32>
    %cst_136 = arith.constant 0.000000e+00 : f32
    %402 = vector.broadcast %cst_136 : f32 to vector<2x64xf32>
    %403 = arith.cmpf oge, %401, %402 : vector<2x64xf32>
    %cst_137 = arith.constant 2.000000e-01 : f32
    %404 = vector.broadcast %cst_137 : f32 to vector<2x64xf32>
    %405 = arith.mulf %404, %401 : vector<2x64xf32>
    %406 = arith.select %403, %401, %405 : vector<2x64xi1>, vector<2x64xf32>
    %c0_138 = arith.constant 0 : index
    %c0_139 = arith.constant 0 : index
    %407 = vector.load %arg14[%c0_138, %c0_139] : memref<64x64xf32, #tpu.memory_space<vmem>>, vector<64x64xf32>
    %cst_140 = arith.constant dense<0.000000e+00> : vector<2x64xf32>
    %408 = tpu.matmul %406, %407, %cst_140 {dimension_numbers = #tpu.dot_dimension_numbers<[1], [0], [0], [1], [0, 0, 1, 1], [], []>} : vector<2x64xf32>, vector<64x64xf32>, vector<2x64xf32> -> vector<2x64xf32>
    %409 = vector.broadcast %10 : vector<1x64xf32> to vector<2x64xf32>
    %410 = arith.addf %408, %409 : vector<2x64xf32>
    %411 = tpu.concatenate %3, %410, %395 in 1 : vector<2x32xf32>, vector<2x64xf32>, vector<2x32xf32> -> vector<2x128xf32>
    %c0_141 = arith.constant 0 : index
    %c0_142 = arith.constant 0 : index
    %412 = vector.load %arg15[%c0_141, %c0_142] : memref<128x128xf32, #tpu.memory_space<vmem>>, vector<128x128xf32>
    %cst_143 = arith.constant dense<0.000000e+00> : vector<2x128xf32>
    %413 = tpu.matmul %411, %412, %cst_143 {dimension_numbers = #tpu.dot_dimension_numbers<[1], [0], [0], [1], [0, 0, 1, 1], [], []>} : vector<2x128xf32>, vector<128x128xf32>, vector<2x128xf32> -> vector<2x128xf32>
    %414 = vector.broadcast %11 : vector<1x128xf32> to vector<2x128xf32>
    %415 = arith.addf %413, %414 : vector<2x128xf32>
    %416 = vector.extract_strided_slice %415 {offsets = [0, 0], sizes = [2, 32], strides = [1, 1]} : vector<2x128xf32> to vector<2x32xf32>
    %417 = arith.negf %416 : vector<2x32xf32>
    %418 = math.exp %417 : vector<2x32xf32>
    %cst_144 = arith.constant 1.000000e+00 : f32
    %419 = vector.broadcast %cst_144 : f32 to vector<2x32xf32>
    %420 = arith.addf %419, %418 : vector<2x32xf32>
    %421 = arith.divf %419, %420 : vector<2x32xf32>
    %422 = vector.extract_strided_slice %415 {offsets = [0, 32], sizes = [2, 32], strides = [1, 1]} : vector<2x128xf32> to vector<2x32xf32>
    %423 = arith.negf %422 : vector<2x32xf32>
    %424 = math.exp %423 : vector<2x32xf32>
    %cst_145 = arith.constant 1.000000e+00 : f32
    %425 = vector.broadcast %cst_145 : f32 to vector<2x32xf32>
    %426 = arith.addf %425, %424 : vector<2x32xf32>
    %427 = arith.divf %425, %426 : vector<2x32xf32>
    %428 = vector.extract_strided_slice %415 {offsets = [0, 64], sizes = [2, 32], strides = [1, 1]} : vector<2x128xf32> to vector<2x32xf32>
    %429 = arith.negf %428 : vector<2x32xf32>
    %430 = math.exp %429 : vector<2x32xf32>
    %cst_146 = arith.constant 1.000000e+00 : f32
    %431 = vector.broadcast %cst_146 : f32 to vector<2x32xf32>
    %432 = arith.addf %431, %430 : vector<2x32xf32>
    %433 = arith.divf %431, %432 : vector<2x32xf32>
    %434 = vector.extract_strided_slice %415 {offsets = [0, 96], sizes = [2, 32], strides = [1, 1]} : vector<2x128xf32> to vector<2x32xf32>
    %435 = math.tanh %434 : vector<2x32xf32>
    %436 = arith.mulf %427, %4 : vector<2x32xf32>
    %437 = arith.mulf %421, %435 : vector<2x32xf32>
    %438 = arith.addf %436, %437 : vector<2x32xf32>
    %439 = math.tanh %438 : vector<2x32xf32>
    %440 = arith.mulf %433, %439 : vector<2x32xf32>
    %c0_147 = arith.constant 0 : index
    %c0_148 = arith.constant 0 : index
    %441 = vector.load %arg17[%c0_147, %c0_148] : memref<2x32xf32, #tpu.memory_space<vmem>>, vector<2x32xf32>
    tpu.vector_store %arg17[%c0_147, %c0_148], %440 {strides = array<i32>} : memref<2x32xf32, #tpu.memory_space<vmem>>, vector<2x32xf32>,
    %c0_149 = arith.constant 0 : index
    %c0_150 = arith.constant 0 : index
    %442 = vector.load %arg18[%c0_149, %c0_150] : memref<2x32xf32, #tpu.memory_space<vmem>>, vector<2x32xf32>
    tpu.vector_store %arg18[%c0_149, %c0_150], %438 {strides = array<i32>} : memref<2x32xf32, #tpu.memory_space<vmem>>, vector<2x32xf32>,
    %443 = tpu.concatenate %440, %438 in 1 : vector<2x32xf32>, vector<2x32xf32> -> vector<2x64xf32>
    %444 = vector.shape_cast %443 : vector<2x64xf32> to vector<1x2x64xf32>
    %c0_151 = arith.constant 0 : index
    %c0_152 = arith.constant 0 : index
    %c0_153 = arith.constant 0 : index
    %445 = vector.load %arg16[%c0_151, %c0_152, %c0_153] : memref<1x2x64xf32, #tpu.memory_space<vmem>>, vector<1x2x64xf32>
    tpu.vector_store %arg16[%c0_151, %c0_152, %c0_153], %444 {strides = array<i32>} : memref<1x2x64xf32, #tpu.memory_space<vmem>>, vector<1x2x64xf32>,
    return
  }
  func.func @transform_0(%arg0: i32) -> (i32, i32, i32, i32) {
    %c0_i32 = arith.constant 0 : i32
    %c0_i32_0 = arith.constant 0 : i32
    %c0_i32_1 = arith.constant 0 : i32
    %c0_i32_2 = arith.constant 0 : i32
    return %arg0, %c0_i32, %c0_i32_0, %c0_i32_1 : i32, i32, i32, i32
  }
  func.func @transform_1(%arg0: i32) -> (i32, i32, i32) {
    %c0_i32 = arith.constant 0 : i32
    %c0_i32_0 = arith.constant 0 : i32
    %c0_i32_1 = arith.constant 0 : i32
    return %arg0, %c0_i32, %c0_i32_0 : i32, i32, i32
  }
  func.func @transform_2(%arg0: i32) -> (i32, i32) {
    %c0_i32 = arith.constant 0 : i32
    %c0_i32_0 = arith.constant 0 : i32
    %c0_i32_1 = arith.constant 0 : i32
    return %c0_i32, %c0_i32_0 : i32, i32
  }
  func.func @transform_3(%arg0: i32) -> (i32, i32) {
    %c0_i32 = arith.constant 0 : i32
    %c0_i32_0 = arith.constant 0 : i32
    %c0_i32_1 = arith.constant 0 : i32
    return %c0_i32, %c0_i32_0 : i32, i32
  }
  func.func @transform_4(%arg0: i32) -> (i32, i32) {
    %c0_i32 = arith.constant 0 : i32
    %c0_i32_0 = arith.constant 0 : i32
    %c0_i32_1 = arith.constant 0 : i32
    return %c0_i32, %c0_i32_0 : i32, i32
  }
  func.func @transform_5(%arg0: i32) -> (i32, i32) {
    %c0_i32 = arith.constant 0 : i32
    %c0_i32_0 = arith.constant 0 : i32
    %c0_i32_1 = arith.constant 0 : i32
    return %c0_i32, %c0_i32_0 : i32, i32
  }
  func.func @transform_6(%arg0: i32) -> (i32, i32) {
    %c0_i32 = arith.constant 0 : i32
    %c0_i32_0 = arith.constant 0 : i32
    %c0_i32_1 = arith.constant 0 : i32
    return %c0_i32, %c0_i32_0 : i32, i32
  }
  func.func @transform_7(%arg0: i32) -> (i32, i32, i32) {
    %c0_i32 = arith.constant 0 : i32
    %c0_i32_0 = arith.constant 0 : i32
    %c0_i32_1 = arith.constant 0 : i32
    %c0_i32_2 = arith.constant 0 : i32
    return %c0_i32, %c0_i32_0, %c0_i32_1 : i32, i32, i32
  }
  func.func @transform_8(%arg0: i32) -> (i32, i32, i32) {
    %c0_i32 = arith.constant 0 : i32
    %c0_i32_0 = arith.constant 0 : i32
    %c0_i32_1 = arith.constant 0 : i32
    %c0_i32_2 = arith.constant 0 : i32
    return %c0_i32, %c0_i32_0, %c0_i32_1 : i32, i32, i32
  }
  func.func @transform_9(%arg0: i32) -> (i32, i32, i32) {
    %c0_i32 = arith.constant 0 : i32
    %c0_i32_0 = arith.constant 0 : i32
    %c0_i32_1 = arith.constant 0 : i32
    %c0_i32_2 = arith.constant 0 : i32
    return %c0_i32, %c0_i32_0, %c0_i32_1 : i32, i32, i32
  }
  func.func @transform_10(%arg0: i32) -> (i32, i32, i32) {
    %c0_i32 = arith.constant 0 : i32
    %c0_i32_0 = arith.constant 0 : i32
    %c0_i32_1 = arith.constant 0 : i32
    %c0_i32_2 = arith.constant 0 : i32
    return %c0_i32, %c0_i32_0, %c0_i32_1 : i32, i32, i32
  }
  func.func @transform_11(%arg0: i32) -> (i32, i32) {
    %c0_i32 = arith.constant 0 : i32
    %c0_i32_0 = arith.constant 0 : i32
    %c0_i32_1 = arith.constant 0 : i32
    return %c0_i32, %c0_i32_0 : i32, i32
  }
  func.func @transform_12(%arg0: i32) -> (i32, i32) {
    %c0_i32 = arith.constant 0 : i32
    %c0_i32_0 = arith.constant 0 : i32
    %c0_i32_1 = arith.constant 0 : i32
    return %c0_i32, %c0_i32_0 : i32, i32
  }
  func.func @transform_13(%arg0: i32) -> (i32, i32) {
    %c0_i32 = arith.constant 0 : i32
    %c0_i32_0 = arith.constant 0 : i32
    %c0_i32_1 = arith.constant 0 : i32
    return %c0_i32, %c0_i32_0 : i32, i32
  }
  func.func @transform_14(%arg0: i32) -> (i32, i32) {
    %c0_i32 = arith.constant 0 : i32
    %c0_i32_0 = arith.constant 0 : i32
    %c0_i32_1 = arith.constant 0 : i32
    return %c0_i32, %c0_i32_0 : i32, i32
  }
  func.func @transform_15(%arg0: i32) -> (i32, i32, i32) {
    %c0_i32 = arith.constant 0 : i32
    %c0_i32_0 = arith.constant 0 : i32
    %c0_i32_1 = arith.constant 0 : i32
    return %arg0, %c0_i32, %c0_i32_0 : i32, i32, i32
  }
}

</mosaic_0001>

<bundles_post_ra>
// kernel: run.1
= control target key start
LH: loop header
LB: loop body
LE: loop exit
PB: predicated region body
PF: predicated region fallthrough
CT: control target
= control target key end

     0   :  { %20 = vsyncpa [#allocation5], 0  ;;  %s7059_s0 = inlined_call_operand.vmem [shape: f32[1,2,4,256], index: 0, kind: input, shape index: {}]   ;;  %s7060_s1 = inlined_call_operand.vmem [shape: f32[1,2,24], index: 1, kind: input, shape index: {}]   ;;  %s7061_s2 = inlined_call_operand.vmem [shape: f32[2,32], index: 2, kind: input, shape index: {}]   ;;  %s7062_s3 = inlined_call_operand.vmem [shape: f32[2,32], index: 3, kind: input, shape index: {}]   ;;  %s7063_s4 = inlined_call_operand.hbm [shape: bf16[576,256], index: 4, kind: input, shape index: {}]   ;;  %s7064_s5 = inlined_call_operand.hbm [shape: bf16[144,64], index: 5, kind: input, shape index: {}]   ;;  %s7065_s6 = inlined_call_operand.hbm [shape: bf16[72,16], index: 6, kind: input, shape index: {}]   ;;  %s7066_s7 = inlined_call_operand.hbm [shape: f32[9,4,16], index: 7, kind: input, shape index: {}]   ;;  %s7067_s8 = inlined_call_operand.hbm [shape: f32[9,16,16], index: 8, kind: input, shape index: {}]   ;;  %s7068_s9 = inlined_call_operand.vmem [shape: f32[9,16,16], index: 9, kind: input, shape index: {}]   ;;  %s7069_s10 = inlined_call_operand.hbm [shape: f32[4,16,32], index: 10, kind: input, shape index: {}]   ;;  %s7070_s11 = inlined_call_operand.vmem [shape: f32[8,128], index: 11, kind: input, shape index: {}]   ;;  %s7071_s12 = inlined_call_operand.hbm [shape: f32[24,64], index: 12, kind: input, shape index: {}]   ;;  %s7072_s13 = inlined_call_operand.hbm [shape: f32[64,64], index: 13, kind: input, shape index: {}]   ;;  %s7073_s14 = inlined_call_operand.hbm [shape: f32[128,128], index: 14, kind: input, shape index: {}]   ;;  %s7074_s15 = inlined_call_operand.vmem [shape: f32[1,2,64], index: 15, kind: output, shape index: {}]  }
   0x1   :  { %21 = vsyncpa [#allocation7], 0 }
   0x2   :  { %22 = vsyncpa [#allocation10], 0 }
   0x3   :  { %23 = vsyncpa [#allocation13], 0  ;;  %s50_s20 = sshll.u32 %s7064_s5, 4  ;;  %s51_s20 = int_to_ptr.hbm [resolvable:$true] %s50_s20 }
   0x4   :  { %24 = vsyncpa [#allocation16], 0  ;;  %s5872_s21 = smov [#allocation6]   ;;  %s76_s25 = sshll.u32 %s7066_s7, 4  ;;  %s77_s25 = int_to_ptr.hbm [resolvable:$true] %s76_s25 }
   0x5   :  { %s52_s22 = sshll.u32 %s5872_s21, 4  ;;  %s5873_s26 = smov 64   ;;  %s53_s22 = int_to_ptr.vmem [resolvable:$true] %s52_s22 }
   0x6   :  { %s5874_s27 = smov 4   ;;  %s5875_s28 = smov [#allocation9]  }
   0x7   :  { %58 = dma.hbm_to_vmem [thread:$0]  %s51_s20, 1152, %s53_s22, [#allocation7], %s5873_s26, %s5873_s26, %s5874_s27  }
   0x8   :  { %s78_s29 = sshll.u32 %s5875_s28, 4  ;;  %s104_s16 = sshll.u32 %s7069_s10, 4  ;;  %s79_s29 = int_to_ptr.vmem [resolvable:$true] %s78_s29  ;;  %s105_s16 = int_to_ptr.hbm [resolvable:$true] %s104_s16 }
   0x9   :  { %84 = dma.hbm_to_vmem [thread:$0]  %s77_s25, 576, %s79_s29, [#allocation10], %s5873_s26, %s5873_s26, %s5874_s27  }
   0xa   :  { %s5876_s7 = smov [#allocation12]   ;;  %s132_s20 = sshll.u32 %s7072_s13, 4  ;;  %s133_s20 = int_to_ptr.hbm [resolvable:$true] %s132_s20 }
   0xb   :  { %s106_s17 = sshll.u32 %s5876_s7, 4  ;;  %s5877_s21 = smov 128   ;;  %s107_s17 = int_to_ptr.vmem [resolvable:$true] %s106_s17 }
   0xc   :  { %s5878_s22 = smov 8   ;;  %s5879_s23 = smov [#allocation15]  }
   0xd   :  { %112 = dma.hbm_to_vmem [thread:$0]  %s105_s16, 1024, %s107_s17, [#allocation13], %s5877_s21, %s5877_s21, %s5878_s22  }
   0xe   :  { %s134_s24 = sshll.u32 %s5879_s23, 4  ;;  %s37_s10 = sshll.u32 %s7063_s4, 4  ;;  %s135_s24 = int_to_ptr.vmem [resolvable:$true] %s134_s24  ;;  %s38_s10 = int_to_ptr.hbm [resolvable:$true] %s37_s10 }
   0xf   :  { %140 = dma.hbm_to_vmem [thread:$0]  %s133_s20, 1024, %s135_s24, [#allocation16], %s5877_s21, %s5877_s21, %s5878_s22  }
  0x10   :  { %s63_s5 = sshll.u32 %s7065_s6, 4  ;;  %s5880_s30 = smov [#allocation4]   ;;  %s64_s5 = int_to_ptr.hbm [resolvable:$true] %s63_s5 }
  0x11   :  { %s39_s7 = sshll.u32 %s5880_s30, 4  ;;  %s5881_s16 = smov [#allocation8]   ;;  %s40_s7 = int_to_ptr.vmem [resolvable:$true] %s39_s7 }
  0x12   :  { %45 = dma.hbm_to_vmem [thread:$0]  %s38_s10, 9216, %s40_s7, [#allocation5], %s5877_s21, %s5877_s21, %s5878_s22  }
  0x13   :  { %s65_s4 = sshll.u32 %s5881_s16, 4  ;;  %s89_s19 = sshll.u32 %s7067_s8, 4  ;;  %s66_s4 = int_to_ptr.vmem [resolvable:$true] %s65_s4  ;;  %s90_s19 = int_to_ptr.hbm [resolvable:$true] %s89_s19 }
  0x14   :  { %71 = dma.hbm_to_vmem [thread:$0]  %s64_s5, 576, %s66_s4, [#allocation7], %s5873_s26, %s5873_s26, %s5874_s27  }
  0x15   :  { %s119_s23 = sshll.u32 %s7071_s12, 4  ;;  %s5882_s24 = smov [#allocation11]   ;;  %s120_s23 = int_to_ptr.hbm [resolvable:$true] %s119_s23 }
  0x16   :  { %s91_s25 = sshll.u32 %s5882_s24, 4  ;;  %s5883_s28 = smov [#allocation14]   ;;  %s92_s25 = int_to_ptr.vmem [resolvable:$true] %s91_s25 }
  0x17   :  { %97 = dma.hbm_to_vmem [thread:$0]  %s90_s19, 2304, %s92_s25, [#allocation10], %s5877_s21, %s5877_s21, %s5878_s22  }
  0x18   :  { %s121_s8 = sshll.u32 %s5883_s28, 4  ;;  %s145_s29 = sshll.u32 %s7073_s14, 4  ;;  %s122_s8 = int_to_ptr.vmem [resolvable:$true] %s121_s8  ;;  %s146_s29 = int_to_ptr.hbm [resolvable:$true] %s145_s29 }
  0x19   :  { %127 = dma.hbm_to_vmem [thread:$0]  %s120_s23, 384, %s122_s8, [#allocation13], %s5877_s21, %s5877_s21, %s5878_s22  }
  0x1a   :  { %s5884_s12 = smov [#allocation17]  }
  0x1b   :  { %s147_s27 = sshll.u32 %s5884_s12, 4  ;;  %s148_s27 = int_to_ptr.vmem [resolvable:$true] %s147_s27 }
  0x1c   :  { %153 = dma.hbm_to_vmem [thread:$0]  %s146_s29, 2048, %s148_s27, [#allocation16], %s5877_s21, %s5877_s21, %s5878_s22  }
  0x1d   :  { %5862 = dma.done.wait [#allocation5], 9216  }
  0x1e   :  { %5863 = vsyncadd [#allocation5], 4294958080 }
  0x1f   :  { %5864 = dma.done.wait [#allocation7], 1728  }
  0x20   :  { %5865 = vsyncadd [#allocation7], 4294965568 }
  0x21   :  { %5866 = dma.done.wait [#allocation10], 2880  }
  0x22   :  { %5867 = vsyncadd [#allocation10], 4294964416 }
  0x23   :  { %5868 = dma.done.wait [#allocation13], 1408  }
  0x24   :  { %5869 = vsyncadd [#allocation13], 4294965888 }
  0x25   :  { %5870 = dma.done.wait [#allocation16], 3072  }
  0x26   :  { %5871 = vsyncadd [#allocation16], 4294964224  ;;  %v217_v0 = vld [vmem:[%s7059_s0] sm:$0xff]  ;;  %v218_v1 = vld [vmem:[%s7059_s0 + $0x8] sm:$0xff]  ;;  %vm1149_vm0 = vcmask 1043456   ;;  %vm1124_vm1 = vcmask 31744  }
  0x27   :  { %220 = vst [vmem:[#allocation1] ss:$2 sm:$0xff] %v217_v0  ;;  %vm1894_vm10 = vcmask 523264   ;;  %vm1994_vm11 = vcmask 130048   ;;  %s5885_s12 = smov 32   ;;  %s5886_s27 = smov 96  }
  0x2e   :  { %v221_v2 = vld.sshfl [vmem:[#allocation1] sm:$0xff pattern:$0x75316420]  ;;  %v222_v3 = vld.sshfl [vmem:[#allocation1 + $0x8] sm:$0xff pattern:$0x75316420] }
  0x2f   :  { %v5401_v4 = vpack.i.bf16 %v222_v3, %v221_v2  ;;  %2692 = vst [vmem:[#allocation1] ss:$2 sm:$0xff] %v218_v1 }
  0x31   :  { %5402 = vxpose.xlu0.b32.start.end [1/1] (short) %v5401_v4, 128 }
  0xd5   :  { %v5403_v5 = vpop.trf.xlu0 }
  0xd6   :  { %v5404_v7 = vunpack.i.l.bf16 %v5403_v5  ;;  %v5407_v8 = vunpack.i.h.bf16 %v5403_v5  ;;  %v4704_v5 = vld [vmem:[#allocation4] sm:$0xf] }
  0xdd   :  { %v5408_v6 = vpop.trf.xlu0 }
  0xde   :  { %v5409_v9 = vunpack.i.l.bf16 %v5408_v6  ;;  %v5412_v10 = vunpack.i.h.bf16 %v5408_v6  ;;  %v5298_v6 = vld [vmem:[#allocation4 + $0x4] sm:$0xf0] }
  0xe0   :  { %v6027_v11 = vpack.c.bf16 %v5409_v9, %v5404_v7  ;;  %v6029_v12 = vpack.c.bf16 %v5412_v10, %v5407_v8  ;;  %v5297_v7 = vld [vmem:[#allocation4 + $0x4] sm:$0xf]  ;;  %v4706_v8 = vld [vmem:[#allocation4 + $0x8] sm:$0xf0]  ;;  %v6031_v9 = vor.u32 %v5298_v6, %v4704_v5  ;;  %v4778_v5 = vld [vmem:[#allocation4 + $0x98] sm:$0xf0] }
  0xe1   :  { %v6033_v10 = vor.u32 %v5297_v7, %v4706_v8 }
  0xe5   :  { %v5413_v13 = vpop.trf.xlu0 }
  0xe6   :  { %v5414_v15 = vunpack.i.l.bf16 %v5413_v13  ;;  %v5417_v16 = vunpack.i.h.bf16 %v5413_v13  ;;  %v4712_v13 = vld [vmem:[#allocation4 + $0x10] sm:$0xf] }
  0xed   :  { %v5418_v14 = vpop.trf.xlu0 }
  0xee   :  { %v5419_v17 = vunpack.i.l.bf16 %v5418_v14  ;;  %v5422_v18 = vunpack.i.h.bf16 %v5418_v14  ;;  %v5300_v14 = vld [vmem:[#allocation4 + $0x14] sm:$0xf0] }
  0xf0   :  { %v362_v19 = vpack.c.bf16 %v5419_v17, %v5414_v15  ;;  %v370_v20 = vpack.c.bf16 %v5422_v18, %v5417_v16  ;;  %v5299_v15 = vld [vmem:[#allocation4 + $0x14] sm:$0xf]  ;;  %v4714_v16 = vld [vmem:[#allocation4 + $0x18] sm:$0xf0]  ;;  %v6039_v17 = vor.u32 %v5300_v14, %v4712_v13 }
  0xf1   :  { %v6041_v18 = vor.u32 %v5299_v15, %v4714_v16 }
  0xf5   :  { %v5423_v21 = vpop.trf.xlu0 }
  0xf6   :  { %v5424_v23 = vunpack.i.l.bf16 %v5423_v21  ;;  %v5427_v24 = vunpack.i.h.bf16 %v5423_v21 }
  0xfd   :  { %v5428_v22 = vpop.trf.xlu0 }
  0xfe   :  { %v5429_v25 = vunpack.i.l.bf16 %v5428_v22  ;;  %v5432_v26 = vunpack.i.h.bf16 %v5428_v22 }
 0x100   :  { %v363_v27 = vpack.c.bf16 %v5429_v25, %v5424_v23  ;;  %v371_v28 = vpack.c.bf16 %v5432_v26, %v5427_v24  ;;  %v4728_v23 = vld [vmem:[#allocation4 + $0x30] sm:$0xf]  ;;  %v5304_v24 = vld [vmem:[#allocation4 + $0x34] sm:$0xf0]  ;;  %v5303_v25 = vld [vmem:[#allocation4 + $0x34] sm:$0xf] }
 0x101   :  { %v4730_v26 = vld [vmem:[#allocation4 + $0x38] sm:$0xf0] }
 0x105   :  { %v5433_v29 = vpop.trf.xlu0 }
 0x106   :  { %v5434_v31 = vunpack.i.l.bf16 %v5433_v29  ;;  %v5437_v32 = vunpack.i.h.bf16 %v5433_v29  ;;  %v4736_v29 = vld [vmem:[#allocation4 + $0x40] sm:$0xf] }
 0x10d   :  { %v5438_v30 = vpop.trf.xlu0 }
 0x10e   :  { %v5439_v33 = vunpack.i.l.bf16 %v5438_v30  ;;  %v5442_v34 = vunpack.i.h.bf16 %v5438_v30  ;;  %v5306_v30 = vld [vmem:[#allocation4 + $0x44] sm:$0xf0] }
 0x110   :  { %v364_v35 = vpack.c.bf16 %v5439_v33, %v5434_v31  ;;  %v372_v36 = vpack.c.bf16 %v5442_v34, %v5437_v32  ;;  %v5305_v31 = vld [vmem:[#allocation4 + $0x44] sm:$0xf]  ;;  %v4738_v32 = vld [vmem:[#allocation4 + $0x48] sm:$0xf0]  ;;  %v6057_v33 = vor.u32 %v5306_v30, %v4736_v29 }
 0x111   :  { %v6059_v34 = vor.u32 %v5305_v31, %v4738_v32  ;;  %v1116_v31 = vld [vmem:[#allocation9 + $0x4] sm:$0xf] }
 0x112   :  { %4990 = vmatpush.msk.msra.mxu2 %vm1149_vm0, %v1116_v31  ;;  %v5325_v31 = vld [vmem:[#allocation4 + $0xe4] sm:$0xf] }
 0x115   :  { %v5443_v37 = vpop.trf.xlu0 }
 0x116   :  { %v5444_v1 = vunpack.i.l.bf16 %v5443_v37  ;;  %v5447_v2 = vunpack.i.h.bf16 %v5443_v37  ;;  %v5307_v37 = vld [vmem:[#allocation4 + $0x54] sm:$0xf] }
 0x11d   :  { %v5448_v38 = vpop.trf.xlu0 }
 0x11e   :  { %v5449_v63 = vunpack.i.l.bf16 %v5448_v38  ;;  %v5452_v0 = vunpack.i.h.bf16 %v5448_v38  ;;  %v4746_v38 = vld [vmem:[#allocation4 + $0x58] sm:$0xf0] }
 0x120   :  { %v365_v3 = vpack.c.bf16 %v5449_v63, %v5444_v1  ;;  %v373_v4 = vpack.c.bf16 %v5452_v0, %v5447_v2  ;;  %v4776_v2 = vld [vmem:[#allocation4 + $0x90] sm:$0xf] }
 0x125   :  { %v5453_v39 = vpop.trf.xlu0 }
 0x126   :  { %v5454_v59 = vunpack.i.l.bf16 %v5453_v39  ;;  %v5457_v60 = vunpack.i.h.bf16 %v5453_v39 }
 0x12d   :  { %v5458_v40 = vpop.trf.xlu0 }
 0x12e   :  { %v5459_v57 = vunpack.i.l.bf16 %v5458_v40  ;;  %v5462_v58 = vunpack.i.h.bf16 %v5458_v40  ;;  %v6065_v40 = vor.u32 %v5307_v37, %v4746_v38  ;;  %v4792_v37 = vld [vmem:[#allocation4 + $0xb0] sm:$0xf]  ;;  %v5320_v38 = vld [vmem:[#allocation4 + $0xb4] sm:$0xf0] }
 0x130   :  { %v366_v61 = vpack.c.bf16 %v5459_v57, %v5454_v59  ;;  %v374_v62 = vpack.c.bf16 %v5462_v58, %v5457_v60  ;;  %7138 = vst [vmem:[#allocation24_spill] sm:$0xff] %v6065_v40  ;;  %v4770_v57 = vld [vmem:[#allocation4 + $0x88] sm:$0xf0] }
 0x135   :  { %v5463_v41 = vpop.trf.xlu0 }
 0x136   :  { %v5464_v53 = vunpack.i.l.bf16 %v5463_v41  ;;  %v5467_v54 = vunpack.i.h.bf16 %v5463_v41  ;;  %v4752_v41 = vld [vmem:[#allocation4 + $0x60] sm:$0xf] }
 0x13d   :  { %v5468_v42 = vpop.trf.xlu0 }
 0x13e   :  { %v5469_v51 = vunpack.i.l.bf16 %v5468_v42  ;;  %v5472_v52 = vunpack.i.h.bf16 %v5468_v42  ;;  %v5310_v42 = vld [vmem:[#allocation4 + $0x64] sm:$0xf0] }
 0x140   :  { %v367_v55 = vpack.c.bf16 %v5469_v51, %v5464_v53  ;;  %v375_v56 = vpack.c.bf16 %v5472_v52, %v5467_v54  ;;  %v4762_v51 = vld [vmem:[#allocation4 + $0x78] sm:$0xf0]  ;;  %v4768_v54 = vld [vmem:[#allocation4 + $0x80] sm:$0xf] }
 0x145   :  { %v5473_v43 = vpop.trf.xlu0 }
 0x146   :  { %v5474_v45 = vunpack.i.l.bf16 %v5473_v43  ;;  %v5477_v46 = vunpack.i.h.bf16 %v5473_v43  ;;  %v5309_v43 = vld [vmem:[#allocation4 + $0x64] sm:$0xf] }
 0x14d   :  { %v5478_v44 = vpop.trf.xlu0 }
 0x14e   :  { %v5479_v47 = vunpack.i.l.bf16 %v5478_v44  ;;  %v5482_v48 = vunpack.i.h.bf16 %v5478_v44  ;;  %v4754_v44 = vld [vmem:[#allocation4 + $0x68] sm:$0xf0] }
 0x150   :  { %v368_v49 = vpack.c.bf16 %v5479_v47, %v5474_v45  ;;  %v376_v50 = vpack.c.bf16 %v5482_v48, %v5477_v46  ;;  %v6069_v45 = vor.u32 %v5310_v42, %v4752_v41  ;;  %v6071_v46 = vor.u32 %v5309_v43, %v4754_v44  ;;  %v1115_v47 = vld [vmem:[#allocation9] sm:$0xf]  ;;  %v4760_v48 = vld [vmem:[#allocation4 + $0x70] sm:$0xf]  ;;  %v5319_v41 = vld [vmem:[#allocation4 + $0xb4] sm:$0xf] }
 0x151   :  { %4999 = vmatpush.msk.msra.mxu3 %vm1149_vm0, %v1115_v47  ;;  %v4794_v42 = vld [vmem:[#allocation4 + $0xb8] sm:$0xf0]  ;;  %v6108_v43 = vor.u32 %v5320_v38, %v4792_v37 }
 0x152   :  { %737 = vmatpush.bf16.msra.mxu0 %v368_v49  ;;  %926 = vmatpush.bf16.msra.mxu1 %v376_v50  ;;  %7139 = vst [vmem:[#allocation25_spill] sm:$0xff] %v6069_v45  ;;  %v5312_v49 = vld [vmem:[#allocation4 + $0x74] sm:$0xf0]  ;;  %v5311_v50 = vld [vmem:[#allocation4 + $0x74] sm:$0xf]  ;;  %v6110_v44 = vor.u32 %v5319_v41, %v4794_v42 }
 0x153   :  { %7140 = vst [vmem:[#allocation26_spill] sm:$0xff] %v6071_v46  ;;  %v6077_v52 = vor.u32 %v5312_v49, %v4760_v48  ;;  %v6079_v53 = vor.u32 %v5311_v50, %v4762_v51  ;;  %v1117_v42 = vld [vmem:[#allocation9 + $0x8] sm:$0xf] }
 0x154   :  { %7149 = vst [vmem:[#allocation35_spill] sm:$0xff] %v6108_v43  ;;  %5008 = vmatpush.msk.msrb.mxu2 %vm1149_vm0, %v1117_v42 }
 0x155   :  { %7141 = vst [vmem:[#allocation27_spill] sm:$0xff] %v6077_v52 }
 0x156   :  { %738 = vmatpush.bf16.msra.mxu0 %v367_v55  ;;  %927 = vmatpush.bf16.msra.mxu1 %v375_v56  ;;  %7142 = vst [vmem:[#allocation28_spill] sm:$0xff] %v6079_v53  ;;  %v5314_v55 = vld [vmem:[#allocation4 + $0x84] sm:$0xf0]  ;;  %v5313_v56 = vld [vmem:[#allocation4 + $0x84] sm:$0xf] }
 0x157   :  { %v6083_v58 = vor.u32 %v5314_v55, %v4768_v54  ;;  %v6085_v59 = vor.u32 %v5313_v56, %v4770_v57  ;;  %7150 = vst [vmem:[#allocation36_spill] sm:$0xff] %v6110_v44  ;;  %v4800_v55 = vld [vmem:[#allocation4 + $0xc0] sm:$0xf]  ;;  %v5322_v56 = vld [vmem:[#allocation4 + $0xc4] sm:$0xf0] }
 0x158   :  { %v5321_v57 = vld [vmem:[#allocation4 + $0xc4] sm:$0xf] }
 0x159   :  { %7143 = vst [vmem:[#allocation29_spill] sm:$0xff] %v6083_v58 }
 0x15a   :  { %739 = vmatpush.bf16.msra.mxu0 %v366_v61  ;;  %928 = vmatpush.bf16.msra.mxu1 %v374_v62  ;;  %7144 = vst [vmem:[#allocation30_spill] sm:$0xff] %v6085_v59 }
 0x15e   :  { %740 = vmatpush.bf16.msra.mxu0 %v365_v3  ;;  %929 = vmatpush.bf16.msra.mxu1 %v373_v4  ;;  %v5316_v3 = vld [vmem:[#allocation4 + $0x94] sm:$0xf0]  ;;  %v5315_v4 = vld [vmem:[#allocation4 + $0x94] sm:$0xf] }
 0x15f   :  { %v6091_v6 = vor.u32 %v5316_v3, %v4776_v2  ;;  %v6093_v7 = vor.u32 %v5315_v4, %v4778_v5  ;;  %v4808_v5 = vld [vmem:[#allocation4 + $0xd0] sm:$0xf] }
 0x161   :  { %7145 = vst [vmem:[#allocation31_spill] sm:$0xff] %v6091_v6 }
 0x162   :  { %741 = vmatpush.bf16.msra.mxu0 %v364_v35  ;;  %930 = vmatpush.bf16.msra.mxu1 %v372_v36  ;;  %v4744_v35 = vld [vmem:[#allocation4 + $0x50] sm:$0xf]  ;;  %v5308_v36 = vld [vmem:[#allocation4 + $0x54] sm:$0xf0]  ;;  %7146 = vst [vmem:[#allocation32_spill] sm:$0xff] %v6093_v7 }
 0x163   :  { %v6063_v39 = vor.u32 %v5308_v36, %v4744_v35 }
 0x165   :  { %7137 = vst [vmem:[#allocation23_spill] sm:$0xff] %v6063_v39 }
 0x166   :  { %742 = vmatpush.bf16.msra.mxu0 %v363_v27  ;;  %931 = vmatpush.bf16.msra.mxu1 %v371_v28  ;;  %v6051_v27 = vor.u32 %v5304_v24, %v4728_v23  ;;  %v6053_v28 = vor.u32 %v5303_v25, %v4730_v26  ;;  %v4786_v23 = vld [vmem:[#allocation4 + $0xa8] sm:$0xf0] }
 0x16a   :  { %743 = vmatpush.bf16.msra.mxu0 %v362_v19  ;;  %932 = vmatpush.bf16.msra.mxu1 %v370_v20  ;;  %v4720_v19 = vld [vmem:[#allocation4 + $0x20] sm:$0xf]  ;;  %v5301_v20 = vld [vmem:[#allocation4 + $0x24] sm:$0xf] }
 0x16e   :  { %744 = vmatpush.bf16.msra.mxu0 %v6027_v11  ;;  %933 = vmatpush.bf16.msra.mxu1 %v6029_v12  ;;  %v5302_v11 = vld [vmem:[#allocation4 + $0x24] sm:$0xf0]  ;;  %v4722_v12 = vld [vmem:[#allocation4 + $0x28] sm:$0xf0] }
 0x16f   :  { %v6045_v21 = vor.u32 %v5302_v11, %v4720_v19  ;;  %v6047_v22 = vor.u32 %v5301_v20, %v4722_v12  ;;  %v4784_v11 = vld [vmem:[#allocation4 + $0xa0] sm:$0xf]  ;;  %v5318_v20 = vld [vmem:[#allocation4 + $0xa4] sm:$0xf0]  ;;  %v5317_v12 = vld [vmem:[#allocation4 + $0xa4] sm:$0xf] }
 0x170   :  { %v6099_v24 = vor.u32 %v5318_v20, %v4784_v11  ;;  %v6101_v25 = vor.u32 %v5317_v12, %v4786_v23 }
 0x171   :  { %745 = vmatmul.bf16.vlgmr.msra.gmra.mxu0 %v6031_v9  ;;  %934 = vmatmul.bf16.vlgmr.msra.gmra.mxu1 %v6033_v10 }
 0x172   :  { %5177 = vmatpush.msk.msrb.mxu1 %vm1149_vm0, %v1115_v47  ;;  %7147 = vst [vmem:[#allocation33_spill] sm:$0xff] %v6099_v24 }
 0x173   :  { %7148 = vst [vmem:[#allocation34_spill] sm:$0xff] %v6101_v25 }
 0x181   :  { %750 = vmatmul.bf16.gmra.mxu0 %v6039_v17  ;;  %939 = vmatmul.bf16.gmra.mxu1 %v6041_v18 }
 0x191   :  { %755 = vmatmul.bf16.gmra.mxu0 %v6045_v21  ;;  %944 = vmatmul.bf16.gmra.mxu1 %v6047_v22 }
 0x1a1   :  { %760 = vmatmul.bf16.gmra.mxu0 %v6051_v27  ;;  %949 = vmatmul.bf16.gmra.mxu1 %v6053_v28 }
 0x1b1   :  { %765 = vmatmul.bf16.gmra.mxu0 %v6057_v33  ;;  %954 = vmatmul.bf16.gmra.mxu1 %v6059_v34 }
 0x1c1   :  { %770 = vmatmul.bf16.gmra.mxu0 %v6063_v39  ;;  %959 = vmatmul.bf16.gmra.mxu1 %v6065_v40 }
 0x1d1   :  { %775 = vmatmul.bf16.gmra.mxu0 %v6069_v45  ;;  %964 = vmatmul.bf16.gmra.mxu1 %v6071_v46 }
 0x1e1   :  { %780 = vmatmul.bf16.gmra.mxu0 %v6077_v52  ;;  %969 = vmatmul.bf16.gmra.mxu1 %v6079_v53 }
 0x1ee   :  { %v746_v60 = vpop.f32.mrf.mxu0  ;;  %v935_v61 = vpop.f32.mrf.mxu1 }
 0x1ef   :  { %v936_v62 = vadd.f32 %v935_v61, %v746_v60  ;;  %v4802_v60 = vld [vmem:[#allocation4 + $0xc8] sm:$0xf0]  ;;  %v6116_v61 = vor.u32 %v5322_v56, %v4800_v55  ;;  %v4826_v55 = vld [vmem:[#allocation4 + $0xf8] sm:$0xf0] }
 0x1f1   :  { %785 = vmatmul.bf16.gmra.mxu0 %v6083_v58  ;;  %974 = vmatmul.bf16.gmra.mxu1 %v6085_v59  ;;  %7151 = vst [vmem:[#allocation37_spill] sm:$0xff] %v6116_v61 }
 0x1f2   :  { %5000 = vmatmul.msk.f32.vlgmr.msra.gmra.mxu3 %vm1124_vm1, %v936_v62  ;;  %v6118_v62 = vor.u32 %v5321_v57, %v4802_v60 }
 0x1f4   :  { %7152 = vst [vmem:[#allocation38_spill] sm:$0xff] %v6118_v62 }
 0x1f6   :  { %v748_v63 = vpop.f32.mrf.mxu0  ;;  %v937_v0 = vpop.f32.mrf.mxu1 }
 0x1f7   :  { %v938_v1 = vadd.f32 %v937_v0, %v748_v63 }
 0x1fa   :  { %5001 = vmatmul.msk.f32.gmra.mxu3 %vm1124_vm1, %v938_v1 }
 0x1fe   :  { %v751_v8 = vpop.f32.mrf.mxu0  ;;  %v940_v13 = vpop.f32.mrf.mxu1 }
 0x1ff   :  { %v941_v14 = vadd.f32 %v940_v13, %v751_v8  ;;  %v5324_v8 = vld [vmem:[#allocation4 + $0xd4] sm:$0xf0]  ;;  %v5323_v13 = vld [vmem:[#allocation4 + $0xd4] sm:$0xf] }
 0x201   :  { %790 = vmatmul.bf16.gmra.mxu0 %v6091_v6  ;;  %979 = vmatmul.bf16.gmra.mxu1 %v6093_v7 }
 0x202   :  { %5002 = vmatmul.msk.f32.gmra.mxu3 %vm1124_vm1, %v941_v14  ;;  %v4810_v14 = vld [vmem:[#allocation4 + $0xd8] sm:$0xf0] }
 0x206   :  { %v753_v15 = vpop.f32.mrf.mxu0  ;;  %v942_v16 = vpop.f32.mrf.mxu1 }
 0x207   :  { %v943_v19 = vadd.f32 %v942_v16, %v753_v15  ;;  %v6124_v15 = vor.u32 %v5324_v8, %v4808_v5  ;;  %v6126_v16 = vor.u32 %v5323_v13, %v4810_v14  ;;  %v5330_v5 = vld [vmem:[#allocation4 + $0x104] sm:$0xf0]  ;;  %v5329_v8 = vld [vmem:[#allocation4 + $0x104] sm:$0xf]  ;;  %v4834_v13 = vld [vmem:[#allocation4 + $0x108] sm:$0xf0] }
 0x209   :  { %7153 = vst [vmem:[#allocation39_spill] sm:$0xff] %v6124_v15 }
 0x20a   :  { %5003 = vmatmul.msk.f32.gmra.mxu3 %vm1124_vm1, %v943_v19  ;;  %7154 = vst [vmem:[#allocation40_spill] sm:$0xff] %v6126_v16 }
 0x20e   :  { %v756_v26 = vpop.f32.mrf.mxu0  ;;  %v945_v29 = vpop.f32.mrf.mxu1 }
 0x20f   :  { %v946_v30 = vadd.f32 %v945_v29, %v756_v26  ;;  %v4816_v29 = vld [vmem:[#allocation4 + $0xe0] sm:$0xf] }
 0x211   :  { %795 = vmatmul.bf16.gmra.mxu0 %v6099_v24  ;;  %984 = vmatmul.bf16.gmra.mxu1 %v6101_v25  ;;  %v6376_v25 = vld [vmem:[#allocation11 + $0x68] sm:$0xff] }
 0x212   :  { %5004 = vmatmul.msk.f32.gmra.mxu3 %vm1124_vm1, %v946_v30  ;;  %v5326_v30 = vld [vmem:[#allocation4 + $0xe4] sm:$0xf0]  ;;  %2197 = vmatpush.msrb.mxu0 %v6376_v25 }
 0x216   :  { %v758_v32 = vpop.f32.mrf.mxu0  ;;  %v947_v35 = vpop.f32.mrf.mxu1 }
 0x217   :  { %v948_v36 = vadd.f32 %v947_v35, %v758_v32  ;;  %v4818_v32 = vld [vmem:[#allocation4 + $0xe8] sm:$0xf0]  ;;  %v6132_v35 = vor.u32 %v5326_v30, %v4816_v29  ;;  %v4840_v30 = vld [vmem:[#allocation4 + $0x110] sm:$0xf] }
 0x219   :  { %7155 = vst [vmem:[#allocation41_spill] sm:$0xff] %v6132_v35 }
 0x21a   :  { %5005 = vmatmul.msk.f32.gmra.mxu3 %vm1124_vm1, %v948_v36  ;;  %v6134_v36 = vor.u32 %v5325_v31, %v4818_v32  ;;  %v5332_v31 = vld [vmem:[#allocation4 + $0x114] sm:$0xf0]  ;;  %v5331_v32 = vld [vmem:[#allocation4 + $0x114] sm:$0xf] }
 0x21c   :  { %7156 = vst [vmem:[#allocation42_spill] sm:$0xff] %v6134_v36 }
 0x21e   :  { %v761_v47 = vpop.f32.mrf.mxu0  ;;  %v950_v48 = vpop.f32.mrf.mxu1 }
 0x21f   :  { %v951_v49 = vadd.f32 %v950_v48, %v761_v47 }
 0x221   :  { %800 = vmatmul.bf16.gmra.mxu0 %v6108_v43  ;;  %989 = vmatmul.bf16.gmra.mxu1 %v6110_v44 }
 0x222   :  { %5006 = vmatmul.msk.f32.gmra.mxu3 %vm1124_vm1, %v951_v49 }
 0x226   :  { %v763_v50 = vpop.f32.mrf.mxu0  ;;  %v952_v51 = vpop.f32.mrf.mxu1 }
 0x227   :  { %v953_v54 = vadd.f32 %v952_v51, %v763_v50  ;;  %v4824_v50 = vld [vmem:[#allocation4 + $0xf0] sm:$0xf]  ;;  %v5328_v51 = vld [vmem:[#allocation4 + $0xf4] sm:$0xf0] }
 0x228   :  { %v6141_v56 = vor.u32 %v5328_v51, %v4824_v50 }
 0x22a   :  { %5007 = vmatmul.msk.f32.gmra.mxu3 %vm1124_vm1, %v953_v54  ;;  %v5327_v54 = vld [vmem:[#allocation4 + $0xf4] sm:$0xf]  ;;  %7157 = vst [vmem:[#allocation43_spill] sm:$0xff] %v6141_v56 }
 0x22b   :  { %v6143_v57 = vor.u32 %v5327_v54, %v4826_v55  ;;  %v4848_v54 = vld [vmem:[#allocation4 + $0x120] sm:$0xf]  ;;  %v5334_v55 = vld [vmem:[#allocation4 + $0x124] sm:$0xf0] }
 0x22d   :  { %7158 = vst [vmem:[#allocation44_spill] sm:$0xff] %v6143_v57 }
 0x22e   :  { %v766_v63 = vpop.f32.mrf.mxu0  ;;  %v955_v0 = vpop.f32.mrf.mxu1 }
 0x22f   :  { %v956_v1 = vadd.f32 %v955_v0, %v766_v63 }
 0x231   :  { %805 = vmatmul.bf16.gmra.mxu0 %v6116_v61  ;;  %994 = vmatmul.bf16.gmra.mxu1 %v6118_v62  ;;  %v1122_v62 = vld [vmem:[#allocation9 + $0x1c] sm:$0xf] }
 0x232   :  { %4991 = vmatmul.msk.f32.vlgmr.msra.gmra.mxu2 %vm1124_vm1, %v956_v1 }
 0x236   :  { %v768_v2 = vpop.f32.mrf.mxu0  ;;  %v957_v3 = vpop.f32.mrf.mxu1 }
 0x237   :  { %v958_v4 = vadd.f32 %v957_v3, %v768_v2 }
 0x23a   :  { %4992 = vmatmul.msk.f32.gmra.mxu2 %vm1124_vm1, %v958_v4  ;;  %v4832_v4 = vld [vmem:[#allocation4 + $0x100] sm:$0xf] }
 0x23b   :  { %v6149_v14 = vor.u32 %v5330_v5, %v4832_v4  ;;  %v1118_v5 = vld [vmem:[#allocation9 + $0xc] sm:$0xf] }
 0x23c   :  { %5017 = vmatpush.msk.msrb.mxu3 %vm1149_vm0, %v1118_v5  ;;  %5195 = vmatpush.msk.msra.mxu1 %vm1149_vm0, %v1118_v5 }
 0x23d   :  { %7159 = vst [vmem:[#allocation45_spill] sm:$0xff] %v6149_v14 }
 0x23e   :  { %v771_v19 = vpop.f32.mrf.mxu0  ;;  %v960_v11 = vpop.f32.mrf.mxu1 }
 0x23f   :  { %v961_v20 = vadd.f32 %v960_v11, %v771_v19  ;;  %v6151_v19 = vor.u32 %v5329_v8, %v4834_v13 }
 0x241   :  { %810 = vmatmul.bf16.gmra.mxu0 %v6124_v15  ;;  %999 = vmatmul.bf16.gmra.mxu1 %v6126_v16  ;;  %7160 = vst [vmem:[#allocation46_spill] sm:$0xff] %v6151_v19  ;;  %v4978_v16 = vld [vmem:[#allocation4 + $0x228] sm:$0xf0] }
 0x242   :  { %4993 = vmatmul.msk.f32.gmra.mxu2 %vm1124_vm1, %v961_v20 }
 0x246   :  { %v773_v12 = vpop.f32.mrf.mxu0  ;;  %v962_v23 = vpop.f32.mrf.mxu1 }
 0x247   :  { %v963_v26 = vadd.f32 %v962_v23, %v773_v12 }
 0x24a   :  { %4994 = vmatmul.msk.f32.gmra.mxu2 %vm1124_vm1, %v963_v26 }
 0x24e   :  { %v776_v37 = vpop.f32.mrf.mxu0  ;;  %v965_v38 = vpop.f32.mrf.mxu1 }
 0x24f   :  { %v966_v41 = vadd.f32 %v965_v38, %v776_v37  ;;  %v4842_v37 = vld [vmem:[#allocation4 + $0x118] sm:$0xf0]  ;;  %v6157_v38 = vor.u32 %v5332_v31, %v4840_v30 }
 0x251   :  { %815 = vmatmul.bf16.gmra.mxu0 %v6132_v35  ;;  %1004 = vmatmul.bf16.gmra.mxu1 %v6134_v36  ;;  %7161 = vst [vmem:[#allocation47_spill] sm:$0xff] %v6157_v38 }
 0x252   :  { %4995 = vmatmul.msk.f32.gmra.mxu2 %vm1124_vm1, %v966_v41  ;;  %v6159_v41 = vor.u32 %v5331_v32, %v4842_v37 }
 0x254   :  { %7162 = vst [vmem:[#allocation48_spill] sm:$0xff] %v6159_v41 }
 0x256   :  { %v778_v47 = vpop.f32.mrf.mxu0  ;;  %v967_v48 = vpop.f32.mrf.mxu1 }
 0x257   :  { %v968_v49 = vadd.f32 %v967_v48, %v778_v47 }
 0x25a   :  { %4996 = vmatmul.msk.f32.gmra.mxu2 %vm1124_vm1, %v968_v49 }
 0x25e   :  { %v781_v60 = vpop.f32.mrf.mxu0  ;;  %v970_v63 = vpop.f32.mrf.mxu1 }
 0x25f   :  { %v971_v0 = vadd.f32 %v970_v63, %v781_v60  ;;  %v5333_v60 = vld [vmem:[#allocation4 + $0x124] sm:$0xf]  ;;  %v4850_v63 = vld [vmem:[#allocation4 + $0x128] sm:$0xf0] }
 0x261   :  { %820 = vmatmul.bf16.gmra.mxu0 %v6141_v56  ;;  %1009 = vmatmul.bf16.gmra.mxu1 %v6143_v57 }
 0x262   :  { %4997 = vmatmul.msk.f32.gmra.mxu2 %vm1124_vm1, %v971_v0  ;;  %v6165_v0 = vor.u32 %v5334_v55, %v4848_v54  ;;  %v4866_v54 = vld [vmem:[#allocation4 + $0x148] sm:$0xf0] }
 0x264   :  { %7163 = vst [vmem:[#allocation49_spill] sm:$0xff] %v6165_v0 }
 0x266   :  { %v783_v1 = vpop.f32.mrf.mxu0  ;;  %v972_v2 = vpop.f32.mrf.mxu1 }
 0x267   :  { %v973_v3 = vadd.f32 %v972_v2, %v783_v1  ;;  %v6167_v1 = vor.u32 %v5333_v60, %v4850_v63 }
 0x269   :  { %7164 = vst [vmem:[#allocation50_spill] sm:$0xff] %v6167_v1 }
 0x26a   :  { %4998 = vmatmul.msk.f32.gmra.mxu2 %vm1124_vm1, %v973_v3 }
 0x26e   :  { %v786_v11 = vpop.f32.mrf.mxu0  ;;  %v975_v20 = vpop.f32.mrf.mxu1 }
 0x26f   :  { %v976_v12 = vadd.f32 %v975_v20, %v786_v11  ;;  %v4856_v20 = vld [vmem:[#allocation4 + $0x130] sm:$0xf] }
 0x271   :  { %825 = vmatmul.bf16.gmra.mxu0 %v6149_v14  ;;  %1014 = vmatmul.bf16.gmra.mxu1 %v6151_v19  ;;  %v4962_v14 = vld [vmem:[#allocation4 + $0x208] sm:$0xf0] }
 0x272   :  { %5009 = vmatmul.msk.f32.vlgmr.msrb.gmra.mxu2 %vm1124_vm1, %v976_v12  ;;  %v5336_v12 = vld [vmem:[#allocation4 + $0x134] sm:$0xf0] }
 0x276   :  { %v788_v23 = vpop.f32.mrf.mxu0  ;;  %v977_v26 = vpop.f32.mrf.mxu1 }
 0x277   :  { %v978_v29 = vadd.f32 %v977_v26, %v788_v23  ;;  %v5335_v23 = vld [vmem:[#allocation4 + $0x134] sm:$0xf]  ;;  %v4858_v26 = vld [vmem:[#allocation4 + $0x138] sm:$0xf0] }
 0x278   :  { %v6177_v30 = vor.u32 %v5335_v23, %v4858_v26 }
 0x27a   :  { %5010 = vmatmul.msk.f32.gmra.mxu2 %vm1124_vm1, %v978_v29  ;;  %v6175_v29 = vor.u32 %v5336_v12, %v4856_v20  ;;  %7166 = vst [vmem:[#allocation52_spill] sm:$0xff] %v6177_v30  ;;  %v5339_v20 = vld [vmem:[#allocation4 + $0x154] sm:$0xf]  ;;  %v4874_v12 = vld [vmem:[#allocation4 + $0x158] sm:$0xf0] }
 0x27b   :  { %v6193_v26 = vor.u32 %v5339_v20, %v4874_v12  ;;  %v4888_v12 = vld [vmem:[#allocation4 + $0x170] sm:$0xf] }
 0x27c   :  { %7165 = vst [vmem:[#allocation51_spill] sm:$0xff] %v6175_v29 }
 0x27d   :  { %7170 = vst [vmem:[#allocation56_spill] sm:$0xff] %v6193_v26 }
 0x27e   :  { %v791_v42 = vpop.f32.mrf.mxu0  ;;  %v980_v47 = vpop.f32.mrf.mxu1 }
 0x27f   :  { %v981_v48 = vadd.f32 %v980_v47, %v791_v42 }
 0x281   :  { %830 = vmatmul.bf16.gmra.mxu0 %v6157_v38  ;;  %1019 = vmatmul.bf16.gmra.mxu1 %v6159_v41 }
 0x282   :  { %5011 = vmatmul.msk.f32.gmra.mxu2 %vm1124_vm1, %v981_v48 }
 0x286   :  { %v793_v49 = vpop.f32.mrf.mxu0  ;;  %v982_v50 = vpop.f32.mrf.mxu1 }
 0x287   :  { %v983_v51 = vadd.f32 %v982_v50, %v793_v49  ;;  %v4864_v49 = vld [vmem:[#allocation4 + $0x140] sm:$0xf]  ;;  %v5338_v50 = vld [vmem:[#allocation4 + $0x144] sm:$0xf0] }
 0x288   :  { %v6183_v55 = vor.u32 %v5338_v50, %v4864_v49  ;;  %v4880_v49 = vld [vmem:[#allocation4 + $0x160] sm:$0xf]  ;;  %v5342_v50 = vld [vmem:[#allocation4 + $0x164] sm:$0xf0] }
 0x28a   :  { %5012 = vmatmul.msk.f32.gmra.mxu2 %vm1124_vm1, %v983_v51  ;;  %v5337_v51 = vld [vmem:[#allocation4 + $0x144] sm:$0xf]  ;;  %7167 = vst [vmem:[#allocation53_spill] sm:$0xff] %v6183_v55 }
 0x28b   :  { %v6185_v60 = vor.u32 %v5337_v51, %v4866_v54  ;;  %v5341_v51 = vld [vmem:[#allocation4 + $0x164] sm:$0xf]  ;;  %v4882_v54 = vld [vmem:[#allocation4 + $0x168] sm:$0xf0] }
 0x28d   :  { %7168 = vst [vmem:[#allocation54_spill] sm:$0xff] %v6185_v60 }
 0x28e   :  { %v796_v2 = vpop.f32.mrf.mxu0  ;;  %v985_v3 = vpop.f32.mrf.mxu1 }
 0x28f   :  { %v986_v4 = vadd.f32 %v985_v3, %v796_v2 }
 0x291   :  { %835 = vmatmul.bf16.gmra.mxu0 %v6165_v0  ;;  %1024 = vmatmul.bf16.gmra.mxu1 %v6167_v1  ;;  %v1121_v0 = vld [vmem:[#allocation9 + $0x18] sm:$0xf] }
 0x292   :  { %5013 = vmatmul.msk.f32.gmra.mxu2 %vm1124_vm1, %v986_v4 }
 0x296   :  { %v798_v8 = vpop.f32.mrf.mxu0  ;;  %v987_v13 = vpop.f32.mrf.mxu1 }
 0x297   :  { %v988_v11 = vadd.f32 %v987_v13, %v798_v8  ;;  %v4872_v13 = vld [vmem:[#allocation4 + $0x150] sm:$0xf] }
 0x29a   :  { %5014 = vmatmul.msk.f32.gmra.mxu2 %vm1124_vm1, %v988_v11  ;;  %v5340_v11 = vld [vmem:[#allocation4 + $0x154] sm:$0xf0] }
 0x29b   :  { %v6191_v23 = vor.u32 %v5340_v11, %v4872_v13 }
 0x29d   :  { %7169 = vst [vmem:[#allocation55_spill] sm:$0xff] %v6191_v23 }
 0x29e   :  { %v801_v31 = vpop.f32.mrf.mxu0  ;;  %v990_v32 = vpop.f32.mrf.mxu1 }
 0x29f   :  { %v991_v37 = vadd.f32 %v990_v32, %v801_v31 }
 0x2a1   :  { %840 = vmatmul.bf16.gmra.mxu0 %v6175_v29  ;;  %1029 = vmatmul.bf16.gmra.mxu1 %v6177_v30 }
 0x2a2   :  { %5015 = vmatmul.msk.f32.gmra.mxu2 %vm1124_vm1, %v991_v37 }
 0x2a6   :  { %v803_v42 = vpop.f32.mrf.mxu0  ;;  %v992_v47 = vpop.f32.mrf.mxu1 }
 0x2a7   :  { %v993_v48 = vadd.f32 %v992_v47, %v803_v42 }
 0x2aa   :  { %5016 = vmatmul.msk.f32.gmra.mxu2 %vm1124_vm1, %v993_v48 }
 0x2ae   :  { %v806_v63 = vpop.f32.mrf.mxu0  ;;  %v995_v2 = vpop.f32.mrf.mxu1 }
 0x2af   :  { %v996_v3 = vadd.f32 %v995_v2, %v806_v63  ;;  %v6199_v63 = vor.u32 %v5342_v50, %v4880_v49  ;;  %v6201_v2 = vor.u32 %v5341_v51, %v4882_v54 }
 0x2b1   :  { %845 = vmatmul.bf16.gmra.mxu0 %v6183_v55  ;;  %1034 = vmatmul.bf16.gmra.mxu1 %v6185_v60  ;;  %7171 = vst [vmem:[#allocation57_spill] sm:$0xff] %v6199_v63 }
 0x2b2   :  { %5018 = vmatmul.msk.f32.vlgmr.msrb.gmra.mxu3 %vm1124_vm1, %v996_v3  ;;  %7172 = vst [vmem:[#allocation58_spill] sm:$0xff] %v6201_v2 }
 0x2b6   :  { %v808_v4 = vpop.f32.mrf.mxu0  ;;  %v997_v5 = vpop.f32.mrf.mxu1 }
 0x2b7   :  { %v998_v8 = vadd.f32 %v997_v5, %v808_v4 }
 0x2ba   :  { %5019 = vmatmul.msk.f32.gmra.mxu3 %vm1124_vm1, %v998_v8  ;;  %v1119_v8 = vld [vmem:[#allocation9 + $0x10] sm:$0xf] }
 0x2bb   :  { %5026 = vmatpush.msk.msra.mxu2 %vm1149_vm0, %v1119_v8  ;;  %v5345_v8 = vld [vmem:[#allocation4 + $0x184] sm:$0xf] }
 0x2bd   :  { %5044 = vmatpush.msk.msrb.mxu2 %vm1149_vm0, %v1121_v0 }
 0x2be   :  { %v811_v31 = vpop.f32.mrf.mxu0  ;;  %v1000_v32 = vpop.f32.mrf.mxu1 }
 0x2bf   :  { %v1001_v37 = vadd.f32 %v1000_v32, %v811_v31  ;;  %v5344_v31 = vld [vmem:[#allocation4 + $0x174] sm:$0xf0]  ;;  %v5343_v32 = vld [vmem:[#allocation4 + $0x174] sm:$0xf] }
 0x2c1   :  { %850 = vmatmul.bf16.gmra.mxu0 %v6191_v23  ;;  %1039 = vmatmul.bf16.gmra.mxu1 %v6193_v26  ;;  %v4938_v26 = vld [vmem:[#allocation4 + $0x1d8] sm:$0xf0] }
 0x2c2   :  { %5020 = vmatmul.msk.f32.gmra.mxu3 %vm1124_vm1, %v1001_v37  ;;  %v4890_v37 = vld [vmem:[#allocation4 + $0x178] sm:$0xf0] }
 0x2c6   :  { %v813_v42 = vpop.f32.mrf.mxu0  ;;  %v1002_v47 = vpop.f32.mrf.mxu1 }
 0x2c7   :  { %v1003_v48 = vadd.f32 %v1002_v47, %v813_v42  ;;  %v6208_v42 = vor.u32 %v5344_v31, %v4888_v12  ;;  %v6210_v47 = vor.u32 %v5343_v32, %v4890_v37 }
 0x2c9   :  { %7173 = vst [vmem:[#allocation59_spill] sm:$0xff] %v6208_v42 }
 0x2ca   :  { %5021 = vmatmul.msk.f32.gmra.mxu3 %vm1124_vm1, %v1003_v48  ;;  %7174 = vst [vmem:[#allocation60_spill] sm:$0xff] %v6210_v47 }
 0x2ce   :  { %v816_v3 = vpop.f32.mrf.mxu0  ;;  %v1005_v4 = vpop.f32.mrf.mxu1 }
 0x2cf   :  { %v1006_v5 = vadd.f32 %v1005_v4, %v816_v3  ;;  %v4896_v4 = vld [vmem:[#allocation4 + $0x180] sm:$0xf] }
 0x2d1   :  { %855 = vmatmul.bf16.gmra.mxu0 %v6199_v63  ;;  %1044 = vmatmul.bf16.gmra.mxu1 %v6201_v2 }
 0x2d2   :  { %5022 = vmatmul.msk.f32.gmra.mxu3 %vm1124_vm1, %v1006_v5  ;;  %v5346_v5 = vld [vmem:[#allocation4 + $0x184] sm:$0xf0] }
 0x2d6   :  { %v818_v13 = vpop.f32.mrf.mxu0  ;;  %v1007_v11 = vpop.f32.mrf.mxu1 }
 0x2d7   :  { %v1008_v20 = vadd.f32 %v1007_v11, %v818_v13  ;;  %v4898_v13 = vld [vmem:[#allocation4 + $0x188] sm:$0xf0]  ;;  %v6216_v11 = vor.u32 %v5346_v5, %v4896_v4 }
 0x2d9   :  { %7175 = vst [vmem:[#allocation61_spill] sm:$0xff] %v6216_v11 }
 0x2da   :  { %5023 = vmatmul.msk.f32.gmra.mxu3 %vm1124_vm1, %v1008_v20  ;;  %v6218_v20 = vor.u32 %v5345_v8, %v4898_v13 }
 0x2dc   :  { %7176 = vst [vmem:[#allocation62_spill] sm:$0xff] %v6218_v20 }
 0x2de   :  { %v821_v48 = vpop.f32.mrf.mxu0  ;;  %v1010_v49 = vpop.f32.mrf.mxu1 }
 0x2df   :  { %v1011_v50 = vadd.f32 %v1010_v49, %v821_v48 }
 0x2e1   :  { %860 = vmatmul.bf16.gmra.mxu0 %v6208_v42  ;;  %1049 = vmatmul.bf16.gmra.mxu1 %v6210_v47 }
 0x2e2   :  { %5024 = vmatmul.msk.f32.gmra.mxu3 %vm1124_vm1, %v1011_v50  ;;  %v4904_v50 = vld [vmem:[#allocation4 + $0x190] sm:$0xf] }
 0x2e6   :  { %v823_v51 = vpop.f32.mrf.mxu0  ;;  %v1012_v54 = vpop.f32.mrf.mxu1 }
 0x2e7   :  { %v1013_v3 = vadd.f32 %v1012_v54, %v823_v51  ;;  %v5348_v51 = vld [vmem:[#allocation4 + $0x194] sm:$0xf0]  ;;  %v5347_v54 = vld [vmem:[#allocation4 + $0x194] sm:$0xf] }
 0x2e8   :  { %v6224_v4 = vor.u32 %v5348_v51, %v4904_v50  ;;  %v5350_v50 = vld [vmem:[#allocation4 + $0x1a4] sm:$0xf0]  ;;  %v5349_v51 = vld [vmem:[#allocation4 + $0x1a4] sm:$0xf] }
 0x2ea   :  { %5025 = vmatmul.msk.f32.gmra.mxu3 %vm1124_vm1, %v1013_v3  ;;  %v4906_v3 = vld [vmem:[#allocation4 + $0x198] sm:$0xf0]  ;;  %7177 = vst [vmem:[#allocation63_spill] sm:$0xff] %v6224_v4 }
 0x2eb   :  { %v6226_v5 = vor.u32 %v5347_v54, %v4906_v3  ;;  %v4914_v54 = vld [vmem:[#allocation4 + $0x1a8] sm:$0xf0] }
 0x2ed   :  { %7178 = vst [vmem:[#allocation64_spill] sm:$0xff] %v6226_v5 }
 0x2ee   :  { %v826_v12 = vpop.f32.mrf.mxu0  ;;  %v1015_v31 = vpop.f32.mrf.mxu1 }
 0x2ef   :  { %v1016_v32 = vadd.f32 %v1015_v31, %v826_v12 }
 0x2f1   :  { %865 = vmatmul.bf16.gmra.mxu0 %v6216_v11  ;;  %1054 = vmatmul.bf16.gmra.mxu1 %v6218_v20  ;;  %v1120_v11 = vld [vmem:[#allocation9 + $0x14] sm:$0xf] }
 0x2f2   :  { %5027 = vmatmul.msk.f32.vlgmr.msra.gmra.mxu2 %vm1124_vm1, %v1016_v32  ;;  %5035 = vmatpush.msk.msra.mxu3 %vm1149_vm0, %v1120_v11 }
 0x2f4   :  { %5053 = vmatpush.msk.msrb.mxu3 %vm1149_vm0, %v1122_v62 }
 0x2f6   :  { %v828_v37 = vpop.f32.mrf.mxu0  ;;  %v1017_v48 = vpop.f32.mrf.mxu1 }
 0x2f7   :  { %v1018_v49 = vadd.f32 %v1017_v48, %v828_v37  ;;  %v6231_v37 = vpop.f32.mrf.mxu2 }
 0x2fa   :  { %5028 = vmatmul.msk.f32.gmra.mxu2 %vm1124_vm1, %v1018_v49  ;;  %v4912_v49 = vld [vmem:[#allocation4 + $0x1a0] sm:$0xf] }
 0x2fb   :  { %v6234_v3 = vor.u32 %v5350_v50, %v4912_v49  ;;  %v6244_v49 = vpop.f32.mrf.mxu3  ;;  %v4920_v50 = vld [vmem:[#allocation4 + $0x1b0] sm:$0xf] }
 0x2fd   :  { %7179 = vst [vmem:[#allocation65_spill] sm:$0xff] %v6234_v3 }
 0x2fe   :  { %v831_v8 = vpop.f32.mrf.mxu0  ;;  %v1020_v13 = vpop.f32.mrf.mxu1 }
 0x2ff   :  { %v1021_v12 = vadd.f32 %v1020_v13, %v831_v8  ;;  %v6236_v8 = vor.u32 %v5349_v51, %v4914_v54  ;;  %v5351_v51 = vld [vmem:[#allocation4 + $0x1b4] sm:$0xf]  ;;  %v4922_v54 = vld [vmem:[#allocation4 + $0x1b8] sm:$0xf0] }
 0x301   :  { %870 = vmatmul.bf16.gmra.mxu0 %v6224_v4  ;;  %1059 = vmatmul.bf16.gmra.mxu1 %v6226_v5  ;;  %7180 = vst [vmem:[#allocation66_spill] sm:$0xff] %v6236_v8 }
 0x302   :  { %5029 = vmatmul.msk.f32.gmra.mxu2 %vm1124_vm1, %v1021_v12  ;;  %v6239_v12 = vpop.f32.mrf.mxu2 }
 0x306   :  { %v833_v31 = vpop.f32.mrf.mxu0  ;;  %v1022_v32 = vpop.f32.mrf.mxu1 }
 0x307   :  { %v1023_v48 = vadd.f32 %v1022_v32, %v833_v31 }
 0x30a   :  { %5030 = vmatmul.msk.f32.gmra.mxu2 %vm1124_vm1, %v1023_v48  ;;  %v6247_v11 = vpop.f32.mrf.mxu2 }
 0x30e   :  { %v836_v13 = vpop.f32.mrf.mxu0  ;;  %v1025_v4 = vpop.f32.mrf.mxu1 }
 0x30f   :  { %v1026_v5 = vadd.f32 %v1025_v4, %v836_v13  ;;  %v5352_v4 = vld [vmem:[#allocation4 + $0x1b4] sm:$0xf0] }
 0x310   :  { %v6249_v13 = vor.u32 %v5352_v4, %v4920_v50  ;;  %v4928_v50 = vld [vmem:[#allocation4 + $0x1c0] sm:$0xf]  ;;  %v5354_v4 = vld [vmem:[#allocation4 + $0x1c4] sm:$0xf0] }
 0x311   :  { %875 = vmatmul.bf16.gmra.mxu0 %v6234_v3  ;;  %1064 = vmatmul.bf16.gmra.mxu1 %v6236_v8  ;;  %v6251_v3 = vor.u32 %v5351_v51, %v4922_v54  ;;  %v5353_v51 = vld [vmem:[#allocation4 + $0x1c4] sm:$0xf]  ;;  %v4930_v54 = vld [vmem:[#allocation4 + $0x1c8] sm:$0xf0] }
 0x312   :  { %5031 = vmatmul.msk.f32.gmra.mxu2 %vm1124_vm1, %v1026_v5  ;;  %7181 = vst [vmem:[#allocation67_spill] sm:$0xff] %v6249_v13 }
 0x313   :  { %7182 = vst [vmem:[#allocation68_spill] sm:$0xff] %v6251_v3 }
 0x316   :  { %v838_v31 = vpop.f32.mrf.mxu0  ;;  %v1027_v32 = vpop.f32.mrf.mxu1 }
 0x317   :  { %v1028_v48 = vadd.f32 %v1027_v32, %v838_v31  ;;  %v6256_v31 = vpop.f32.mrf.mxu3  ;;  %v6258_v32 = vpop.f32.mrf.mxu2 }
 0x31a   :  { %5032 = vmatmul.msk.f32.gmra.mxu2 %vm1124_vm1, %v1028_v48 }
 0x31e   :  { %v841_v8 = vpop.f32.mrf.mxu0  ;;  %v1030_v20 = vpop.f32.mrf.mxu1 }
 0x31f   :  { %v1031_v5 = vadd.f32 %v1030_v20, %v841_v8  ;;  %v6261_v20 = vpop.f32.mrf.mxu3  ;;  %v6263_v8 = vor.u32 %v5354_v4, %v4928_v50  ;;  %v6267_v63 = vpop.f32.mrf.mxu2  ;;  %v4936_v4 = vld [vmem:[#allocation4 + $0x1d0] sm:$0xf] }
 0x321   :  { %880 = vmatmul.bf16.gmra.mxu0 %v6249_v13  ;;  %1069 = vmatmul.bf16.gmra.mxu1 %v6251_v3  ;;  %7183 = vst [vmem:[#allocation69_spill] sm:$0xff] %v6263_v8  ;;  %v6265_v13 = vor.u32 %v5353_v51, %v4930_v54  ;;  %v5356_v51 = vld [vmem:[#allocation4 + $0x1d4] sm:$0xf0]  ;;  %v5355_v54 = vld [vmem:[#allocation4 + $0x1d4] sm:$0xf] }
 0x322   :  { %5033 = vmatmul.msk.f32.gmra.mxu2 %vm1124_vm1, %v1031_v5 }
 0x323   :  { %7184 = vst [vmem:[#allocation70_spill] sm:$0xff] %v6265_v13 }
 0x326   :  { %v843_v48 = vpop.f32.mrf.mxu0  ;;  %v1032_v42 = vpop.f32.mrf.mxu1 }
 0x327   :  { %v1033_v47 = vadd.f32 %v1032_v42, %v843_v48  ;;  %v6272_v48 = vpop.f32.mrf.mxu3  ;;  %v6274_v50 = vpop.f32.mrf.mxu2 }
 0x32a   :  { %5034 = vmatmul.msk.f32.gmra.mxu2 %vm1124_vm1, %v1033_v47 }
 0x32e   :  { %v846_v5 = vpop.f32.mrf.mxu0  ;;  %v1035_v3 = vpop.f32.mrf.mxu1 }
 0x32f   :  { %v1036_v2 = vadd.f32 %v1035_v3, %v846_v5  ;;  %v6277_v3 = vor.u32 %v5356_v51, %v4936_v4  ;;  %v6279_v5 = vor.u32 %v5355_v54, %v4938_v26  ;;  %v6281_v55 = vpop.f32.mrf.mxu3  ;;  %v4944_v4 = vld [vmem:[#allocation4 + $0x1e0] sm:$0xf]  ;;  %v5358_v26 = vld [vmem:[#allocation4 + $0x1e4] sm:$0xf0]  ;;  %v5357_v51 = vld [vmem:[#allocation4 + $0x1e4] sm:$0xf] }
 0x330   :  { %v4946_v54 = vld [vmem:[#allocation4 + $0x1e8] sm:$0xf0] }
 0x331   :  { %885 = vmatmul.bf16.gmra.mxu0 %v6263_v8  ;;  %1074 = vmatmul.bf16.gmra.mxu1 %v6265_v13  ;;  %7185 = vst [vmem:[#allocation71_spill] sm:$0xff] %v6277_v3 }
 0x332   :  { %5036 = vmatmul.msk.f32.vlgmr.msra.gmra.mxu3 %vm1124_vm1, %v1036_v2  ;;  %7186 = vst [vmem:[#allocation72_spill] sm:$0xff] %v6279_v5 }
 0x336   :  { %v848_v42 = vpop.f32.mrf.mxu0  ;;  %v1037_v47 = vpop.f32.mrf.mxu1 }
 0x337   :  { %v1038_v23 = vadd.f32 %v1037_v47, %v848_v42  ;;  %v6286_v42 = vpop.f32.mrf.mxu2 }
 0x33a   :  { %5037 = vmatmul.msk.f32.gmra.mxu3 %vm1124_vm1, %v1038_v23 }
 0x33e   :  { %v851_v8 = vpop.f32.mrf.mxu0  ;;  %v1040_v13 = vpop.f32.mrf.mxu1 }
 0x33f   :  { %v1041_v2 = vadd.f32 %v1040_v13, %v851_v8  ;;  %v6289_v13 = vpop.f32.mrf.mxu3  ;;  %v6291_v8 = vpop.f32.mrf.mxu2 }
 0x341   :  { %890 = vmatmul.bf16.gmra.mxu0 %v6277_v3  ;;  %1079 = vmatmul.bf16.gmra.mxu1 %v6279_v5  ;;  %v6293_v3 = vor.u32 %v5358_v26, %v4944_v4  ;;  %v6295_v5 = vor.u32 %v5357_v51, %v4946_v54  ;;  %v4952_v51 = vld [vmem:[#allocation4 + $0x1f0] sm:$0xf]  ;;  %v5359_v54 = vld [vmem:[#allocation4 + $0x1f4] sm:$0xf] }
 0x342   :  { %5038 = vmatmul.msk.f32.gmra.mxu3 %vm1124_vm1, %v1041_v2 }
 0x343   :  { %7187 = vst [vmem:[#allocation73_spill] sm:$0xff] %v6293_v3 }
 0x344   :  { %7188 = vst [vmem:[#allocation74_spill] sm:$0xff] %v6295_v5 }
 0x346   :  { %v853_v23 = vpop.f32.mrf.mxu0  ;;  %v1042_v47 = vpop.f32.mrf.mxu1 }
 0x347   :  { %v1043_v60 = vadd.f32 %v1042_v47, %v853_v23  ;;  %v6303_v4 = vpop.f32.mrf.mxu2 }
 0x34a   :  { %5039 = vmatmul.msk.f32.gmra.mxu3 %vm1124_vm1, %v1043_v60  ;;  %v6301_v60 = vpop.f32.mrf.mxu3 }
 0x34e   :  { %v856_v2 = vpop.f32.mrf.mxu0  ;;  %v1045_v29 = vpop.f32.mrf.mxu1 }
 0x34f   :  { %v1046_v30 = vadd.f32 %v1045_v29, %v856_v2  ;;  %v5360_v29 = vld [vmem:[#allocation4 + $0x1f4] sm:$0xf0]  ;;  %v4954_v2 = vld [vmem:[#allocation4 + $0x1f8] sm:$0xf0]  ;;  %v6312_v41 = vpop.f32.mrf.mxu2 }
 0x350   :  { %v6306_v0 = vor.u32 %v5360_v29, %v4952_v51  ;;  %v4960_v29 = vld [vmem:[#allocation4 + $0x200] sm:$0xf] }
 0x351   :  { %895 = vmatmul.bf16.gmra.mxu0 %v6293_v3  ;;  %1084 = vmatmul.bf16.gmra.mxu1 %v6295_v5  ;;  %v6308_v3 = vor.u32 %v5359_v54, %v4954_v2  ;;  %v5362_v54 = vld [vmem:[#allocation4 + $0x204] sm:$0xf0]  ;;  %v5361_v2 = vld [vmem:[#allocation4 + $0x204] sm:$0xf] }
 0x352   :  { %5040 = vmatmul.msk.f32.gmra.mxu3 %vm1124_vm1, %v1046_v30  ;;  %7189 = vst [vmem:[#allocation75_spill] sm:$0xff] %v6306_v0  ;;  %v6310_v30 = vpop.f32.mrf.mxu3 }
 0x353   :  { %7190 = vst [vmem:[#allocation76_spill] sm:$0xff] %v6308_v3 }
 0x356   :  { %v858_v23 = vpop.f32.mrf.mxu0  ;;  %v1047_v47 = vpop.f32.mrf.mxu1 }
 0x357   :  { %v1048_v26 = vadd.f32 %v1047_v47, %v858_v23 }
 0x35a   :  { %5041 = vmatmul.msk.f32.gmra.mxu3 %vm1124_vm1, %v1048_v26  ;;  %v6317_v26 = vpop.f32.mrf.mxu3 }
 0x35e   :  { %v861_v5 = vpop.f32.mrf.mxu0  ;;  %v1050_v1 = vpop.f32.mrf.mxu1 }
 0x35f   :  { %v1051_v38 = vadd.f32 %v1050_v1, %v861_v5  ;;  %v6320_v1 = vpop.f32.mrf.mxu2  ;;  %v6322_v5 = vor.u32 %v5362_v54, %v4960_v29  ;;  %v4968_v29 = vld [vmem:[#allocation4 + $0x210] sm:$0xf]  ;;  %v5363_v54 = vld [vmem:[#allocation4 + $0x214] sm:$0xf] }
 0x361   :  { %900 = vmatmul.bf16.gmra.mxu0 %v6306_v0  ;;  %1089 = vmatmul.bf16.gmra.mxu1 %v6308_v3  ;;  %7191 = vst [vmem:[#allocation77_spill] sm:$0xff] %v6322_v5  ;;  %v6324_v0 = vor.u32 %v5361_v2, %v4962_v14  ;;  %v5364_v14 = vld [vmem:[#allocation4 + $0x214] sm:$0xf0]  ;;  %v4970_v2 = vld [vmem:[#allocation4 + $0x218] sm:$0xf0] }
 0x362   :  { %5042 = vmatmul.msk.f32.gmra.mxu3 %vm1124_vm1, %v1051_v38  ;;  %v6326_v56 = vpop.f32.mrf.mxu3 }
 0x363   :  { %7192 = vst [vmem:[#allocation78_spill] sm:$0xff] %v6324_v0 }
 0x366   :  { %v863_v23 = vpop.f32.mrf.mxu0  ;;  %v1052_v47 = vpop.f32.mrf.mxu1 }
 0x367   :  { %v1053_v51 = vadd.f32 %v1052_v47, %v863_v23  ;;  %v6331_v23 = vpop.f32.mrf.mxu2 }
 0x36a   :  { %5043 = vmatmul.msk.f32.gmra.mxu3 %vm1124_vm1, %v1053_v51 }
 0x36e   :  { %v866_v3 = vpop.f32.mrf.mxu0  ;;  %v1055_v19 = vpop.f32.mrf.mxu1 }
 0x36f   :  { %v1056_v38 = vadd.f32 %v1055_v19, %v866_v3  ;;  %v6334_v19 = vpop.f32.mrf.mxu3  ;;  %v6336_v3 = vor.u32 %v5364_v14, %v4968_v29  ;;  %v4976_v14 = vld [vmem:[#allocation4 + $0x220] sm:$0xf] }
 0x371   :  { %905 = vmatmul.bf16.gmra.mxu0 %v6322_v5  ;;  %1094 = vmatmul.bf16.gmra.mxu1 %v6324_v0  ;;  %7193 = vst [vmem:[#allocation79_spill] sm:$0xff] %v6336_v3  ;;  %v6338_v5 = vor.u32 %v5363_v54, %v4970_v2  ;;  %v5366_v54 = vld [vmem:[#allocation4 + $0x224] sm:$0xf0]  ;;  %v5365_v2 = vld [vmem:[#allocation4 + $0x224] sm:$0xf] }
 0x372   :  { %5045 = vmatmul.msk.f32.vlgmr.msrb.gmra.mxu2 %vm1124_vm1, %v1056_v38  ;;  %v6340_v38 = vpop.f32.mrf.mxu2 }
 0x373   :  { %7194 = vst [vmem:[#allocation80_spill] sm:$0xff] %v6338_v5 }
 0x376   :  { %v868_v47 = vpop.f32.mrf.mxu0  ;;  %v1057_v51 = vpop.f32.mrf.mxu1 }
 0x377   :  { %v1058_v57 = vadd.f32 %v1057_v51, %v868_v47 }
 0x37a   :  { %5046 = vmatmul.msk.f32.gmra.mxu2 %vm1124_vm1, %v1058_v57  ;;  %v6345_v57 = vpop.f32.mrf.mxu3  ;;  %v6347_v29 = vpop.f32.mrf.mxu2 }
 0x37e   :  { %v871_v0 = vpop.f32.mrf.mxu0  ;;  %v1060_v35 = vpop.f32.mrf.mxu1 }
 0x37f   :  { %v1061_v36 = vadd.f32 %v1060_v35, %v871_v0  ;;  %v6350_v35 = vor.u32 %v5366_v54, %v4976_v14  ;;  %v6352_v0 = vor.u32 %v5365_v2, %v4978_v16  ;;  %v4984_v54 = vld [vmem:[#allocation4 + $0x230] sm:$0xf]  ;;  %v4986_v2 = vld [vmem:[#allocation4 + $0x238] sm:$0xf0] }
 0x381   :  { %910 = vmatmul.bf16.gmra.mxu0 %v6336_v3  ;;  %1099 = vmatmul.bf16.gmra.mxu1 %v6338_v5  ;;  %7195 = vst [vmem:[#allocation81_spill] sm:$0xff] %v6350_v35 }
 0x382   :  { %5047 = vmatmul.msk.f32.gmra.mxu2 %vm1124_vm1, %v1061_v36  ;;  %7196 = vst [vmem:[#allocation82_spill] sm:$0xff] %v6352_v0  ;;  %v6354_v36 = vpop.f32.mrf.mxu3 }
 0x386   :  { %v873_v47 = vpop.f32.mrf.mxu0  ;;  %v1062_v51 = vpop.f32.mrf.mxu1 }
 0x387   :  { %v1063_v15 = vadd.f32 %v1062_v51, %v873_v47 }
 0x38a   :  { %5048 = vmatmul.msk.f32.gmra.mxu2 %vm1124_vm1, %v1063_v15  ;;  %v6360_v15 = vpop.f32.mrf.mxu2  ;;  %v6362_v14 = vpop.f32.mrf.mxu3 }
 0x38e   :  { %v876_v3 = vpop.f32.mrf.mxu0  ;;  %v1065_v5 = vpop.f32.mrf.mxu1 }
 0x38f   :  { %v1066_v61 = vadd.f32 %v1065_v5, %v876_v3  ;;  %v5368_v5 = vld [vmem:[#allocation4 + $0x234] sm:$0xf0]  ;;  %v5367_v3 = vld [vmem:[#allocation4 + $0x234] sm:$0xf] }
 0x391   :  { %915 = vmatmul.bf16.gmra.mxu0 %v6350_v35  ;;  %1104 = vmatmul.bf16.gmra.mxu1 %v6352_v0  ;;  %v6367_v35 = vor.u32 %v5368_v5, %v4984_v54  ;;  %v6369_v0 = vor.u32 %v5367_v3, %v4986_v2 }
 0x392   :  { %5049 = vmatmul.msk.f32.gmra.mxu2 %vm1124_vm1, %v1066_v61  ;;  %v6365_v62 = vpop.f32.mrf.mxu2 }
 0x393   :  { %7197 = vst [vmem:[#allocation83_spill] sm:$0xff] %v6367_v35 }
 0x394   :  { %7198 = vst [vmem:[#allocation84_spill] sm:$0xff] %v6369_v0 }
 0x396   :  { %v878_v47 = vpop.f32.mrf.mxu0  ;;  %v1067_v51 = vpop.f32.mrf.mxu1 }
 0x397   :  { %v1068_v16 = vadd.f32 %v1067_v51, %v878_v47  ;;  %v6374_v47 = vpop.f32.mrf.mxu3 }
 0x39a   :  { %5050 = vmatmul.msk.f32.gmra.mxu2 %vm1124_vm1, %v1068_v16  ;;  %v1458_v51 = vpop.f32.mrf.mxu2 }
 0x39e   :  { %v881_v61 = vpop.f32.mrf.mxu0  ;;  %v1070_v43 = vpop.f32.mrf.mxu1 }
 0x39f   :  { %v1071_v44 = vadd.f32 %v1070_v43, %v881_v61  ;;  %v6380_v5 = vpop.f32.mrf.mxu3  ;;  %v1239_v43 = vadd.f32 %v6244_v49, %v6231_v37  ;;  %v1245_v49 = vadd.f32 %v6261_v20, %v6247_v11 }
 0x3a1   :  { %920 = vmatmul.bf16.gmra.mxu0 %v6367_v35  ;;  %1109 = vmatmul.bf16.gmra.mxu1 %v6369_v0  ;;  %v1330_v35 = vadd.f32 %v6303_v4, %v1239_v43 }
 0x3a2   :  { %5051 = vmatmul.msk.f32.gmra.mxu2 %vm1124_vm1, %v1071_v44  ;;  %v6384_v44 = vpop.f32.mrf.mxu2 }
 0x3a6   :  { %v883_v16 = vpop.f32.mrf.mxu0  ;;  %v1072_v24 = vpop.f32.mrf.mxu1 }
 0x3a7   :  { %v1073_v54 = vadd.f32 %v1072_v24, %v883_v16  ;;  %v1406_v24 = vadd.f32 %v6317_v26, %v1330_v35  ;;  %v1332_v26 = vadd.f32 %v6320_v1, %v1245_v49  ;;  %v1123_v35 = vld [vmem:[#allocation9 + $0x20] sm:$0xf] }
 0x3a8   :  { %5062 = vmatpush.msk.msra.mxu2 %vm1149_vm0, %v1123_v35 }
 0x3a9   :  { %v1482_v16 = vadd.f32 %v1458_v51, %v1406_v24 }
 0x3aa   :  { %5052 = vmatmul.msk.f32.gmra.mxu2 %vm1124_vm1, %v1073_v54  ;;  %v1464_v59 = vpop.f32.mrf.mxu2 }
 0x3ae   :  { %v886_v3 = vpop.f32.mrf.mxu0  ;;  %v1075_v2 = vpop.f32.mrf.mxu1 }
 0x3af   :  { %v1076_v61 = vadd.f32 %v1075_v2, %v886_v3 }
 0x3b1   :  { %5054 = vmatmul.msk.f32.vlgmr.msrb.gmra.mxu3 %vm1124_vm1, %v1076_v61 }
 0x3b5   :  { %v1534_v0 = vpop.f32.mrf.mxu3 }
 0x3b6   :  { %v6389_v6 = vadd.f32 %v1534_v0, %v1482_v16  ;;  %v888_v54 = vpop.f32.mrf.mxu0  ;;  %v1077_v7 = vpop.f32.mrf.mxu1  ;;  %v1408_v0 = vadd.f32 %v6334_v19, %v1332_v26  ;;  %v1251_v16 = vadd.f32 %v6281_v55, %v6267_v63  ;;  %v1257_v63 = vadd.f32 %v6301_v60, %v6286_v42 }
 0x3b7   :  { %v1078_v58 = vadd.f32 %v1077_v7, %v888_v54  ;;  %v6400_v7 = vpop.f32.mrf.mxu2 }
 0x3b9   :  { %5055 = vmatmul.msk.f32.gmra.mxu3 %vm1124_vm1, %v1078_v58  ;;  %v1484_v58 = vadd.f32 %v1464_v59, %v1408_v0 }
 0x3bd   :  { %v6392_v37 = vpop.f32.mrf.mxu3 }
 0x3be   :  { %v891_v4 = vpop.f32.mrf.mxu0  ;;  %v1080_v43 = vpop.f32.mrf.mxu1 }
 0x3bf   :  { %v1081_v3 = vadd.f32 %v1080_v43, %v891_v4  ;;  %v1470_v24 = vpop.f32.mrf.mxu2  ;;  %v1334_v4 = vadd.f32 %v6340_v38, %v1251_v16 }
 0x3c1   :  { %5056 = vmatmul.msk.f32.gmra.mxu3 %vm1124_vm1, %v1081_v3  ;;  %v1410_v59 = vadd.f32 %v6354_v36, %v1334_v4  ;;  %v1336_v36 = vadd.f32 %v6360_v15, %v1257_v63 }
 0x3c3   :  { %v1486_v43 = vadd.f32 %v1470_v24, %v1410_v59  ;;  %v1412_v24 = vadd.f32 %v6374_v47, %v1336_v36 }
 0x3c5   :  { %v1540_v51 = vpop.f32.mrf.mxu3 }
 0x3c6   :  { %v6402_v2 = vadd.f32 %v1540_v51, %v1484_v58  ;;  %v893_v61 = vpop.f32.mrf.mxu0  ;;  %v1082_v11 = vpop.f32.mrf.mxu1 }
 0x3c7   :  { %v1083_v20 = vadd.f32 %v1082_v11, %v893_v61  ;;  %v6414_v58 = vpop.f32.mrf.mxu2 }
 0x3c9   :  { %5057 = vmatmul.msk.f32.gmra.mxu3 %vm1124_vm1, %v1083_v20 }
 0x3cd   :  { %v6405_v1 = vpop.f32.mrf.mxu3 }
 0x3ce   :  { %v896_v19 = vpop.f32.mrf.mxu0  ;;  %v1085_v54 = vpop.f32.mrf.mxu1 }
 0x3cf   :  { %v1086_v49 = vadd.f32 %v1085_v54, %v896_v19  ;;  %v1476_v20 = vpop.f32.mrf.mxu2 }
 0x3d0   :  { %v1488_v16 = vadd.f32 %v1476_v20, %v1412_v24 }
 0x3d1   :  { %5058 = vmatmul.msk.f32.gmra.mxu3 %vm1124_vm1, %v1086_v49 }
 0x3d5   :  { %v1546_v3 = vpop.f32.mrf.mxu3 }
 0x3d6   :  { %v6412_v26 = vadd.f32 %v1546_v3, %v1486_v43  ;;  %v898_v35 = vpop.f32.mrf.mxu0  ;;  %v1087_v0 = vpop.f32.mrf.mxu1 }
 0x3d7   :  { %v1088_v51 = vadd.f32 %v1087_v0, %v898_v35  ;;  %v6425_v43 = vpop.f32.mrf.mxu2 }
 0x3d9   :  { %5059 = vmatmul.msk.f32.gmra.mxu3 %vm1124_vm1, %v1088_v51 }
 0x3dd   :  { %v6417_v55 = vpop.f32.mrf.mxu3 }
 0x3de   :  { %v901_v38 = vpop.f32.mrf.mxu0  ;;  %v1090_v61 = vpop.f32.mrf.mxu1 }
 0x3df   :  { %v1091_v11 = vadd.f32 %v1090_v61, %v901_v38 }
 0x3e1   :  { %5060 = vmatmul.msk.f32.gmra.mxu3 %vm1124_vm1, %v1091_v11 }
 0x3e5   :  { %v1552_v19 = vpop.f32.mrf.mxu3 }
 0x3e6   :  { %v1564_v54 = vadd.f32 %v1552_v19, %v1488_v16  ;;  %v903_v49 = vpop.f32.mrf.mxu0  ;;  %v1092_v4 = vpop.f32.mrf.mxu1 }
 0x3e7   :  { %v1093_v59 = vadd.f32 %v1092_v4, %v903_v49 }
 0x3e9   :  { %5061 = vmatmul.msk.f32.gmra.mxu3 %vm1124_vm1, %v1093_v59 }
 0x3ee   :  { %v906_v42 = vpop.f32.mrf.mxu0  ;;  %v1095_v60 = vpop.f32.mrf.mxu1 }
 0x3ef   :  { %v1096_v3 = vadd.f32 %v1095_v60, %v906_v42 }
 0x3f1   :  { %5063 = vmatmul.msk.f32.vlgmr.msra.gmra.mxu2 %vm1124_vm1, %v1096_v3 }
 0x3f5   :  { %v1610_v15 = vpop.f32.mrf.mxu2 }
 0x3f6   :  { %v908_v35 = vpop.f32.mrf.mxu0  ;;  %v1097_v0 = vpop.f32.mrf.mxu1 }
 0x3f7   :  { %v1098_v51 = vadd.f32 %v1097_v0, %v908_v35 }
 0x3f9   :  { %5064 = vmatmul.msk.f32.gmra.mxu2 %vm1124_vm1, %v1098_v51 }
 0x3fd   :  { %v6429_v47 = vpop.f32.mrf.mxu2 }
 0x3fe   :  { %v911_v63 = vpop.f32.mrf.mxu0  ;;  %v1100_v38 = vpop.f32.mrf.mxu1 }
 0x3ff   :  { %v1101_v61 = vadd.f32 %v1100_v38, %v911_v63 }
 0x401   :  { %5065 = vmatmul.msk.f32.gmra.mxu2 %vm1124_vm1, %v1101_v61 }
 0x405   :  { %v6432_v11 = vpop.f32.mrf.mxu2 }
 0x406   :  { %v913_v36 = vpop.f32.mrf.mxu0  ;;  %v1102_v20 = vpop.f32.mrf.mxu1 }
 0x407   :  { %v1103_v24 = vadd.f32 %v1102_v20, %v913_v36 }
 0x409   :  { %5066 = vmatmul.msk.f32.gmra.mxu2 %vm1124_vm1, %v1103_v24 }
 0x40d   :  { %v6435_v16 = vpop.f32.mrf.mxu2 }
 0x40e   :  { %v916_v19 = vpop.f32.mrf.mxu0  ;;  %v1105_v49 = vpop.f32.mrf.mxu1 }
 0x40f   :  { %v1106_v4 = vadd.f32 %v1105_v49, %v916_v19  ;;  %v1555_v19 = vpop.f32.mrf.mxu3  ;;  %v1634_v49 = vadd.f32 %v1610_v15, %v6389_v6  ;;  %v1248_v15 = vadd.f32 %v6272_v48, %v6258_v32 }
 0x411   :  { %5067 = vmatmul.msk.f32.gmra.mxu2 %vm1124_vm1, %v1106_v4 }
 0x415   :  { %v1622_v59 = vpop.f32.mrf.mxu2 }
 0x416   :  { %v918_v42 = vpop.f32.mrf.mxu0  ;;  %v1107_v60 = vpop.f32.mrf.mxu1 }
 0x417   :  { %v1108_v3 = vadd.f32 %v1107_v60, %v918_v42 }
 0x419   :  { %5068 = vmatmul.msk.f32.gmra.mxu2 %vm1124_vm1, %v1108_v3 }
 0x41d   :  { %v1625_v35 = vpop.f32.mrf.mxu2 }
 0x41e   :  { %v921_v0 = vpop.f32.mrf.mxu0  ;;  %v1110_v51 = vpop.f32.mrf.mxu1 }
 0x41f   :  { %v1111_v63 = vadd.f32 %v1110_v51, %v921_v0 }
 0x421   :  { %5069 = vmatmul.msk.f32.gmra.mxu2 %vm1124_vm1, %v1111_v63 }
 0x425   :  { %v1628_v38 = vpop.f32.mrf.mxu2 }
 0x426   :  { %v1640_v61 = vadd.f32 %v1628_v38, %v1564_v54  ;;  %v923_v36 = vpop.f32.mrf.mxu0  ;;  %v1112_v20 = vpop.f32.mrf.mxu1 }
 0x427   :  { %v1113_v24 = vadd.f32 %v1112_v20, %v923_v36  ;;  %v1254_v20 = vadd.f32 %v6289_v13, %v6274_v50  ;;  %v1242_v50 = vadd.f32 %v6256_v31, %v6239_v12  ;;  %v1638_v31 = vadd.f32 %v1622_v59, %v6412_v26 }
 0x429   :  { %5070 = vmatmul.msk.f32.gmra.mxu2 %vm1124_vm1, %v1113_v24  ;;  %v1335_v6 = vadd.f32 %v6347_v29, %v1254_v20  ;;  %v1331_v48 = vadd.f32 %v6312_v41, %v1242_v50 }
 0x42d   :  { %v1631_v60 = vpop.f32.mrf.mxu2 }
 0x434   :  { %v1686_v4 = vpop.f32.mrf.mxu3 }
 0x435   :  { %v1710_v42 = vadd.f32 %v1686_v4, %v1634_v49  ;;  %v1411_v4 = vadd.f32 %v6362_v14, %v1335_v6 }
 0x437   :  { %v1487_v40 = vadd.f32 %v6414_v58, %v1411_v4  ;;  %v1407_v58 = vadd.f32 %v6326_v56, %v1331_v48  ;;  %v5580_v48 = vld [vmem:[#allocation9 + $0x4] sm:$0xf] }
 0x439   :  { %v1563_v32 = vadd.f32 %v6417_v55, %v1487_v40  ;;  %v1483_v40 = vadd.f32 %v6384_v44, %v1407_v58 }
 0x43b   :  { %v1639_v14 = vadd.f32 %v1625_v35, %v1563_v32  ;;  %v1559_v56 = vadd.f32 %v6392_v37, %v1483_v40  ;;  %v5372_v40 = vld [vmem:[#allocation6 + $0x18] sm:$0xff] }
 0x43c   :  { %v1689_v3 = vpop.f32.mrf.mxu3 }
 0x43d   :  { %v1635_v44 = vadd.f32 %v6429_v47, %v1559_v56  ;;  %v1977_v56 = vld [vmem:[#allocation11 + $0x8] sm:$0xff] }
 0x444   :  { %v1692_v0 = vpop.f32.mrf.mxu3 }
 0x44c   :  { %v1695_v63 = vpop.f32.mrf.mxu3 }
 0x454   :  { %v1698_v54 = vpop.f32.mrf.mxu3 }
 0x455   :  { %v1714_v55 = vadd.f32 %v1698_v54, %v1638_v31 }
 0x45c   :  { %v1701_v46 = vpop.f32.mrf.mxu3 }
 0x464   :  { %v1704_v49 = vpop.f32.mrf.mxu3 }
 0x474   :  { %v1762_v52 = vpop.f32.mrf.mxu2 }
 0x475   :  { %v6442_v53 = vadd.f32 %v1762_v52, %v1710_v42  ;;  %v1260_v52 = vadd.f32 %v6310_v30, %v6291_v8  ;;  %v1333_v42 = vadd.f32 %v6331_v23, %v1248_v15  ;;  %v1711_v15 = vadd.f32 %v1689_v3, %v1635_v44  ;;  %v1980_v44 = vld [vmem:[#allocation11 + $0x20] sm:$0xff] }
 0x477   :  { %v1337_v39 = vadd.f32 %v6365_v62, %v1260_v52  ;;  %v1409_v13 = vadd.f32 %v6345_v57, %v1333_v42  ;;  %v1716_v62 = vadd.f32 %v1704_v49, %v1640_v61  ;;  %v1715_v57 = vadd.f32 %v1701_v46, %v1639_v14 }
 0x479   :  { %v1413_v29 = vadd.f32 %v6380_v5, %v1337_v39  ;;  %v1485_v8 = vadd.f32 %v6400_v7, %v1409_v13  ;;  %v1707_v5 = vpop.f32.mrf.mxu3 }
 0x47b   :  { %v1489_v23 = vadd.f32 %v6425_v43, %v1413_v29  ;;  %v1561_v20 = vadd.f32 %v6405_v1, %v1485_v8  ;;  %v5565_v43 = vld [vmem:[%s7070_s11] ss:$0 sm:$0xff]  ;;  %v1636_v1 = vadd.f32 %v6432_v11, %v6402_v2 }
 0x47c   :  { %v1765_v51 = vpop.f32.mrf.mxu2 }
 0x47d   :  { %v1565_v12 = vadd.f32 %v1555_v19, %v1489_v23  ;;  %v1637_v41 = vadd.f32 %v6435_v16, %v1561_v20  ;;  %v1712_v16 = vadd.f32 %v1692_v0, %v1636_v1  ;;  %v1787_v37 = vadd.f32 %v1765_v51, %v1711_v15  ;;  %v1985_v15 = vld [vmem:[#allocation11 + $0x48] sm:$0xff] }
 0x47e   :  { %v1795_v51 = vadd.f32 %v5565_v43, %v6442_v53  ;;  %v5369_v53 = vld [vmem:[#allocation6] sm:$0xff] }
 0x47f   :  { %v1641_v7 = vadd.f32 %v1631_v60, %v1565_v12  ;;  %v1713_v26 = vadd.f32 %v1695_v63, %v1637_v41  ;;  %v5374_v41 = vld [vmem:[#allocation6 + $0x28] sm:$0xff] }
 0x480   :  { %v1811_v14 = vmul.f32 0.2, %v1795_v51  ;;  %vm1803_vm9 = vcmp.ge.f32.partialorder %v1795_v51, 0.0 }
 0x481   :  { %v1717_v46 = vadd.f32 %v1707_v5, %v1641_v7  ;;  %v5373_v5 = vld [vmem:[#allocation6 + $0x20] sm:$0xff]  ;;  %v5375_v7 = vld [vmem:[#allocation6 + $0x30] sm:$0xff] }
 0x482   :  { %v1819_v12 = vsel %vm1803_vm9, %v1795_v51, %v1811_v14 }
 0x484   :  { %v1768_v45 = vpop.f32.mrf.mxu2 }
 0x485   :  { %v1788_v49 = vadd.f32 %v1768_v45, %v1712_v16  ;;  %v1988_v45 = vld [vmem:[#allocation11 + $0x60] sm:$0xff]  ;;  %v1983_v16 = vld [vmem:[#allocation11 + $0x38] sm:$0xff] }
 0x486   :  { %2198 = vmatpush.msrb.mxu0 %v1988_v45 }
 0x487   :  { %v1797_v63 = vadd.f32 %v5565_v43, %v1788_v49 }
 0x488   :  { %5168 = vmatpush.msk.msra.mxu0 %vm1149_vm0, %v5580_v48 }
 0x489   :  { %v1813_v29 = vmul.f32 0.2, %v1797_v63  ;;  %vm1805_vm7 = vcmp.ge.f32.partialorder %v1797_v63, 0.0 }
 0x48c   :  { %v1771_v38 = vpop.f32.mrf.mxu2 }
 0x48d   :  { %v1789_v60 = vadd.f32 %v1771_v38, %v1713_v26  ;;  %v1796_v38 = vadd.f32 %v5565_v43, %v1787_v37  ;;  %v1976_v26 = vld [vmem:[#allocation11] sm:$0xff] }
 0x48f   :  { %v1798_v42 = vadd.f32 %v5565_v43, %v1789_v60  ;;  %vm1804_vm8 = vcmp.ge.f32.partialorder %v1796_v38, 0.0 }
 0x491   :  { %v1814_v13 = vmul.f32 0.2, %v1798_v42  ;;  %vm1806_vm6 = vcmp.ge.f32.partialorder %v1798_v42, 0.0 }
 0x493   :  { %v1822_v23 = vsel %vm1806_vm6, %v1798_v42, %v1814_v13  ;;  %v1986_v42 = vld [vmem:[#allocation11 + $0x50] sm:$0xff]  ;;  %v5581_v13 = vld [vmem:[#allocation9 + $0x8] sm:$0xf] }
 0x494   :  { %v1774_v36 = vpop.f32.mrf.mxu2 }
 0x495   :  { %v1790_v59 = vadd.f32 %v1774_v36, %v1714_v55  ;;  %v5376_v55 = vld [vmem:[#allocation6 + $0x38] sm:$0xff] }
 0x497   :  { %v1799_v52 = vadd.f32 %v5565_v43, %v1790_v59  ;;  %v1981_v59 = vld [vmem:[#allocation11 + $0x28] sm:$0xff] }
 0x499   :  { %v1815_v36 = vmul.f32 0.2, %v1799_v52  ;;  %vm1807_vm5 = vcmp.ge.f32.partialorder %v1799_v52, 0.0 }
 0x49b   :  { %v1823_v32 = vsel %vm1807_vm5, %v1799_v52, %v1815_v36  ;;  %v1984_v52 = vld [vmem:[#allocation11 + $0x40] sm:$0xff]  ;;  %v1990_v36 = vld [vmem:[#allocation11 + $0x70] sm:$0xff] }
 0x49c   :  { %v1777_v24 = vpop.f32.mrf.mxu2 }
 0x49d   :  { %v1791_v35 = vadd.f32 %v1777_v24, %v1715_v57  ;;  %v5370_v57 = vld [vmem:[#allocation6 + $0x8] sm:$0xff] }
 0x49f   :  { %v1800_v54 = vadd.f32 %v5565_v43, %v1791_v35  ;;  %v5377_v35 = vld [vmem:[#allocation6 + $0x40] sm:$0xff] }
 0x4a1   :  { %v1816_v2 = vmul.f32 0.2, %v1800_v54  ;;  %vm1808_vm4 = vcmp.ge.f32.partialorder %v1800_v54, 0.0 }
 0x4a3   :  { %v1824_v3 = vsel %vm1808_vm4, %v1800_v54, %v1816_v2  ;;  %v1982_v54 = vld [vmem:[#allocation11 + $0x30] sm:$0xff] }
 0x4a4   :  { %v1780_v30 = vpop.f32.mrf.mxu2  ;;  %v1847_v8 = vpack.c.bf16 %v1824_v3, %v1823_v32 }
 0x4a5   :  { %v1792_v39 = vadd.f32 %v1780_v30, %v1716_v62  ;;  %v1812_v30 = vmul.f32 0.2, %v1796_v38  ;;  %v1821_v62 = vsel %vm1805_vm7, %v1797_v63, %v1813_v29 }
 0x4a6   :  { %v1846_v58 = vpack.c.bf16 %v1822_v23, %v1821_v62 }
 0x4a7   :  { %v1801_v61 = vadd.f32 %v5565_v43, %v1792_v39  ;;  %v1820_v20 = vsel %vm1804_vm8, %v1796_v38, %v1812_v30  ;;  %v5371_v39 = vld [vmem:[#allocation6 + $0x10] sm:$0xff] }
 0x4a8   :  { %v1845_v31 = vpack.c.bf16 %v1820_v20, %v1819_v12  ;;  %v1992_v38 = vld [vmem:[#allocation11 + $0x80] sm:$0xff] }
 0x4a9   :  { %v1817_v24 = vmul.f32 0.2, %v1801_v61  ;;  %vm1809_vm2 = vcmp.ge.f32.partialorder %v1801_v61, 0.0 }
 0x4ab   :  { %v1825_v47 = vsel %vm1809_vm2, %v1801_v61, %v1817_v24 }
 0x4ac   :  { %v1783_v19 = vpop.f32.mrf.mxu2 }
 0x4ad   :  { %v1793_v6 = vadd.f32 %v1783_v19, %v1717_v46 }
 0x4af   :  { %v1802_v4 = vadd.f32 %v5565_v43, %v1793_v6  ;;  %v1978_v43 = vld [vmem:[#allocation11 + $0x10] sm:$0xff] }
 0x4b1   :  { %vm1810_vm3 = vcmp.ge.f32.partialorder %v1802_v4, 0.0  ;;  %v1818_v11 = vmul.f32 0.2, %v1802_v4 }
 0x4b3   :  { %v1826_v50 = vsel %vm1810_vm3, %v1802_v4, %v1818_v11  ;;  %v1987_v4 = vld [vmem:[#allocation11 + $0x58] sm:$0xff] }
 0x4b4   :  { %v1848_v0 = vpack.c.bf16 %v1826_v50, %v1825_v47  ;;  %v1991_v11 = vld [vmem:[#allocation11 + $0x78] sm:$0xff]  ;;  %v1993_v50 = vld [vmem:[#allocation11 + $0x88] sm:$0xff] }
 0x4b6   :  { %1926 = vmatpush.bf16.msra.mxu3 %v1848_v0 }
 0x4ba   :  { %1927 = vmatpush.bf16.msra.mxu3 %v1847_v8 }
 0x4be   :  { %1928 = vmatpush.bf16.msra.mxu3 %v1846_v58 }
 0x4c2   :  { %1929 = vmatpush.bf16.msra.mxu3 %v1845_v31 }
 0x4c5   :  { %5107 = vmatmul.msk.bf16.vlgmr.msra.gmra.mxu3 %vm1894_vm10, %v5369_v53 }
 0x4c6   :  { %5382 = vmatpush.msrb.mxu3 %v6376_v25  ;;  %v1979_v25 = vld [vmem:[#allocation11 + $0x18] sm:$0xff] }
 0x4c7   :  { %2015 = vmatpush.msrb.mxu2 %v1979_v25 }
 0x4c8   :  { %5383 = vmatpush.msrb.mxu3 %v1988_v45 }
 0x4c9   :  { %2016 = vmatpush.msrb.mxu2 %v1978_v43 }
 0x4ca   :  { %2259 = vmatpush.msra.mxu3 %v1993_v50 }
 0x4cb   :  { %2044 = vmatpush.msra.mxu2 %v1977_v56 }
 0x4cc   :  { %2260 = vmatpush.msra.mxu3 %v1992_v38  ;;  %v5380_v38 = vld [vmem:[#allocation8 + $0x10] sm:$0xff] }
 0x4cd   :  { %2045 = vmatpush.msra.mxu2 %v1976_v26 }
 0x4d5   :  { %5108 = vmatmul.msk.bf16.gmra.mxu3 %vm1894_vm10, %v5370_v57 }
 0x4e5   :  { %5109 = vmatmul.msk.bf16.gmra.mxu3 %vm1894_vm10, %v5371_v39 }
 0x4f5   :  { %5110 = vmatmul.msk.bf16.gmra.mxu3 %vm1894_vm10, %v5372_v40 }
 0x505   :  { %5111 = vmatmul.msk.bf16.gmra.mxu3 %vm1894_vm10, %v5373_v5 }
 0x515   :  { %5112 = vmatmul.msk.bf16.gmra.mxu3 %vm1894_vm10, %v5374_v41 }
 0x525   :  { %5113 = vmatmul.msk.bf16.gmra.mxu3 %vm1894_vm10, %v5375_v7 }
 0x535   :  { %5114 = vmatmul.msk.bf16.gmra.mxu3 %vm1894_vm10, %v5376_v55 }
 0x545   :  { %5115 = vmatmul.msk.bf16.gmra.mxu3 %vm1894_vm10, %v5377_v35 }
 0x548   :  { %v1931_v1 = vpop.f32.mrf.mxu3 }
 0x550   :  { %v1933_v46 = vpop.f32.mrf.mxu3 }
 0x558   :  { %v1936_v61 = vpop.f32.mrf.mxu3 }
 0x559   :  { %5116 = vmatmul.msk.f32.vlgmr.msrb.gmra.mxu2 %vm1994_vm11, %v1936_v61 }
 0x55a   :  { %2073 = vmatpush.msrb.mxu2 %v1981_v59 }
 0x55c   :  { %2074 = vmatpush.msrb.mxu2 %v1980_v44 }
 0x560   :  { %v1938_v19 = vpop.f32.mrf.mxu3 }
 0x561   :  { %5117 = vmatmul.msk.f32.gmra.mxu2 %vm1994_vm11, %v1938_v19 }
 0x568   :  { %v1941_v60 = vpop.f32.mrf.mxu3 }
 0x569   :  { %5118 = vmatmul.msk.f32.vlgmr.msra.gmra.mxu2 %vm1994_vm11, %v1931_v1 }
 0x56a   :  { %2104 = vmatpush.msra.mxu2 %v1983_v16  ;;  %v5566_v16 = vld [vmem:[%s7070_s11 + $0x1] ss:$0 sm:$0xff] }
 0x56c   :  { %2105 = vmatpush.msra.mxu2 %v1982_v54 }
 0x570   :  { %v1943_v6 = vpop.f32.mrf.mxu3 }
 0x571   :  { %5119 = vmatmul.msk.f32.gmra.mxu2 %vm1994_vm11, %v1933_v46 }
 0x578   :  { %v1946_v49 = vpop.f32.mrf.mxu3 }
 0x579   :  { %5120 = vmatmul.msk.f32.vlgmr.msrb.gmra.mxu2 %vm1994_vm11, %v1941_v60 }
 0x57a   :  { %2135 = vmatpush.msrb.mxu2 %v1985_v15 }
 0x57c   :  { %2136 = vmatpush.msrb.mxu2 %v1984_v52 }
 0x580   :  { %v1948_v24 = vpop.f32.mrf.mxu3 }
 0x581   :  { %5121 = vmatmul.msk.f32.gmra.mxu2 %vm1994_vm11, %v1943_v6 }
 0x588   :  { %v1951_v37 = vpop.f32.mrf.mxu3 }
 0x589   :  { %5122 = vmatmul.msk.f32.vlgmr.msra.gmra.mxu2 %vm1994_vm11, %v1946_v49 }
 0x58a   :  { %2166 = vmatpush.msra.mxu2 %v1987_v4 }
 0x58c   :  { %2167 = vmatpush.msra.mxu2 %v1986_v42 }
 0x590   :  { %v1953_v2 = vpop.f32.mrf.mxu3 }
 0x591   :  { %5123 = vmatmul.msk.f32.gmra.mxu2 %vm1994_vm11, %v1948_v24 }
 0x598   :  { %v1956_v63 = vpop.f32.mrf.mxu3 }
 0x599   :  { %5124 = vmatmul.msk.f32.vlgmr.msrb.gmra.mxu2 %vm1994_vm11, %v1951_v37 }
 0x59a   :  { %2228 = vmatpush.msrb.mxu2 %v1991_v11 }
 0x59c   :  { %2229 = vmatpush.msrb.mxu2 %v1990_v36  ;;  %v2693_v36 = vld.sshfl [vmem:[#allocation1] sm:$0xff pattern:$0x75316420] }
 0x5a0   :  { %v1958_v47 = vpop.f32.mrf.mxu3 }
 0x5a1   :  { %5125 = vmatmul.msk.f32.gmra.mxu2 %vm1994_vm11, %v1953_v2 }
 0x5a8   :  { %v1961_v0 = vpop.f32.mrf.mxu3 }
 0x5a9   :  { %5126 = vmatmul.msk.f32.vlgmr.msra.gmra.mxu2 %vm1994_vm11, %v1956_v63  ;;  %5128 = vmatmul.msk.f32.vlgmr.msrb.gmra.mxu0 %vm1994_vm11, %v1961_v0  ;;  %v5378_v63 = vld [vmem:[#allocation8] sm:$0xff]  ;;  %v5379_v0 = vld [vmem:[#allocation8 + $0x8] sm:$0xff] }
 0x5aa   :  { %5186 = vmatpush.msk.msrb.mxu0 %vm1149_vm0, %v5581_v13  ;;  %v5381_v13 = vld [vmem:[#allocation8 + $0x18] sm:$0xff] }
 0x5b0   :  { %v1963_v3 = vpop.f32.mrf.mxu3 }
 0x5b1   :  { %5127 = vmatmul.msk.f32.gmra.mxu2 %vm1994_vm11, %v1958_v47  ;;  %5129 = vmatmul.msk.f32.vlgmr.msrb.gmra.mxu3 %vm1994_vm11, %v1963_v3  ;;  %v2694_v47 = vld.sshfl [vmem:[#allocation1 + $0x8] sm:$0xff pattern:$0x75316420]  ;;  %v2287_v3 = vld [vmem:[#allocation8 + $0x20] sm:$0xf] }
 0x5b2   :  { %v5483_v50 = vpack.i.bf16 %v2694_v47, %v2693_v36 }
 0x5b4   :  { %5484 = vxpose.xlu0.b32.start.end [1/1] (short) %v5483_v50, 128 }
 0x5b8   :  { %v1966_v45 = vpop.f32.mrf.mxu3 }
 0x5b9   :  { %5130 = vmatmul.msk.f32.vlgmr.msrb.gmra.mxu2 %vm1994_vm11, %v1966_v45  ;;  %v2306_v45 = vunpack.c.l.b16 %v2287_v3 }
 0x5c0   :  { %v1968_v51 = vpop.f32.mrf.mxu3 }
 0x5c1   :  { %5131 = vmatmul.msk.f32.gmra.mxu2 %vm1994_vm11, %v1968_v51  ;;  %v6513_v51 = vpack.c.b16 %v2306_v45, %v2306_v45 }
 0x5c8   :  { %v1971_v29 = vpop.f32.mrf.mxu3 }
 0x5c9   :  { %5132 = vmatmul.msk.f32.vlgmr.msra.gmra.mxu3 %vm1994_vm11, %v1971_v29  ;;  %v2363_v29 = vld [vmem:[%s7068_s9 + $0x18] sm:$0xff] }
 0x5ca   :  { %2395 = vmatpush.msrb.mxu3 %v2363_v29 }
 0x5d0   :  { %v1973_v32 = vpop.f32.mrf.mxu3 }
 0x5d1   :  { %5133 = vmatmul.msk.f32.gmra.mxu3 %vm1994_vm11, %v1973_v32  ;;  %v2362_v32 = vld [vmem:[%s7068_s9 + $0x10] sm:$0xff] }
 0x5d2   :  { %2396 = vmatpush.msrb.mxu3 %v2362_v32 }
 0x5dc   :  { %v2018_v48 = vpop.f32.mrf.mxu2 }
 0x5e4   :  { %v2021_v8 = vpop.f32.mrf.mxu2 }
 0x5ec   :  { %v2047_v30 = vpop.f32.mrf.mxu2 }
 0x5ed   :  { %v2048_v39 = vadd.f32 %v2047_v30, %v2018_v48  ;;  %v2361_v48 = vld [vmem:[%s7068_s9 + $0x8] sm:$0xff] }
 0x5ee   :  { %2418 = vmatpush.msra.mxu3 %v2361_v48 }
 0x5f4   :  { %v2050_v23 = vpop.f32.mrf.mxu2 }
 0x5f5   :  { %v2051_v7 = vadd.f32 %v2050_v23, %v2021_v8  ;;  %v2360_v8 = vld [vmem:[%s7068_s9] sm:$0xff]  ;;  %v2365_v23 = vld [vmem:[%s7068_s9 + $0x28] sm:$0xff] }
 0x5f6   :  { %2419 = vmatpush.msra.mxu3 %v2360_v8 }
 0x5fc   :  { %v2076_v14 = vpop.f32.mrf.mxu2 }
 0x5fd   :  { %v2082_v40 = vadd.f32 %v2076_v14, %v2048_v39  ;;  %v2371_v39 = vld [vmem:[%s7068_s9 + $0x58] sm:$0xff] }
 0x604   :  { %v2079_v62 = vpop.f32.mrf.mxu2 }
 0x605   :  { %v2083_v43 = vadd.f32 %v2079_v62, %v2051_v7  ;;  %v2364_v62 = vld [vmem:[%s7068_s9 + $0x20] sm:$0xff] }
 0x60c   :  { %v2107_v58 = vpop.f32.mrf.mxu2 }
 0x60d   :  { %v2113_v5 = vadd.f32 %v2107_v58, %v2082_v40  ;;  %v2367_v58 = vld [vmem:[%s7068_s9 + $0x38] sm:$0xff] }
 0x614   :  { %v2110_v20 = vpop.f32.mrf.mxu2 }
 0x615   :  { %v2114_v56 = vadd.f32 %v2110_v20, %v2083_v43  ;;  %v2375_v43 = vld [vmem:[%s7068_s9 + $0x78] sm:$0xff] }
 0x61c   :  { %v2138_v12 = vpop.f32.mrf.mxu2 }
 0x61d   :  { %v2144_v25 = vadd.f32 %v2138_v12, %v2113_v5  ;;  %v2366_v12 = vld [vmem:[%s7068_s9 + $0x30] sm:$0xff] }
 0x61e   :  { %v2370_v5 = vld [vmem:[%s7068_s9 + $0x50] sm:$0xff] }
 0x624   :  { %v2141_v31 = vpop.f32.mrf.mxu2 }
 0x625   :  { %v2145_v26 = vadd.f32 %v2141_v31, %v2114_v56  ;;  %v2369_v31 = vld [vmem:[%s7068_s9 + $0x48] sm:$0xff]  ;;  %v2374_v56 = vld [vmem:[%s7068_s9 + $0x70] sm:$0xff] }
 0x626   :  { %v2200_v1 = vpop.f32.mrf.mxu0 }
 0x62c   :  { %v2169_v53 = vpop.f32.mrf.mxu2 }
 0x62d   :  { %v2175_v35 = vadd.f32 %v2169_v53, %v2144_v25  ;;  %v2372_v25 = vld [vmem:[%s7068_s9 + $0x60] sm:$0xff] }
 0x62f   :  { %v2206_v46 = vadd.f32 %v2200_v1, %v2175_v35 }
 0x634   :  { %v2172_v57 = vpop.f32.mrf.mxu2  ;;  %v2203_v41 = vpop.f32.mrf.mxu3 }
 0x635   :  { %v2176_v61 = vadd.f32 %v2172_v57, %v2145_v26  ;;  %v2368_v57 = vld [vmem:[%s7068_s9 + $0x40] sm:$0xff]  ;;  %v2377_v26 = vld [vmem:[%s7068_s9 + $0x88] sm:$0xff] }
 0x637   :  { %v2207_v54 = vadd.f32 %v2203_v41, %v2176_v61  ;;  %v2373_v41 = vld [vmem:[%s7068_s9 + $0x68] sm:$0xff] }
 0x63c   :  { %v2231_v55 = vpop.f32.mrf.mxu2 }
 0x63d   :  { %v2237_v44 = vadd.f32 %v2231_v55, %v2206_v46 }
 0x644   :  { %v2234_v60 = vpop.f32.mrf.mxu2 }
 0x645   :  { %v2238_v6 = vadd.f32 %v2234_v60, %v2207_v54 }
 0x64c   :  { %v2262_v59 = vpop.f32.mrf.mxu3 }
 0x64d   :  { %v2268_v19 = vadd.f32 %v2262_v59, %v2237_v44  ;;  %v2376_v59 = vld [vmem:[%s7068_s9 + $0x80] sm:$0xff] }
 0x64f   :  { %v2271_v15 = vadd.f32 %v5566_v16, %v2268_v19 }
 0x651   :  { %v2275_v24 = vmul.f32 0.2, %v2271_v15  ;;  %vm2273_vm12 = vcmp.ge.f32.partialorder %v2271_v15, 0.0 }
 0x653   :  { %v2277_v42 = vsel %vm2273_vm12, %v2271_v15, %v2275_v24  ;;  %vm4530_vm12 = vcmask 195584  }
 0x654   :  { %v2265_v49 = vpop.f32.mrf.mxu3 }
 0x655   :  { %v2269_v52 = vadd.f32 %v2265_v49, %v2238_v6 }
 0x657   :  { %v2272_v4 = vadd.f32 %v5566_v16, %v2269_v52 }
 0x658   :  { %v5485_v55 = vpop.trf.xlu0 }
 0x659   :  { %vm2274_vm13 = vcmp.ge.f32.partialorder %v2272_v4, 0.0  ;;  %v2276_v37 = vmul.f32 0.2, %v2272_v4  ;;  %v5489_v61 = vunpack.i.h.bf16 %v5485_v55  ;;  %v5486_v44 = vunpack.i.l.bf16 %v5485_v55 }
 0x65b   :  { %v2278_v2 = vsel %vm2274_vm13, %v2272_v4, %v2276_v37 }
 0x65c   :  { %v2288_v11 = vpack.c.bf16 %v2278_v2, %v2277_v42 }
 0x65e   :  { %2334 = vmatpush.bf16.msra.mxu2 %v2288_v11 }
 0x660   :  { %v5490_v1 = vpop.trf.xlu0 }
 0x661   :  { %5150 = vmatmul.msk.bf16.vlgmr.msra.gmra.mxu2 %vm1994_vm11, %v5378_v63  ;;  %v5494_v19 = vunpack.i.h.bf16 %v5490_v1  ;;  %v5491_v16 = vunpack.i.l.bf16 %v5490_v1 }
 0x663   :  { %v6578_v54 = vpack.c.bf16 %v5494_v19, %v5489_v61  ;;  %v6580_v6 = vpack.c.bf16 %v5491_v16, %v5486_v44 }
 0x668   :  { %v5495_v60 = vpop.trf.xlu0 }
 0x669   :  { %v5499_v24 = vunpack.i.h.bf16 %v5495_v60  ;;  %v5496_v4 = vunpack.i.l.bf16 %v5495_v60 }
 0x670   :  { %v5500_v49 = vpop.trf.xlu0 }
 0x671   :  { %5151 = vmatmul.msk.bf16.gmra.mxu2 %vm1994_vm11, %v5379_v0  ;;  %v5504_v37 = vunpack.i.h.bf16 %v5500_v49  ;;  %v5501_v42 = vunpack.i.l.bf16 %v5500_v49 }
 0x673   :  { %v6584_v11 = vpack.c.bf16 %v5504_v37, %v5499_v24  ;;  %v6586_v63 = vpack.c.bf16 %v5501_v42, %v5496_v4  ;;  %v212_v24 = vld [vmem:[#allocation12 + $0x18] sm:$0xff]  ;;  %v209_v4 = vld [vmem:[#allocation12] sm:$0xff]  ;;  %v211_v42 = vld [vmem:[#allocation12 + $0x10] sm:$0xff] }
 0x674   :  { %v216_v37 = vld [vmem:[#allocation12 + $0x38] sm:$0xff] }
 0x678   :  { %v5505_v2 = vpop.trf.xlu0 }
 0x679   :  { %v5509_v47 = vunpack.i.h.bf16 %v5505_v2  ;;  %v5506_v50 = vunpack.i.l.bf16 %v5505_v2  ;;  %v214_v2 = vld [vmem:[#allocation12 + $0x28] sm:$0xff] }
 0x680   :  { %v5510_v36 = vpop.trf.xlu0 }
 0x681   :  { %5152 = vmatmul.msk.bf16.gmra.mxu2 %vm1994_vm11, %v5380_v38  ;;  %v5514_v0 = vunpack.i.h.bf16 %v5510_v36  ;;  %v5511_v38 = vunpack.i.l.bf16 %v5510_v36  ;;  %v215_v36 = vld [vmem:[#allocation12 + $0x30] sm:$0xff] }
 0x683   :  { %v6588_v3 = vpack.c.bf16 %v5514_v0, %v5509_v47  ;;  %v6590_v45 = vpack.c.bf16 %v5511_v38, %v5506_v50  ;;  %v213_v50 = vld [vmem:[#allocation12 + $0x20] sm:$0xff] }
 0x691   :  { %5153 = vmatmul.msk.bf16.gmra.mxu2 %vm1994_vm11, %v5381_v13  ;;  %v5515_v13 = vpop.trf.xlu0 }
 0x692   :  { %v5519_v32 = vunpack.i.h.bf16 %v5515_v13  ;;  %v5516_v48 = vunpack.i.l.bf16 %v5515_v13 }
 0x699   :  { %v5520_v29 = vpop.trf.xlu0 }
 0x69a   :  { %v5524_v8 = vunpack.i.h.bf16 %v5520_v29 }
 0x6a1   :  { %5154 = vmatmul.msk.bf16.gmra.mxu2 %vm1994_vm11, %v6513_v51 }
 0x6e4   :  { %v2336_v30 = vpop.f32.mrf.mxu2 }
 0x6ec   :  { %v2338_v14 = vpop.f32.mrf.mxu2 }
 0x6ed   :  { %5155 = vmatmul.msk.f32.vlgmr.msrb.gmra.mxu3 %vm1994_vm11, %v2338_v14  ;;  %v6592_v14 = vpack.c.bf16 %v5524_v8, %v5519_v32 }
 0x6ee   :  { %2441 = vmatpush.msrb.mxu3 %v2365_v23  ;;  %v5525_v23 = vpop.trf.xlu0 }
 0x6f0   :  { %2442 = vmatpush.msrb.mxu3 %v2364_v62 }
 0x6f4   :  { %v2341_v20 = vpop.f32.mrf.mxu2 }
 0x6f5   :  { %5156 = vmatmul.msk.f32.vlgmr.msra.gmra.mxu3 %vm1994_vm11, %v2336_v30  ;;  %v5521_v30 = vunpack.i.l.bf16 %v5520_v29 }
 0x6f6   :  { %2465 = vmatpush.msra.mxu3 %v2367_v58  ;;  %v5530_v58 = vpop.trf.xlu0 }
 0x6f7   :  { %v6594_v62 = vpack.c.bf16 %v5521_v30, %v5516_v48 }
 0x6f8   :  { %2466 = vmatpush.msra.mxu3 %v2366_v12  ;;  %v5526_v12 = vunpack.i.l.bf16 %v5525_v23 }
 0x6fc   :  { %v2343_v53 = vpop.f32.mrf.mxu2 }
 0x6fd   :  { %5157 = vmatmul.msk.f32.vlgmr.msrb.gmra.mxu3 %vm1994_vm11, %v2341_v20  ;;  %v5529_v20 = vunpack.i.h.bf16 %v5525_v23 }
 0x6fe   :  { %2489 = vmatpush.msrb.mxu3 %v2369_v31  ;;  %v5534_v31 = vunpack.i.h.bf16 %v5530_v58 }
 0x700   :  { %2490 = vmatpush.msrb.mxu3 %v2368_v57  ;;  %v5535_v57 = vpop.trf.xlu0 }
 0x704   :  { %v2346_v40 = vpop.f32.mrf.mxu2 }
 0x705   :  { %5158 = vmatmul.msk.f32.vlgmr.msra.gmra.mxu3 %vm1994_vm11, %v2343_v53  ;;  %v5531_v53 = vunpack.i.l.bf16 %v5530_v58  ;;  %v5567_v58 = vld [vmem:[%s7070_s11 + $0x2] ss:$0 sm:$0xff] }
 0x706   :  { %2513 = vmatpush.msra.mxu3 %v2371_v39  ;;  %v6596_v39 = vpack.c.bf16 %v5534_v31, %v5529_v20 }
 0x708   :  { %2514 = vmatpush.msra.mxu3 %v2370_v5  ;;  %v5540_v5 = vpop.trf.xlu0 }
 0x709   :  { %v5541_v55 = vunpack.i.l.bf16 %v5540_v5 }
 0x70c   :  { %v2348_v7 = vpop.f32.mrf.mxu2 }
 0x70d   :  { %5159 = vmatmul.msk.f32.vlgmr.msrb.gmra.mxu3 %vm1994_vm11, %v2346_v40  ;;  %v6598_v40 = vpack.c.bf16 %v5531_v53, %v5526_v12 }
 0x70e   :  { %2537 = vmatpush.msrb.mxu3 %v2373_v41  ;;  %v5539_v41 = vunpack.i.h.bf16 %v5535_v57 }
 0x710   :  { %2538 = vmatpush.msrb.mxu3 %v2372_v25  ;;  %v5544_v25 = vunpack.i.h.bf16 %v5540_v5 }
 0x714   :  { %v2351_v35 = vpop.f32.mrf.mxu2 }
 0x715   :  { %5160 = vmatmul.msk.f32.vlgmr.msra.gmra.mxu3 %vm1994_vm11, %v2348_v7  ;;  %v5536_v7 = vunpack.i.l.bf16 %v5535_v57 }
 0x716   :  { %2561 = vmatpush.msra.mxu3 %v2375_v43 }
 0x717   :  { %v6602_v1 = vpack.c.bf16 %v5541_v55, %v5536_v7 }
 0x718   :  { %2562 = vmatpush.msra.mxu3 %v2374_v56  ;;  %v6600_v56 = vpack.c.bf16 %v5544_v25, %v5539_v41 }
 0x71c   :  { %v2353_v46 = vpop.f32.mrf.mxu2 }
 0x71d   :  { %5161 = vmatmul.msk.f32.vlgmr.msrb.gmra.mxu3 %vm1994_vm11, %v2351_v35  ;;  %v5545_v35 = vpop.trf.xlu0 }
 0x71e   :  { %2585 = vmatpush.msrb.mxu3 %v2377_v26  ;;  %v5546_v61 = vunpack.i.l.bf16 %v5545_v35  ;;  %v5549_v25 = vunpack.i.h.bf16 %v5545_v35 }
 0x720   :  { %2586 = vmatpush.msrb.mxu3 %v2376_v59 }
 0x724   :  { %v2356_v15 = vpop.f32.mrf.mxu2 }
 0x725   :  { %5162 = vmatmul.msk.f32.vlgmr.msra.gmra.mxu3 %vm1994_vm11, %v2353_v46  ;;  %v210_v46 = vld [vmem:[#allocation12 + $0x8] sm:$0xff]  ;;  %v5550_v59 = vpop.trf.xlu0 }
 0x726   :  { %2637 = vmatpush.msrb.mxu2 %v210_v46  ;;  %v5551_v44 = vunpack.i.l.bf16 %v5550_v59  ;;  %2615 = vmatpush.msra.mxu3 %v212_v24  ;;  %v5554_v55 = vunpack.i.h.bf16 %v5550_v59  ;;  %v7207_v59 = vld [vmem:[#allocation32_spill] sm:$0xff] }
 0x728   :  { %v2767_v60 = vpack.c.bf16 %v5551_v44, %v5546_v61  ;;  %2638 = vmatpush.msrb.mxu2 %v209_v4  ;;  %2616 = vmatpush.msra.mxu3 %v211_v42  ;;  %v2775_v44 = vpack.c.bf16 %v5554_v55, %v5549_v25  ;;  %v7209_v42 = vld [vmem:[#allocation34_spill] sm:$0xff] }
 0x72a   :  { %2684 = vmatpush.msra.mxu2 %v216_v37 }
 0x72c   :  { %v2358_v52 = vpop.f32.mrf.mxu2  ;;  %2685 = vmatpush.msra.mxu2 %v215_v36 }
 0x72d   :  { %5163 = vmatmul.msk.f32.vlgmr.msrb.gmra.mxu3 %vm1994_vm11, %v2356_v15  ;;  %v5555_v16 = vpop.trf.xlu0 }
 0x72e   :  { %2660 = vmatpush.msrb.mxu3 %v214_v2  ;;  %v5559_v31 = vunpack.i.h.bf16 %v5555_v16  ;;  %v5556_v5 = vunpack.i.l.bf16 %v5555_v16  ;;  %v7210_v2 = vld [vmem:[#allocation33_spill] sm:$0xff] }
 0x730   :  { %2661 = vmatpush.msrb.mxu3 %v213_v50 }
 0x735   :  { %v5560_v49 = vpop.trf.xlu0 }
 0x736   :  { %v5564_v53 = vunpack.i.h.bf16 %v5560_v49  ;;  %v5561_v41 = vunpack.i.l.bf16 %v5560_v49 }
 0x738   :  { %v2768_v61 = vpack.c.bf16 %v5561_v41, %v5556_v5  ;;  %v5584_v41 = vld [vmem:[#allocation9 + $0x10] sm:$0xf] }
 0x770   :  { %v2398_v43 = vpop.f32.mrf.mxu3 }
 0x778   :  { %v2421_v26 = vpop.f32.mrf.mxu3 }
 0x779   :  { %v2422_v38 = vadd.f32 %v2421_v26, %v2398_v43  ;;  %v2776_v43 = vpack.c.bf16 %v5564_v53, %v5559_v31  ;;  %v7214_v31 = vld [vmem:[#allocation37_spill] sm:$0xff] }
 0x780   :  { %v2444_v19 = vpop.f32.mrf.mxu3 }
 0x781   :  { %v2447_v13 = vadd.f32 %v2444_v19, %v2422_v38 }
 0x788   :  { %v2468_v15 = vpop.f32.mrf.mxu3 }
 0x789   :  { %v2471_v29 = vadd.f32 %v2468_v15, %v2447_v13 }
 0x790   :  { %v2492_v52 = vpop.f32.mrf.mxu3 }
 0x791   :  { %v2495_v48 = vadd.f32 %v2492_v52, %v2471_v29  ;;  %v7211_v29 = vld [vmem:[#allocation36_spill] sm:$0xff] }
 0x798   :  { %v2516_v47 = vpop.f32.mrf.mxu3 }
 0x799   :  { %v2519_v8 = vadd.f32 %v2516_v47, %v2495_v48 }
 0x7a0   :  { %v2540_v0 = vpop.f32.mrf.mxu3 }
 0x7a1   :  { %v2543_v30 = vadd.f32 %v2540_v0, %v2519_v8 }
 0x7a8   :  { %v2564_v32 = vpop.f32.mrf.mxu3 }
 0x7a9   :  { %v2567_v23 = vadd.f32 %v2564_v32, %v2543_v30  ;;  %v7212_v32 = vld [vmem:[#allocation35_spill] sm:$0xff] }
 0x7b0   :  { %v2588_v20 = vpop.f32.mrf.mxu3 }
 0x7b1   :  { %v2591_v12 = vadd.f32 %v2588_v20, %v2567_v23 }
 0x7b3   :  { %v2593_v57 = vadd.f32 %v5567_v58, %v2591_v12  ;;  %v7213_v12 = vld [vmem:[#allocation38_spill] sm:$0xff] }
 0x7b5   :  { %vm2594_vm14 = vcmp.ge.f32.partialorder %v2593_v57, 0.0  ;;  %v2595_v7 = vmul.f32 0.2, %v2593_v57 }
 0x7b7   :  { %v2596_v26 = vsel %vm2594_vm14, %v2593_v57, %v2595_v7  ;;  %vm4518_vm14 = vcmask 1040384  }
 0x7b8   :  { %v2598_v46 = vrot.slane %v2596_v26, 1  ;;  %5165 = vmatmul.msk.f32.vlgmr.msrb.gmra.mxu2 %vm1994_vm11, %v2596_v26  ;;  %v2667_v19 = vrot.slane %v2596_v26, 3  ;;  %v2643_v16 = vrot.slane %v2596_v26, 2  ;;  %v7216_v26 = vld [vmem:[#allocation39_spill] sm:$0xff] }
 0x7b9   :  { %2966 = vmatpush.bf16.msrb.mxu2 %v2776_v43  ;;  %v7215_v43 = vld [vmem:[#allocation40_spill] sm:$0xff] }
 0x7ba   :  { %5164 = vmatmul.msk.f32.vlgmr.msra.gmra.mxu3 %vm1994_vm11, %v2598_v46 }
 0x7bb   :  { %2777 = vmatpush.bf16.msra.mxu3 %v2768_v61 }
 0x7bd   :  { %2967 = vmatpush.bf16.msrb.mxu2 %v2775_v44 }
 0x7bf   :  { %2778 = vmatpush.bf16.msra.mxu3 %v2767_v60  ;;  %v7208_v60 = vld [vmem:[#allocation31_spill] sm:$0xff] }
 0x7c0   :  { %5167 = vmatmul.msk.f32.vlgmr.msra.gmra.mxu2 %vm1994_vm11, %v2667_v19 }
 0x7c1   :  { %2968 = vmatpush.bf16.msrb.mxu2 %v6600_v56 }
 0x7c2   :  { %5166 = vmatmul.msk.f32.vlgmr.msrb.gmra.mxu3 %vm1994_vm11, %v2643_v16 }
 0x7c3   :  { %2779 = vmatpush.bf16.msra.mxu3 %v6602_v1 }
 0x7c5   :  { %2969 = vmatpush.bf16.msrb.mxu2 %v6596_v39  ;;  %v5582_v39 = vld [vmem:[#allocation9] sm:$0xf] }
 0x7c7   :  { %2780 = vmatpush.bf16.msra.mxu3 %v6598_v40  ;;  %v5583_v40 = vld [vmem:[#allocation9 + $0x14] sm:$0xf] }
 0x7c9   :  { %2970 = vmatpush.bf16.msrb.mxu2 %v6592_v14 }
 0x7cb   :  { %2781 = vmatpush.bf16.msra.mxu3 %v6594_v62 }
 0x7cd   :  { %2971 = vmatpush.bf16.msrb.mxu2 %v6588_v3  ;;  %v7206_v3 = vld [vmem:[#allocation29_spill] sm:$0xff] }
 0x7cf   :  { %2782 = vmatpush.bf16.msra.mxu3 %v6590_v45 }
 0x7d1   :  { %2972 = vmatpush.bf16.msrb.mxu2 %v6584_v11 }
 0x7d3   :  { %2783 = vmatpush.bf16.msra.mxu3 %v6586_v63 }
 0x7d5   :  { %2973 = vmatpush.bf16.msrb.mxu2 %v6578_v54  ;;  %v7201_v54 = vld [vmem:[#allocation26_spill] sm:$0xff] }
 0x7d7   :  { %2784 = vmatpush.bf16.msra.mxu3 %v6580_v6 }
 0x7d8   :  { %2974 = vmatmul.bf16.vlgmr.msrb.gmra.mxu2 %v6033_v10  ;;  %v7199_v10 = vld [vmem:[#allocation24_spill] sm:$0xff] }
 0x7da   :  { %2785 = vmatmul.bf16.vlgmr.msra.gmra.mxu3 %v6031_v9  ;;  %v7200_v9 = vld [vmem:[#allocation23_spill] sm:$0xff] }
 0x7db   :  { %5384 = vmatpush.msk.msrb.mxu3 %vm1149_vm0, %v5582_v39 }
 0x7dd   :  { %4508 = vmatpush.msra.mxu3 %v216_v37 }
 0x7df   :  { %4509 = vmatpush.msra.mxu3 %v215_v36 }
 0x7e8   :  { %2979 = vmatmul.bf16.gmra.mxu2 %v6041_v18  ;;  %v7202_v18 = vld [vmem:[#allocation25_spill] sm:$0xff] }
 0x7ea   :  { %2790 = vmatmul.bf16.gmra.mxu3 %v6039_v17 }
 0x7f8   :  { %2984 = vmatmul.bf16.gmra.mxu2 %v6047_v22 }
 0x7fa   :  { %2795 = vmatmul.bf16.gmra.mxu3 %v6045_v21 }
 0x808   :  { %2989 = vmatmul.bf16.gmra.mxu2 %v6053_v28 }
 0x80a   :  { %2800 = vmatmul.bf16.gmra.mxu3 %v6051_v27  ;;  %v7203_v27 = vld [vmem:[#allocation28_spill] sm:$0xff] }
 0x818   :  { %2994 = vmatmul.bf16.gmra.mxu2 %v6059_v34  ;;  %v7204_v34 = vld [vmem:[#allocation27_spill] sm:$0xff] }
 0x81a   :  { %2805 = vmatmul.bf16.gmra.mxu3 %v6057_v33  ;;  %v7205_v33 = vld [vmem:[#allocation30_spill] sm:$0xff] }
 0x828   :  { %2999 = vmatmul.bf16.gmra.mxu2 %v7199_v10  ;;  %v7217_v10 = vld [vmem:[#allocation42_spill] sm:$0xff] }
 0x82a   :  { %2810 = vmatmul.bf16.gmra.mxu3 %v7200_v9  ;;  %v7218_v9 = vld [vmem:[#allocation41_spill] sm:$0xff] }
 0x838   :  { %3004 = vmatmul.bf16.gmra.mxu2 %v7201_v54 }
 0x83a   :  { %2815 = vmatmul.bf16.gmra.mxu3 %v7202_v18 }
 0x83b   :  { %v2640_v17 = vpop.f32.mrf.mxu2 }
 0x83d   :  { %v2618_v22 = vpop.f32.mrf.mxu3 }
 0x83e   :  { %v2641_v6 = vadd.f32 %v2640_v17, %v2618_v22 }
 0x843   :  { %v2687_v28 = vpop.f32.mrf.mxu2 }
 0x845   :  { %v2663_v21 = vpop.f32.mrf.mxu3 }
 0x846   :  { %v2666_v11 = vadd.f32 %v2663_v21, %v2641_v6 }
 0x848   :  { %v6638_v63 = vadd.f32 %v2687_v28, %v2666_v11  ;;  %3009 = vmatmul.bf16.gmra.mxu2 %v7203_v27  ;;  %v7219_v11 = vld [vmem:[#allocation44_spill] sm:$0xff]  ;;  %v7220_v28 = vld [vmem:[#allocation43_spill] sm:$0xff] }
 0x84a   :  { %2820 = vmatmul.bf16.gmra.mxu3 %v7204_v34 }
 0x858   :  { %3014 = vmatmul.bf16.gmra.mxu2 %v7205_v33 }
 0x85a   :  { %2825 = vmatmul.bf16.gmra.mxu3 %v7206_v3 }
 0x85b   :  { %v2975_v45 = vpop.f32.mrf.mxu2 }
 0x85d   :  { %v2786_v14 = vpop.f32.mrf.mxu3 }
 0x85e   :  { %v2976_v62 = vadd.f32 %v2975_v45, %v2786_v14 }
 0x860   :  { %5178 = vmatmul.msk.f32.vlgmr.msrb.gmra.mxu1 %vm1124_vm1, %v2976_v62  ;;  %v7221_v62 = vld [vmem:[#allocation46_spill] sm:$0xff] }
 0x861   :  { %5213 = vmatpush.msk.msrb.mxu1 %vm1149_vm0, %v5583_v40  ;;  %v7222_v40 = vld [vmem:[#allocation45_spill] sm:$0xff] }
 0x863   :  { %v2977_v35 = vpop.f32.mrf.mxu2 }
 0x865   :  { %v2788_v56 = vpop.f32.mrf.mxu3 }
 0x866   :  { %v2978_v1 = vadd.f32 %v2977_v35, %v2788_v56 }
 0x868   :  { %3019 = vmatmul.bf16.gmra.mxu2 %v7207_v59  ;;  %5179 = vmatmul.msk.f32.gmra.mxu1 %vm1124_vm1, %v2978_v1  ;;  %v5585_v59 = vld [vmem:[#allocation9 + $0x18] sm:$0xf] }
 0x86a   :  { %2830 = vmatmul.bf16.gmra.mxu3 %v7208_v60 }
 0x86b   :  { %v2980_v15 = vpop.f32.mrf.mxu2 }
 0x86d   :  { %v2791_v49 = vpop.f32.mrf.mxu3 }
 0x86e   :  { %v2981_v52 = vadd.f32 %v2980_v15, %v2791_v49 }
 0x870   :  { %5180 = vmatmul.msk.f32.gmra.mxu1 %vm1124_vm1, %v2981_v52  ;;  %v7223_v52 = vld [vmem:[#allocation48_spill] sm:$0xff] }
 0x873   :  { %v2982_v24 = vpop.f32.mrf.mxu2 }
 0x875   :  { %v2793_v4 = vpop.f32.mrf.mxu3 }
 0x876   :  { %v2983_v37 = vadd.f32 %v2982_v24, %v2793_v4  ;;  %v7224_v24 = vld [vmem:[#allocation47_spill] sm:$0xff] }
 0x878   :  { %3024 = vmatmul.bf16.gmra.mxu2 %v7209_v42  ;;  %5181 = vmatmul.msk.f32.gmra.mxu1 %vm1124_vm1, %v2983_v37 }
 0x87a   :  { %2835 = vmatmul.bf16.gmra.mxu3 %v7210_v2 }
 0x87b   :  { %v2985_v36 = vpop.f32.mrf.mxu2 }
 0x87d   :  { %v2796_v47 = vpop.f32.mrf.mxu3 }
 0x87e   :  { %v2986_v50 = vadd.f32 %v2985_v36, %v2796_v47 }
 0x880   :  { %5182 = vmatmul.msk.f32.gmra.mxu1 %vm1124_vm1, %v2986_v50  ;;  %v7225_v50 = vld [vmem:[#allocation50_spill] sm:$0xff] }
 0x883   :  { %v2987_v0 = vpop.f32.mrf.mxu2 }
 0x885   :  { %v2798_v38 = vpop.f32.mrf.mxu3 }
 0x886   :  { %v2988_v13 = vadd.f32 %v2987_v0, %v2798_v38  ;;  %v7226_v0 = vld [vmem:[#allocation49_spill] sm:$0xff] }
 0x888   :  { %3029 = vmatmul.bf16.gmra.mxu2 %v7211_v29  ;;  %5183 = vmatmul.msk.f32.gmra.mxu1 %vm1124_vm1, %v2988_v13 }
 0x88a   :  { %2840 = vmatmul.bf16.gmra.mxu3 %v7212_v32 }
 0x88b   :  { %v2990_v48 = vpop.f32.mrf.mxu2 }
 0x88d   :  { %v2801_v8 = vpop.f32.mrf.mxu3 }
 0x88e   :  { %v6657_v30 = vadd.f32 %v2990_v48, %v2801_v8 }
 0x893   :  { %v2992_v23 = vpop.f32.mrf.mxu2 }
 0x895   :  { %v2803_v58 = vpop.f32.mrf.mxu3 }
 0x896   :  { %v6659_v20 = vadd.f32 %v2992_v23, %v2803_v58  ;;  %v7227_v23 = vld [vmem:[#allocation52_spill] sm:$0xff]  ;;  %v7228_v58 = vld [vmem:[#allocation51_spill] sm:$0xff] }
 0x898   :  { %3034 = vmatmul.bf16.gmra.mxu2 %v7213_v12 }
 0x89a   :  { %2845 = vmatmul.bf16.gmra.mxu3 %v7214_v31 }
 0x89b   :  { %v2995_v53 = vpop.f32.mrf.mxu2 }
 0x89d   :  { %v2806_v57 = vpop.f32.mrf.mxu3 }
 0x89e   :  { %v2996_v5 = vadd.f32 %v2995_v53, %v2806_v57 }
 0x8a0   :  { %5169 = vmatmul.msk.f32.vlgmr.msra.gmra.mxu0 %vm1124_vm1, %v2996_v5 }
 0x8a1   :  { %5204 = vmatpush.msk.msra.mxu0 %vm1149_vm0, %v5584_v41 }
 0x8a3   :  { %v2997_v7 = vpop.f32.mrf.mxu2 }
 0x8a5   :  { %v2808_v25 = vpop.f32.mrf.mxu3 }
 0x8a6   :  { %v2998_v55 = vadd.f32 %v2997_v7, %v2808_v25  ;;  %v7229_v7 = vld [vmem:[#allocation54_spill] sm:$0xff]  ;;  %v7230_v25 = vld [vmem:[#allocation53_spill] sm:$0xff] }
 0x8a8   :  { %3039 = vmatmul.bf16.gmra.mxu2 %v7215_v43  ;;  %5170 = vmatmul.msk.f32.gmra.mxu0 %vm1124_vm1, %v2998_v55 }
 0x8aa   :  { %2850 = vmatmul.bf16.gmra.mxu3 %v7216_v26 }
 0x8ab   :  { %v3000_v46 = vpop.f32.mrf.mxu2 }
 0x8ad   :  { %v2811_v61 = vpop.f32.mrf.mxu3 }
 0x8ae   :  { %v3001_v44 = vadd.f32 %v3000_v46, %v2811_v61  ;;  %v5586_v46 = vld [vmem:[#allocation9 + $0x1c] sm:$0xf] }
 0x8b0   :  { %5171 = vmatmul.msk.f32.gmra.mxu0 %vm1124_vm1, %v3001_v44 }
 0x8b3   :  { %v3002_v19 = vpop.f32.mrf.mxu2 }
 0x8b5   :  { %v2813_v16 = vpop.f32.mrf.mxu3 }
 0x8b6   :  { %v3003_v39 = vadd.f32 %v3002_v19, %v2813_v16  ;;  %v7231_v16 = vld [vmem:[#allocation56_spill] sm:$0xff] }
 0x8b8   :  { %3044 = vmatmul.bf16.gmra.mxu2 %v7217_v10  ;;  %5172 = vmatmul.msk.f32.gmra.mxu0 %vm1124_vm1, %v3003_v39  ;;  %v7232_v39 = vld [vmem:[#allocation55_spill] sm:$0xff] }
 0x8ba   :  { %2855 = vmatmul.bf16.gmra.mxu3 %v7218_v9 }
 0x8bb   :  { %v3005_v54 = vpop.f32.mrf.mxu2 }
 0x8bd   :  { %v2816_v18 = vpop.f32.mrf.mxu3 }
 0x8be   :  { %v3006_v17 = vadd.f32 %v3005_v54, %v2816_v18 }
 0x8c0   :  { %5173 = vmatmul.msk.f32.gmra.mxu0 %vm1124_vm1, %v3006_v17 }
 0x8c3   :  { %v3007_v22 = vpop.f32.mrf.mxu2 }
 0x8c5   :  { %v2818_v6 = vpop.f32.mrf.mxu3 }
 0x8c6   :  { %v3008_v21 = vadd.f32 %v3007_v22, %v2818_v6  ;;  %v7233_v6 = vld [vmem:[#allocation58_spill] sm:$0xff] }
 0x8c8   :  { %3049 = vmatmul.bf16.gmra.mxu2 %v7219_v11  ;;  %5174 = vmatmul.msk.f32.gmra.mxu0 %vm1124_vm1, %v3008_v21  ;;  %v7234_v21 = vld [vmem:[#allocation57_spill] sm:$0xff] }
 0x8ca   :  { %2860 = vmatmul.bf16.gmra.mxu3 %v7220_v28 }
 0x8cb   :  { %v3010_v27 = vpop.f32.mrf.mxu2 }
 0x8cd   :  { %v2821_v34 = vpop.f32.mrf.mxu3 }
 0x8ce   :  { %v3011_v33 = vadd.f32 %v3010_v27, %v2821_v34 }
 0x8d0   :  { %5175 = vmatmul.msk.f32.gmra.mxu0 %vm1124_vm1, %v3011_v33 }
 0x8d3   :  { %v3012_v3 = vpop.f32.mrf.mxu2 }
 0x8d5   :  { %v2823_v45 = vpop.f32.mrf.mxu3 }
 0x8d6   :  { %v3013_v14 = vadd.f32 %v3012_v3, %v2823_v45  ;;  %v7235_v45 = vld [vmem:[#allocation60_spill] sm:$0xff] }
 0x8d8   :  { %3054 = vmatmul.bf16.gmra.mxu2 %v7221_v62  ;;  %5176 = vmatmul.msk.f32.gmra.mxu0 %vm1124_vm1, %v3013_v14  ;;  %v7236_v14 = vld [vmem:[#allocation59_spill] sm:$0xff] }
 0x8da   :  { %2865 = vmatmul.bf16.gmra.mxu3 %v7222_v40 }
 0x8db   :  { %v3015_v35 = vpop.f32.mrf.mxu2 }
 0x8dd   :  { %v2826_v56 = vpop.f32.mrf.mxu3 }
 0x8de   :  { %v3016_v1 = vadd.f32 %v3015_v35, %v2826_v56 }
 0x8e0   :  { %5187 = vmatmul.msk.f32.vlgmr.msrb.gmra.mxu0 %vm1124_vm1, %v3016_v1 }
 0x8e1   :  { %5222 = vmatpush.msk.msrb.mxu0 %vm1149_vm0, %v5585_v59 }
 0x8e3   :  { %v3017_v60 = vpop.f32.mrf.mxu2 }
 0x8e5   :  { %v2828_v15 = vpop.f32.mrf.mxu3 }
 0x8e6   :  { %v3018_v49 = vadd.f32 %v3017_v60, %v2828_v15  ;;  %v7237_v60 = vld [vmem:[#allocation62_spill] sm:$0xff]  ;;  %v7238_v15 = vld [vmem:[#allocation61_spill] sm:$0xff] }
 0x8e8   :  { %3059 = vmatmul.bf16.gmra.mxu2 %v7223_v52  ;;  %5188 = vmatmul.msk.f32.gmra.mxu0 %vm1124_vm1, %v3018_v49 }
 0x8ea   :  { %2870 = vmatmul.bf16.gmra.mxu3 %v7224_v24 }
 0x8eb   :  { %v3020_v4 = vpop.f32.mrf.mxu2 }
 0x8ed   :  { %v2831_v37 = vpop.f32.mrf.mxu3 }
 0x8ee   :  { %v3021_v42 = vadd.f32 %v3020_v4, %v2831_v37  ;;  %v5587_v4 = vld [vmem:[#allocation9 + $0x20] sm:$0xf] }
 0x8f0   :  { %5189 = vmatmul.msk.f32.gmra.mxu0 %vm1124_vm1, %v3021_v42 }
 0x8f3   :  { %v3022_v2 = vpop.f32.mrf.mxu2 }
 0x8f5   :  { %v2833_v36 = vpop.f32.mrf.mxu3 }
 0x8f6   :  { %v3023_v47 = vadd.f32 %v3022_v2, %v2833_v36  ;;  %v7239_v36 = vld [vmem:[#allocation64_spill] sm:$0xff] }
 0x8f8   :  { %3064 = vmatmul.bf16.gmra.mxu2 %v7225_v50  ;;  %5190 = vmatmul.msk.f32.gmra.mxu0 %vm1124_vm1, %v3023_v47  ;;  %v7240_v47 = vld [vmem:[#allocation63_spill] sm:$0xff] }
 0x8fa   :  { %2875 = vmatmul.bf16.gmra.mxu3 %v7226_v0 }
 0x8fb   :  { %v3025_v38 = vpop.f32.mrf.mxu2 }
 0x8fd   :  { %v2836_v13 = vpop.f32.mrf.mxu3 }
 0x8fe   :  { %v3026_v29 = vadd.f32 %v3025_v38, %v2836_v13 }
 0x900   :  { %5191 = vmatmul.msk.f32.gmra.mxu0 %vm1124_vm1, %v3026_v29 }
 0x903   :  { %v3027_v32 = vpop.f32.mrf.mxu2 }
 0x905   :  { %v2838_v48 = vpop.f32.mrf.mxu3 }
 0x906   :  { %v3028_v8 = vadd.f32 %v3027_v32, %v2838_v48 }
 0x908   :  { %3069 = vmatmul.bf16.gmra.mxu2 %v7227_v23  ;;  %5192 = vmatmul.msk.f32.gmra.mxu0 %vm1124_vm1, %v3028_v8  ;;  %v7241_v8 = vld [vmem:[#allocation66_spill] sm:$0xff]  ;;  %v7242_v23 = vld [vmem:[#allocation65_spill] sm:$0xff] }
 0x90a   :  { %2880 = vmatmul.bf16.gmra.mxu3 %v7228_v58 }
 0x90b   :  { %v3030_v12 = vpop.f32.mrf.mxu2 }
 0x90d   :  { %v2841_v31 = vpop.f32.mrf.mxu3 }
 0x90e   :  { %v3031_v53 = vadd.f32 %v3030_v12, %v2841_v31 }
 0x910   :  { %5193 = vmatmul.msk.f32.gmra.mxu0 %vm1124_vm1, %v3031_v53 }
 0x913   :  { %v3032_v57 = vpop.f32.mrf.mxu2 }
 0x915   :  { %v2843_v5 = vpop.f32.mrf.mxu3 }
 0x916   :  { %v3033_v41 = vadd.f32 %v3032_v57, %v2843_v5 }
 0x918   :  { %3074 = vmatmul.bf16.gmra.mxu2 %v7229_v7  ;;  %5194 = vmatmul.msk.f32.gmra.mxu0 %vm1124_vm1, %v3033_v41 }
 0x91a   :  { %2885 = vmatmul.bf16.gmra.mxu3 %v7230_v25  ;;  %v7243_v25 = vld [vmem:[#allocation68_spill] sm:$0xff] }
 0x91b   :  { %v3035_v55 = vpop.f32.mrf.mxu2 }
 0x91d   :  { %v2846_v43 = vpop.f32.mrf.mxu3  ;;  %v6720_v13 = vpop.f32.mrf.mxu0 }
 0x91e   :  { %v3036_v26 = vadd.f32 %v3035_v55, %v2846_v43  ;;  %v7244_v55 = vld [vmem:[#allocation67_spill] sm:$0xff] }
 0x920   :  { %5196 = vmatmul.msk.f32.vlgmr.msra.gmra.mxu1 %vm1124_vm1, %v3036_v26 }
 0x921   :  { %5231 = vmatpush.msk.msra.mxu1 %vm1149_vm0, %v5586_v46 }
 0x923   :  { %v3037_v61 = vpop.f32.mrf.mxu2 }
 0x925   :  { %v2848_v44 = vpop.f32.mrf.mxu3  ;;  %v6725_v12 = vpop.f32.mrf.mxu0 }
 0x926   :  { %v3038_v19 = vadd.f32 %v3037_v61, %v2848_v44 }
 0x928   :  { %3079 = vmatmul.bf16.gmra.mxu2 %v7231_v16  ;;  %5197 = vmatmul.msk.f32.gmra.mxu1 %vm1124_vm1, %v3038_v19  ;;  %v6736_v19 = vpop.f32.mrf.mxu1 }
 0x92a   :  { %2890 = vmatmul.bf16.gmra.mxu3 %v7232_v39 }
 0x92b   :  { %v3040_v10 = vpop.f32.mrf.mxu2 }
 0x92d   :  { %v2851_v9 = vpop.f32.mrf.mxu3  ;;  %v6728_v41 = vpop.f32.mrf.mxu0 }
 0x92e   :  { %v3041_v54 = vadd.f32 %v3040_v10, %v2851_v9  ;;  %v7245_v10 = vld [vmem:[#allocation70_spill] sm:$0xff] }
 0x930   :  { %5198 = vmatmul.msk.f32.gmra.mxu1 %vm1124_vm1, %v3041_v54  ;;  %v7246_v54 = vld [vmem:[#allocation69_spill] sm:$0xff] }
 0x933   :  { %v3042_v18 = vpop.f32.mrf.mxu2 }
 0x935   :  { %v2853_v17 = vpop.f32.mrf.mxu3  ;;  %v6733_v61 = vpop.f32.mrf.mxu0 }
 0x936   :  { %v3043_v22 = vadd.f32 %v3042_v18, %v2853_v17 }
 0x938   :  { %3084 = vmatmul.bf16.gmra.mxu2 %v7233_v6  ;;  %5199 = vmatmul.msk.f32.gmra.mxu1 %vm1124_vm1, %v3043_v22  ;;  %v6743_v6 = vpop.f32.mrf.mxu1 }
 0x93a   :  { %2895 = vmatmul.bf16.gmra.mxu3 %v7234_v21 }
 0x93b   :  { %v3045_v11 = vpop.f32.mrf.mxu2 }
 0x93d   :  { %v2856_v28 = vpop.f32.mrf.mxu3  ;;  %v6740_v9 = vpop.f32.mrf.mxu0 }
 0x93e   :  { %v3046_v27 = vadd.f32 %v3045_v11, %v2856_v28 }
 0x940   :  { %5200 = vmatmul.msk.f32.gmra.mxu1 %vm1124_vm1, %v3046_v27 }
 0x943   :  { %v3047_v34 = vpop.f32.mrf.mxu2 }
 0x945   :  { %v2858_v33 = vpop.f32.mrf.mxu3  ;;  %v6746_v11 = vpop.f32.mrf.mxu0 }
 0x946   :  { %v3048_v3 = vadd.f32 %v3047_v34, %v2858_v33  ;;  %v7247_v34 = vld [vmem:[#allocation72_spill] sm:$0xff]  ;;  %v6750_v33 = vpop.f32.mrf.mxu1 }
 0x948   :  { %3089 = vmatmul.bf16.gmra.mxu2 %v7235_v45  ;;  %5201 = vmatmul.msk.f32.gmra.mxu1 %vm1124_vm1, %v3048_v3  ;;  %v7248_v3 = vld [vmem:[#allocation71_spill] sm:$0xff] }
 0x94a   :  { %2900 = vmatmul.bf16.gmra.mxu3 %v7236_v14 }
 0x94b   :  { %v3050_v62 = vpop.f32.mrf.mxu2 }
 0x94d   :  { %v2861_v40 = vpop.f32.mrf.mxu3 }
 0x94e   :  { %v3051_v35 = vadd.f32 %v3050_v62, %v2861_v40  ;;  %v6753_v62 = vpop.f32.mrf.mxu0 }
 0x950   :  { %5202 = vmatmul.msk.f32.gmra.mxu1 %vm1124_vm1, %v3051_v35  ;;  %v6756_v35 = vpop.f32.mrf.mxu1 }
 0x953   :  { %v3052_v56 = vpop.f32.mrf.mxu2 }
 0x955   :  { %v2863_v1 = vpop.f32.mrf.mxu3 }
 0x956   :  { %v3053_v59 = vadd.f32 %v3052_v56, %v2863_v1 }
 0x958   :  { %3094 = vmatmul.bf16.gmra.mxu2 %v7237_v60  ;;  %5203 = vmatmul.msk.f32.gmra.mxu1 %vm1124_vm1, %v3053_v59  ;;  %v6758_v60 = vpop.f32.mrf.mxu0 }
 0x95a   :  { %2905 = vmatmul.bf16.gmra.mxu3 %v7238_v15  ;;  %v7249_v15 = vld [vmem:[#allocation74_spill] sm:$0xff] }
 0x95b   :  { %v3055_v49 = vpop.f32.mrf.mxu2 }
 0x95d   :  { %v2866_v52 = vpop.f32.mrf.mxu3 }
 0x95e   :  { %v3056_v24 = vadd.f32 %v3055_v49, %v2866_v52  ;;  %v7250_v49 = vld [vmem:[#allocation73_spill] sm:$0xff] }
 0x960   :  { %5205 = vmatmul.msk.f32.vlgmr.msra.gmra.mxu0 %vm1124_vm1, %v3056_v24  ;;  %v6763_v24 = vpop.f32.mrf.mxu1 }
 0x961   :  { %5240 = vmatpush.msk.msra.mxu0 %vm1149_vm0, %v5587_v4 }
 0x963   :  { %v3057_v37 = vpop.f32.mrf.mxu2 }
 0x965   :  { %v2868_v42 = vpop.f32.mrf.mxu3 }
 0x966   :  { %v3058_v2 = vadd.f32 %v3057_v37, %v2868_v42  ;;  %v6766_v42 = vpop.f32.mrf.mxu0 }
 0x968   :  { %3099 = vmatmul.bf16.gmra.mxu2 %v7239_v36  ;;  %5206 = vmatmul.msk.f32.gmra.mxu0 %vm1124_vm1, %v3058_v2 }
 0x96a   :  { %2910 = vmatmul.bf16.gmra.mxu3 %v7240_v47 }
 0x96b   :  { %v3060_v50 = vpop.f32.mrf.mxu2 }
 0x96d   :  { %v2871_v0 = vpop.f32.mrf.mxu3 }
 0x96e   :  { %v3061_v38 = vadd.f32 %v3060_v50, %v2871_v0  ;;  %v6768_v50 = vpop.f32.mrf.mxu1  ;;  %v7251_v0 = vld [vmem:[#allocation76_spill] sm:$0xff] }
 0x970   :  { %5207 = vmatmul.msk.f32.gmra.mxu0 %vm1124_vm1, %v3061_v38  ;;  %v7252_v38 = vld [vmem:[#allocation75_spill] sm:$0xff] }
 0x973   :  { %v3062_v29 = vpop.f32.mrf.mxu2 }
 0x975   :  { %v2873_v32 = vpop.f32.mrf.mxu3 }
 0x976   :  { %v3063_v48 = vadd.f32 %v3062_v29, %v2873_v32  ;;  %v6773_v32 = vpop.f32.mrf.mxu0 }
 0x978   :  { %3104 = vmatmul.bf16.gmra.mxu2 %v7241_v8  ;;  %5208 = vmatmul.msk.f32.gmra.mxu0 %vm1124_vm1, %v3063_v48 }
 0x97a   :  { %2915 = vmatmul.bf16.gmra.mxu3 %v7242_v23 }
 0x97b   :  { %v3065_v58 = vpop.f32.mrf.mxu2 }
 0x97d   :  { %v2876_v31 = vpop.f32.mrf.mxu3 }
 0x97e   :  { %v3066_v53 = vadd.f32 %v3065_v58, %v2876_v31 }
 0x980   :  { %5209 = vmatmul.msk.f32.gmra.mxu0 %vm1124_vm1, %v3066_v53  ;;  %v6778_v53 = vpop.f32.mrf.mxu0 }
 0x983   :  { %v3067_v57 = vpop.f32.mrf.mxu2 }
 0x985   :  { %v2878_v5 = vpop.f32.mrf.mxu3 }
 0x986   :  { %v3068_v7 = vadd.f32 %v3067_v57, %v2878_v5  ;;  %v7253_v5 = vld [vmem:[#allocation78_spill] sm:$0xff] }
 0x988   :  { %3109 = vmatmul.bf16.gmra.mxu2 %v7243_v25  ;;  %5210 = vmatmul.msk.f32.gmra.mxu0 %vm1124_vm1, %v3068_v7  ;;  %v7254_v25 = vld [vmem:[#allocation77_spill] sm:$0xff] }
 0x98a   :  { %2920 = vmatmul.bf16.gmra.mxu3 %v7244_v55 }
 0x98b   :  { %v3070_v43 = vpop.f32.mrf.mxu2 }
 0x98d   :  { %v2881_v26 = vpop.f32.mrf.mxu3 }
 0x98e   :  { %v3071_v46 = vadd.f32 %v3070_v43, %v2881_v26 }
 0x990   :  { %5211 = vmatmul.msk.f32.gmra.mxu0 %vm1124_vm1, %v3071_v46  ;;  %v6785_v46 = vpop.f32.mrf.mxu0 }
 0x993   :  { %v3072_v44 = vpop.f32.mrf.mxu2 }
 0x995   :  { %v2883_v16 = vpop.f32.mrf.mxu3 }
 0x996   :  { %v3073_v39 = vadd.f32 %v3072_v44, %v2883_v16  ;;  %v5588_v44 = vld [vmem:[#allocation11 + $0x18] sm:$0xff] }
 0x998   :  { %3114 = vmatmul.bf16.gmra.mxu2 %v7245_v10  ;;  %5212 = vmatmul.msk.f32.gmra.mxu0 %vm1124_vm1, %v3073_v39  ;;  %v5589_v10 = vld [vmem:[#allocation11 + $0x10] sm:$0xff] }
 0x99a   :  { %2925 = vmatmul.bf16.gmra.mxu3 %v7246_v54 }
 0x99b   :  { %v3075_v18 = vpop.f32.mrf.mxu2 }
 0x99d   :  { %v2886_v17 = vpop.f32.mrf.mxu3  ;;  %v6775_v23 = vpop.f32.mrf.mxu1 }
 0x99e   :  { %v3076_v22 = vadd.f32 %v3075_v18, %v2886_v17  ;;  %v7255_v17 = vld [vmem:[#allocation80_spill] sm:$0xff] }
 0x9a0   :  { %5214 = vmatmul.msk.f32.vlgmr.msrb.gmra.mxu1 %vm1124_vm1, %v3076_v22  ;;  %v6792_v22 = vpop.f32.mrf.mxu0 }
 0x9a3   :  { %v3077_v21 = vpop.f32.mrf.mxu2 }
 0x9a5   :  { %v2888_v28 = vpop.f32.mrf.mxu3  ;;  %v6782_v7 = vpop.f32.mrf.mxu1 }
 0x9a6   :  { %v3078_v27 = vadd.f32 %v3077_v21, %v2888_v28  ;;  %v7256_v21 = vld [vmem:[#allocation79_spill] sm:$0xff] }
 0x9a8   :  { %3119 = vmatmul.bf16.gmra.mxu2 %v7247_v34  ;;  %5215 = vmatmul.msk.f32.gmra.mxu1 %vm1124_vm1, %v3078_v27 }
 0x9aa   :  { %2930 = vmatmul.bf16.gmra.mxu3 %v7248_v3 }
 0x9ab   :  { %v3080_v45 = vpop.f32.mrf.mxu2 }
 0x9ad   :  { %v2891_v14 = vpop.f32.mrf.mxu3  ;;  %v6788_v16 = vpop.f32.mrf.mxu1 }
 0x9ae   :  { %v3081_v40 = vadd.f32 %v3080_v45, %v2891_v14  ;;  %v6798_v14 = vpop.f32.mrf.mxu0 }
 0x9b0   :  { %5216 = vmatmul.msk.f32.gmra.mxu1 %vm1124_vm1, %v3081_v40 }
 0x9b3   :  { %v3082_v56 = vpop.f32.mrf.mxu2 }
 0x9b5   :  { %v2893_v1 = vpop.f32.mrf.mxu3  ;;  %v6795_v27 = vpop.f32.mrf.mxu1 }
 0x9b6   :  { %v3083_v59 = vadd.f32 %v3082_v56, %v2893_v1 }
 0x9b8   :  { %3124 = vmatmul.bf16.gmra.mxu2 %v7249_v15  ;;  %5217 = vmatmul.msk.f32.gmra.mxu1 %vm1124_vm1, %v3083_v59  ;;  %v7257_v59 = vld [vmem:[#allocation82_spill] sm:$0xff]  ;;  %v7258_v15 = vld [vmem:[#allocation81_spill] sm:$0xff] }
 0x9ba   :  { %2935 = vmatmul.bf16.gmra.mxu3 %v7250_v49 }
 0x9bb   :  { %v3085_v52 = vpop.f32.mrf.mxu2 }
 0x9bd   :  { %v2896_v4 = vpop.f32.mrf.mxu3  ;;  %v6800_v1 = vpop.f32.mrf.mxu1 }
 0x9be   :  { %v3086_v37 = vadd.f32 %v3085_v52, %v2896_v4  ;;  %v6805_v4 = vpop.f32.mrf.mxu0 }
 0x9c0   :  { %5218 = vmatmul.msk.f32.gmra.mxu1 %vm1124_vm1, %v3086_v37 }
 0x9c3   :  { %v3087_v2 = vpop.f32.mrf.mxu2 }
 0x9c5   :  { %v2898_v36 = vpop.f32.mrf.mxu3 }
 0x9c6   :  { %v3088_v47 = vadd.f32 %v3087_v2, %v2898_v36  ;;  %v6808_v2 = vpop.f32.mrf.mxu1 }
 0x9c8   :  { %3129 = vmatmul.bf16.gmra.mxu2 %v7251_v0  ;;  %5219 = vmatmul.msk.f32.gmra.mxu1 %vm1124_vm1, %v3088_v47 }
 0x9ca   :  { %2940 = vmatmul.bf16.gmra.mxu3 %v7252_v38  ;;  %v6810_v38 = vpop.f32.mrf.mxu0 }
 0x9cb   :  { %v3090_v29 = vpop.f32.mrf.mxu2 }
 0x9cd   :  { %v2901_v48 = vpop.f32.mrf.mxu3 }
 0x9ce   :  { %v3091_v8 = vadd.f32 %v3090_v29, %v2901_v48  ;;  %v7259_v29 = vld [vmem:[#allocation84_spill] sm:$0xff]  ;;  %v7260_v48 = vld [vmem:[#allocation83_spill] sm:$0xff] }
 0x9d0   :  { %5220 = vmatmul.msk.f32.gmra.mxu1 %vm1124_vm1, %v3091_v8  ;;  %v6815_v8 = vpop.f32.mrf.mxu1 }
 0x9d3   :  { %v3092_v58 = vpop.f32.mrf.mxu2 }
 0x9d5   :  { %v2903_v31 = vpop.f32.mrf.mxu3 }
 0x9d6   :  { %v3093_v57 = vadd.f32 %v3092_v58, %v2903_v31 }
 0x9d8   :  { %3134 = vmatmul.bf16.gmra.mxu2 %v7253_v5  ;;  %5221 = vmatmul.msk.f32.gmra.mxu1 %vm1124_vm1, %v3093_v57 }
 0x9da   :  { %2945 = vmatmul.bf16.gmra.mxu3 %v7254_v25 }
 0x9db   :  { %v3095_v55 = vpop.f32.mrf.mxu2 }
 0x9dd   :  { %v2906_v43 = vpop.f32.mrf.mxu3  ;;  %v3472_v5 = vpop.f32.mrf.mxu0 }
 0x9de   :  { %v3096_v26 = vadd.f32 %v3095_v55, %v2906_v43  ;;  %v6818_v55 = vpop.f32.mrf.mxu1 }
 0x9e0   :  { %5223 = vmatmul.msk.f32.vlgmr.msrb.gmra.mxu0 %vm1124_vm1, %v3096_v26  ;;  %v3262_v26 = vadd.f32 %v6736_v19, %v6720_v13 }
 0x9e1   :  { %3906 = vmatpush.msrb.mxu0 %v5588_v44 }
 0x9e3   :  { %v3097_v39 = vpop.f32.mrf.mxu2  ;;  %3907 = vmatpush.msrb.mxu0 %v5589_v10 }
 0x9e5   :  { %v2908_v54 = vpop.f32.mrf.mxu3 }
 0x9e6   :  { %v3098_v18 = vadd.f32 %v3097_v39, %v2908_v54  ;;  %v3350_v39 = vadd.f32 %v6766_v42, %v3262_v26  ;;  %v6825_v54 = vpop.f32.mrf.mxu0 }
 0x9e8   :  { %3139 = vmatmul.bf16.gmra.mxu2 %v7255_v17  ;;  %5224 = vmatmul.msk.f32.gmra.mxu0 %vm1124_vm1, %v3098_v18  ;;  %v3423_v10 = vadd.f32 %v6775_v23, %v3350_v39 }
 0x9ea   :  { %2950 = vmatmul.bf16.gmra.mxu3 %v7256_v21  ;;  %v3496_v17 = vadd.f32 %v3472_v5, %v3423_v10 }
 0x9eb   :  { %v3100_v28 = vpop.f32.mrf.mxu2 }
 0x9ed   :  { %v2911_v34 = vpop.f32.mrf.mxu3 }
 0x9ee   :  { %v3101_v3 = vadd.f32 %v3100_v28, %v2911_v34  ;;  %v3478_v19 = vpop.f32.mrf.mxu0 }
 0x9f0   :  { %5225 = vmatmul.msk.f32.gmra.mxu0 %vm1124_vm1, %v3101_v3 }
 0x9f3   :  { %v3102_v45 = vpop.f32.mrf.mxu2 }
 0x9f5   :  { %v2913_v40 = vpop.f32.mrf.mxu3 }
 0x9f6   :  { %v3103_v56 = vadd.f32 %v3102_v45, %v2913_v40 }
 0x9f8   :  { %3144 = vmatmul.bf16.gmra.mxu2 %v7257_v59  ;;  %5226 = vmatmul.msk.f32.gmra.mxu0 %vm1124_vm1, %v3103_v56 }
 0x9fa   :  { %2955 = vmatmul.bf16.gmra.mxu3 %v7258_v15 }
 0x9fb   :  { %v3105_v49 = vpop.f32.mrf.mxu2 }
 0x9fd   :  { %v2916_v52 = vpop.f32.mrf.mxu3 }
 0x9fe   :  { %v3106_v37 = vadd.f32 %v3105_v49, %v2916_v52 }
 0xa00   :  { %5227 = vmatmul.msk.f32.gmra.mxu0 %vm1124_vm1, %v3106_v37 }
 0xa03   :  { %v3107_v36 = vpop.f32.mrf.mxu2 }
 0xa05   :  { %v2918_v47 = vpop.f32.mrf.mxu3 }
 0xa06   :  { %v3108_v0 = vadd.f32 %v3107_v36, %v2918_v47  ;;  %v6843_v36 = vpop.f32.mrf.mxu0 }
 0xa08   :  { %3149 = vmatmul.bf16.gmra.mxu2 %v7259_v29  ;;  %5228 = vmatmul.msk.f32.gmra.mxu0 %vm1124_vm1, %v3108_v0 }
 0xa0a   :  { %2960 = vmatmul.bf16.gmra.mxu3 %v7260_v48 }
 0xa0b   :  { %v3110_v58 = vpop.f32.mrf.mxu2 }
 0xa0d   :  { %v2921_v31 = vpop.f32.mrf.mxu3 }
 0xa0e   :  { %v3111_v57 = vadd.f32 %v3110_v58, %v2921_v31  ;;  %v3484_v29 = vpop.f32.mrf.mxu0 }
 0xa10   :  { %5229 = vmatmul.msk.f32.gmra.mxu0 %vm1124_vm1, %v3111_v57 }
 0xa13   :  { %v3112_v25 = vpop.f32.mrf.mxu2 }
 0xa15   :  { %v2923_v43 = vpop.f32.mrf.mxu3 }
 0xa16   :  { %v3113_v44 = vadd.f32 %v3112_v25, %v2923_v43  ;;  %v6857_v39 = vpop.f32.mrf.mxu0 }
 0xa18   :  { %5230 = vmatmul.msk.f32.gmra.mxu0 %vm1124_vm1, %v3113_v44 }
 0xa1a   :  { %5184 = vmatmul.msk.f32.vlgmr.msrb.gmra.mxu3 %vm1124_vm1, %v6657_v30  ;;  %v3268_v30 = vadd.f32 %v6750_v33, %v6728_v41 }
 0xa1b   :  { %v3115_v18 = vpop.f32.mrf.mxu2 }
 0xa1c   :  { %v3352_v40 = vadd.f32 %v6778_v53, %v3268_v30  ;;  %v3274_v53 = vadd.f32 %v6763_v24, %v6740_v9 }
 0xa1d   :  { %v2926_v21 = vpop.f32.mrf.mxu3  ;;  %v3545_v28 = vpop.f32.mrf.mxu1 }
 0xa1e   :  { %v3116_v34 = vadd.f32 %v3115_v18, %v2926_v21  ;;  %v6829_v3 = vadd.f32 %v3545_v28, %v3496_v17  ;;  %v3425_v56 = vadd.f32 %v6788_v16, %v3352_v40  ;;  %v3354_v16 = vadd.f32 %v6792_v22, %v3274_v53  ;;  %v3490_v21 = vpop.f32.mrf.mxu0 }
 0xa20   :  { %5232 = vmatmul.msk.f32.vlgmr.msra.gmra.mxu1 %vm1124_vm1, %v3116_v34  ;;  %v3498_v15 = vadd.f32 %v3478_v19, %v3425_v56  ;;  %v3427_v48 = vadd.f32 %v6800_v1, %v3354_v16  ;;  %v5590_v19 = vld [vmem:[#allocation11 + $0x8] sm:$0xff] }
 0xa22   :  { %5185 = vmatmul.msk.f32.gmra.mxu3 %vm1124_vm1, %v6659_v20  ;;  %v3500_v31 = vadd.f32 %v3484_v29, %v3427_v48 }
 0xa23   :  { %v3117_v13 = vpop.f32.mrf.mxu2 }
 0xa25   :  { %v2928_v42 = vpop.f32.mrf.mxu3  ;;  %v6834_v23 = vpop.f32.mrf.mxu1 }
 0xa26   :  { %v3118_v45 = vadd.f32 %v3117_v13, %v2928_v42  ;;  %v6862_v42 = vpop.f32.mrf.mxu0 }
 0xa28   :  { %5233 = vmatmul.msk.f32.gmra.mxu1 %vm1124_vm1, %v3118_v45  ;;  %v5591_v45 = vld [vmem:[#allocation11] sm:$0xff] }
 0xa2b   :  { %v3120_v59 = vpop.f32.mrf.mxu2 }
 0xa2d   :  { %v2931_v49 = vpop.f32.mrf.mxu3  ;;  %v3551_v52 = vpop.f32.mrf.mxu1 }
 0xa2e   :  { %v3121_v20 = vadd.f32 %v3120_v59, %v2931_v49  ;;  %v6841_v37 = vadd.f32 %v3551_v52, %v3498_v15 }
 0xa30   :  { %5234 = vmatmul.msk.f32.gmra.mxu1 %vm1124_vm1, %v3121_v20 }
 0xa33   :  { %v3122_v47 = vpop.f32.mrf.mxu2 }
 0xa35   :  { %v2933_v41 = vpop.f32.mrf.mxu3  ;;  %v6846_v33 = vpop.f32.mrf.mxu1 }
 0xa36   :  { %v3123_v0 = vadd.f32 %v3122_v47, %v2933_v41 }
 0xa38   :  { %5235 = vmatmul.msk.f32.gmra.mxu1 %vm1124_vm1, %v3123_v0 }
 0xa3b   :  { %v3125_v58 = vpop.f32.mrf.mxu2 }
 0xa3d   :  { %v2936_v57 = vpop.f32.mrf.mxu3  ;;  %v3557_v5 = vpop.f32.mrf.mxu1 }
 0xa3e   :  { %v3126_v25 = vadd.f32 %v3125_v58, %v2936_v57  ;;  %v6853_v43 = vadd.f32 %v3557_v5, %v3500_v31 }
 0xa40   :  { %5236 = vmatmul.msk.f32.gmra.mxu1 %vm1124_vm1, %v3126_v25 }
 0xa43   :  { %v3127_v26 = vpop.f32.mrf.mxu2 }
 0xa45   :  { %v2938_v44 = vpop.f32.mrf.mxu3  ;;  %v3560_v58 = vpop.f32.mrf.mxu1 }
 0xa46   :  { %v3128_v9 = vadd.f32 %v3127_v26, %v2938_v44 }
 0xa48   :  { %5237 = vmatmul.msk.f32.gmra.mxu1 %vm1124_vm1, %v3128_v9 }
 0xa4b   :  { %v3130_v24 = vpop.f32.mrf.mxu2 }
 0xa4d   :  { %v2941_v22 = vpop.f32.mrf.mxu3  ;;  %v3563_v26 = vpop.f32.mrf.mxu1 }
 0xa4e   :  { %v3131_v10 = vadd.f32 %v3130_v24, %v2941_v22 }
 0xa50   :  { %5238 = vmatmul.msk.f32.gmra.mxu1 %vm1124_vm1, %v3131_v10 }
 0xa53   :  { %v3132_v1 = vpop.f32.mrf.mxu2 }
 0xa55   :  { %v2943_v18 = vpop.f32.mrf.mxu3  ;;  %v3566_v10 = vpop.f32.mrf.mxu1 }
 0xa56   :  { %v3133_v17 = vadd.f32 %v3132_v1, %v2943_v18 }
 0xa58   :  { %5239 = vmatmul.msk.f32.gmra.mxu1 %vm1124_vm1, %v3133_v17 }
 0xa5b   :  { %v3135_v28 = vpop.f32.mrf.mxu2 }
 0xa5d   :  { %v2946_v34 = vpop.f32.mrf.mxu3  ;;  %v3618_v59 = vpop.f32.mrf.mxu0 }
 0xa5e   :  { %v3136_v13 = vadd.f32 %v3135_v28, %v2946_v34  ;;  %v3642_v28 = vadd.f32 %v3618_v59, %v6829_v3 }
 0xa60   :  { %5241 = vmatmul.msk.f32.vlgmr.msra.gmra.mxu0 %vm1124_vm1, %v3136_v13 }
 0xa61   :  { %3935 = vmatpush.msra.mxu0 %v5590_v19 }
 0xa63   :  { %v3137_v30 = vpop.f32.mrf.mxu2  ;;  %3936 = vmatpush.msra.mxu0 %v5591_v45 }
 0xa65   :  { %v2948_v40 = vpop.f32.mrf.mxu3  ;;  %v6866_v47 = vpop.f32.mrf.mxu0 }
 0xa66   :  { %v3138_v56 = vadd.f32 %v3137_v30, %v2948_v40 }
 0xa68   :  { %5242 = vmatmul.msk.f32.gmra.mxu0 %vm1124_vm1, %v3138_v56 }
 0xa6b   :  { %v3140_v15 = vpop.f32.mrf.mxu2 }
 0xa6d   :  { %v2951_v49 = vpop.f32.mrf.mxu3  ;;  %v6869_v29 = vpop.f32.mrf.mxu0 }
 0xa6e   :  { %v3141_v52 = vadd.f32 %v3140_v15, %v2951_v49 }
 0xa70   :  { %5243 = vmatmul.msk.f32.gmra.mxu0 %vm1124_vm1, %v3141_v52 }
 0xa73   :  { %v3142_v20 = vpop.f32.mrf.mxu2 }
 0xa75   :  { %v2953_v41 = vpop.f32.mrf.mxu3  ;;  %v6872_v25 = vpop.f32.mrf.mxu0 }
 0xa76   :  { %v3143_v53 = vadd.f32 %v3142_v20, %v2953_v41 }
 0xa78   :  { %5244 = vmatmul.msk.f32.gmra.mxu0 %vm1124_vm1, %v3143_v53 }
 0xa7b   :  { %v3145_v0 = vpop.f32.mrf.mxu2 }
 0xa7d   :  { %v2956_v16 = vpop.f32.mrf.mxu3  ;;  %v3630_v22 = vpop.f32.mrf.mxu0 }
 0xa7e   :  { %v3146_v48 = vadd.f32 %v3145_v0, %v2956_v16 }
 0xa80   :  { %5245 = vmatmul.msk.f32.gmra.mxu0 %vm1124_vm1, %v3146_v48 }
 0xa83   :  { %v3147_v31 = vpop.f32.mrf.mxu2 }
 0xa85   :  { %v2958_v57 = vpop.f32.mrf.mxu3  ;;  %v3633_v34 = vpop.f32.mrf.mxu0 }
 0xa86   :  { %v3148_v5 = vadd.f32 %v3147_v31, %v2958_v57 }
 0xa88   :  { %5246 = vmatmul.msk.f32.gmra.mxu0 %vm1124_vm1, %v3148_v5 }
 0xa8b   :  { %v3150_v44 = vpop.f32.mrf.mxu2 }
 0xa8d   :  { %v2961_v9 = vpop.f32.mrf.mxu3  ;;  %v3636_v52 = vpop.f32.mrf.mxu0 }
 0xa8e   :  { %v3151_v24 = vadd.f32 %v3150_v44, %v2961_v9 }
 0xa90   :  { %5247 = vmatmul.msk.f32.gmra.mxu0 %vm1124_vm1, %v3151_v24 }
 0xa93   :  { %v3152_v1 = vpop.f32.mrf.mxu2 }
 0xa95   :  { %v2963_v18 = vpop.f32.mrf.mxu3  ;;  %v3639_v41 = vpop.f32.mrf.mxu0 }
 0xa96   :  { %v3153_v17 = vadd.f32 %v3152_v1, %v2963_v18 }
 0xa98   :  { %5248 = vmatmul.msk.f32.gmra.mxu0 %vm1124_vm1, %v3153_v17  ;;  %v3271_v17 = vadd.f32 %v6756_v35, %v6733_v61 }
 0xa9d   :  { %v3279_v13 = vpop.f32.mrf.mxu3  ;;  %v3691_v19 = vpop.f32.mrf.mxu1 }
 0xa9e   :  { %v3280_v30 = vadd.f32 %v3279_v13, %v6753_v62  ;;  %v3715_v45 = vadd.f32 %v3691_v19, %v3642_v28  ;;  %v3353_v13 = vadd.f32 %v6785_v46, %v3271_v17 }
 0xaa0   :  { %v3356_v40 = vadd.f32 %v6805_v4, %v3280_v30 }
 0xaa2   :  { %v3429_v56 = vadd.f32 %v6815_v8, %v3356_v40 }
 0xaa4   :  { %v3502_v15 = vadd.f32 %v3490_v21, %v3429_v56 }
 0xaa5   :  { %v3694_v53 = vpop.f32.mrf.mxu1  ;;  %v3282_v5 = vpop.f32.mrf.mxu3 }
 0xaa6   :  { %v3575_v49 = vadd.f32 %v3563_v26, %v3502_v15  ;;  %v3283_v8 = vadd.f32 %v3282_v5, %v6758_v60  ;;  %v3277_v26 = vadd.f32 %v6768_v50, %v6746_v11  ;;  %v3265_v11 = vadd.f32 %v6743_v6, %v6725_v12 }
 0xaa7   :  { %v3426_v50 = vadd.f32 %v6795_v27, %v3353_v13 }
 0xaa8   :  { %v3648_v20 = vadd.f32 %v3636_v52, %v3575_v49  ;;  %v3357_v21 = vadd.f32 %v6810_v38, %v3283_v8  ;;  %v3355_v24 = vadd.f32 %v6798_v14, %v3277_v26 }
 0xaa9   :  { %v3499_v30 = vadd.f32 %v6843_v36, %v3426_v50  ;;  %v5593_v50 = vld [vmem:[#allocation11 + $0x68] sm:$0xff] }
 0xaaa   :  { %v3430_v1 = vadd.f32 %v6818_v55, %v3357_v21  ;;  %v3428_v28 = vadd.f32 %v6808_v2, %v3355_v24  ;;  %v3351_v55 = vadd.f32 %v6773_v32, %v3265_v11 }
 0xaac   :  { %v3501_v60 = vadd.f32 %v6857_v39, %v3428_v28  ;;  %v3503_v38 = vadd.f32 %v6862_v42, %v3430_v1  ;;  %v3424_v46 = vadd.f32 %v6782_v7, %v3351_v55  ;;  %v3572_v39 = vadd.f32 %v6846_v33, %v3499_v30  ;;  %v5596_v55 = vld [vmem:[#allocation11 + $0x88] sm:$0xff]  ;;  %v5598_v30 = vld [vmem:[#allocation6 + $0x8] sm:$0xff] }
 0xaad   :  { %v3697_v3 = vpop.f32.mrf.mxu1  ;;  %v3646_v42 = vadd.f32 %v3630_v22, %v6853_v43  ;;  %v5592_v43 = vld [vmem:[%s7070_s11] ss:$0 sm:$0xff] }
 0xaae   :  { %v3574_v14 = vadd.f32 %v3560_v58, %v3501_v60  ;;  %v3576_v2 = vadd.f32 %v3566_v10, %v3503_v38  ;;  %v3497_v12 = vadd.f32 %v6825_v54, %v3424_v46  ;;  %v3645_v27 = vadd.f32 %v6872_v25, %v3572_v39  ;;  %v5602_v46 = vld [vmem:[#allocation6 + $0x28] sm:$0xff]  ;;  %v5603_v39 = vld [vmem:[#allocation6 + $0x30] sm:$0xff] }
 0xaaf   :  { %v3644_v10 = vadd.f32 %v6869_v29, %v6841_v37 }
 0xab0   :  { %v3647_v61 = vadd.f32 %v3633_v34, %v3574_v14  ;;  %v3649_v58 = vadd.f32 %v3639_v41, %v3576_v2  ;;  %v3570_v36 = vadd.f32 %v6834_v23, %v3497_v12  ;;  %v5595_v14 = vld [vmem:[#allocation11 + $0x60] sm:$0xff]  ;;  %v5601_v2 = vld [vmem:[#allocation6 + $0x20] sm:$0xff] }
 0xab1   :  { %v3717_v25 = vadd.f32 %v3697_v3, %v3644_v10  ;;  %v5609_v10 = vld [vmem:[#allocation11 + $0x30] sm:$0xff] }
 0xab2   :  { %v3643_v54 = vadd.f32 %v6866_v47, %v3570_v36  ;;  %v5608_v36 = vld [vmem:[#allocation11 + $0x38] sm:$0xff] }
 0xab4   :  { %v3716_v41 = vadd.f32 %v3694_v53, %v3643_v54 }
 0xab5   :  { %v3700_v48 = vpop.f32.mrf.mxu1 }
 0xab6   :  { %v3718_v7 = vadd.f32 %v3700_v48, %v3645_v27  ;;  %v5606_v27 = vld [vmem:[#allocation11 + $0x28] sm:$0xff] }
 0xabd   :  { %v3703_v57 = vpop.f32.mrf.mxu1 }
 0xabe   :  { %v3719_v32 = vadd.f32 %v3703_v57, %v3646_v42  ;;  %v5604_v42 = vld [vmem:[#allocation6 + $0x38] sm:$0xff] }
 0xac5   :  { %v3706_v44 = vpop.f32.mrf.mxu1 }
 0xacd   :  { %v3709_v18 = vpop.f32.mrf.mxu1 }
 0xace   :  { %v3721_v35 = vadd.f32 %v3709_v18, %v3648_v20 }
 0xad5   :  { %v3712_v6 = vpop.f32.mrf.mxu1 }
 0xad6   :  { %v3722_v34 = vadd.f32 %v3712_v6, %v3649_v58 }
 0xadd   :  { %v3764_v0 = vpop.f32.mrf.mxu0 }
 0xade   :  { %v6881_v16 = vadd.f32 %v3764_v0, %v3715_v45  ;;  %v3720_v45 = vadd.f32 %v3706_v44, %v3647_v61  ;;  %v5599_v61 = vld [vmem:[#allocation6 + $0x10] sm:$0xff] }
 0xae5   :  { %v3767_v59 = vpop.f32.mrf.mxu0 }
 0xae6   :  { %v3789_v29 = vadd.f32 %v3767_v59, %v3716_v41  ;;  %v5615_v41 = vld [vmem:[#allocation11 + $0x70] sm:$0xff] }
 0xaed   :  { %v3770_v31 = vpop.f32.mrf.mxu0 }
 0xaee   :  { %v3790_v23 = vadd.f32 %v3770_v31, %v3717_v25  ;;  %v3796_v31 = vadd.f32 %v5592_v43, %v6881_v16  ;;  %v5594_v16 = vld [vmem:[#allocation6] sm:$0xff] }
 0xaef   :  { %v5613_v25 = vld [vmem:[#allocation11 + $0x50] sm:$0xff] }
 0xaf0   :  { %v3812_v17 = vmul.f32 0.2, %v3796_v31  ;;  %vm3804_vm6 = vcmp.ge.f32.partialorder %v3796_v31, 0.0 }
 0xaf2   :  { %v3820_v38 = vsel %vm3804_vm6, %v3796_v31, %v3812_v17 }
 0xaf5   :  { %v3773_v62 = vpop.f32.mrf.mxu0 }
 0xaf6   :  { %v3791_v49 = vadd.f32 %v3773_v62, %v3718_v7  ;;  %v3797_v62 = vadd.f32 %v5592_v43, %v3789_v29 }
 0xaf8   :  { %v3799_v48 = vadd.f32 %v5592_v43, %v3791_v49  ;;  %v3813_v1 = vmul.f32 0.2, %v3797_v62  ;;  %vm3805_vm5 = vcmp.ge.f32.partialorder %v3797_v62, 0.0 }
 0xafa   :  { %v3815_v26 = vmul.f32 0.2, %v3799_v48  ;;  %vm3807_vm3 = vcmp.ge.f32.partialorder %v3799_v48, 0.0  ;;  %v3821_v60 = vsel %vm3805_vm5, %v3797_v62, %v3813_v1  ;;  %vm4691_vm5 = vcmask 517120  }
 0xafb   :  { %v3828_v11 = vpack.c.bf16 %v3821_v60, %v3820_v38 }
 0xafc   :  { %v3823_v18 = vsel %vm3807_vm3, %v3799_v48, %v3815_v26 }
 0xafd   :  { %v3776_v4 = vpop.f32.mrf.mxu0 }
 0xafe   :  { %v3792_v33 = vadd.f32 %v3776_v4, %v3719_v32  ;;  %v3798_v4 = vadd.f32 %v5592_v43, %v3790_v23  ;;  %v5607_v32 = vld [vmem:[#allocation11 + $0x20] sm:$0xff] }
 0xb00   :  { %v3800_v0 = vadd.f32 %v5592_v43, %v3792_v33  ;;  %v3814_v59 = vmul.f32 0.2, %v3798_v4  ;;  %vm3806_vm4 = vcmp.ge.f32.partialorder %v3798_v4, 0.0  ;;  %v5610_v33 = vld [vmem:[#allocation11 + $0x48] sm:$0xff] }
 0xb02   :  { %v3816_v8 = vmul.f32 0.2, %v3800_v0  ;;  %vm3808_vm2 = vcmp.ge.f32.partialorder %v3800_v0, 0.0  ;;  %v3822_v28 = vsel %vm3806_vm4, %v3798_v4, %v3814_v59  ;;  %v5618_v4 = vld [vmem:[%s7068_s9 + $0x8] sm:$0xff]  ;;  %v4564_v59 = vld [vmem:[#allocation15 + $0x38] sm:$0xff] }
 0xb03   :  { %v3829_v13 = vpack.c.bf16 %v3823_v18, %v3822_v28  ;;  %4577 = vmatpush.msra.mxu2 %v4564_v59 }
 0xb05   :  { %v3779_v9 = vpop.f32.mrf.mxu0 }
 0xb06   :  { %v3793_v56 = vadd.f32 %v3779_v9, %v3720_v45  ;;  %v3824_v9 = vsel %vm3808_vm2, %v3800_v0, %v3816_v8  ;;  %v5619_v8 = vld [vmem:[%s7068_s9] sm:$0xff] }
 0xb08   :  { %v3801_v52 = vadd.f32 %v5592_v43, %v3793_v56 }
 0xb0a   :  { %v3817_v5 = vmul.f32 0.2, %v3801_v52  ;;  %vm3809_vm1 = vcmp.ge.f32.partialorder %v3801_v52, 0.0 }
 0xb0c   :  { %v3825_v53 = vsel %vm3809_vm1, %v3801_v52, %v3817_v5 }
 0xb0d   :  { %v3782_v19 = vpop.f32.mrf.mxu0  ;;  %v3830_v24 = vpack.c.bf16 %v3825_v53, %v3824_v9 }
 0xb0e   :  { %v3794_v40 = vadd.f32 %v3782_v19, %v3721_v35  ;;  %v5597_v19 = vld [vmem:[#allocation11 + $0x80] sm:$0xff]  ;;  %v5600_v35 = vld [vmem:[#allocation6 + $0x18] sm:$0xff] }
 0xb10   :  { %v3802_v22 = vadd.f32 %v5592_v43, %v3794_v40  ;;  %v5605_v40 = vld [vmem:[#allocation6 + $0x40] sm:$0xff] }
 0xb12   :  { %v3818_v57 = vmul.f32 0.2, %v3802_v22  ;;  %vm3810_vm15 = vcmp.ge.f32.partialorder %v3802_v22, 0.0 }
 0xb14   :  { %v3826_v47 = vsel %vm3810_vm15, %v3802_v22, %v3818_v57  ;;  %v5616_v57 = vld [vmem:[%s7068_s9 + $0x18] sm:$0xff]  ;;  %vm4597_vm15 = vcmask 261120  }
 0xb15   :  { %v3785_v15 = vpop.f32.mrf.mxu0 }
 0xb16   :  { %v3795_v20 = vadd.f32 %v3785_v15, %v3722_v34  ;;  %v5612_v15 = vld [vmem:[#allocation11 + $0x58] sm:$0xff] }
 0xb18   :  { %v3803_v37 = vadd.f32 %v5592_v43, %v3795_v20  ;;  %v5611_v43 = vld [vmem:[#allocation11 + $0x40] sm:$0xff]  ;;  %v5614_v20 = vld [vmem:[#allocation11 + $0x78] sm:$0xff] }
 0xb1a   :  { %vm3811_vm0 = vcmp.ge.f32.partialorder %v3803_v37, 0.0  ;;  %v3819_v44 = vmul.f32 0.2, %v3803_v37 }
 0xb1c   :  { %v3827_v21 = vsel %vm3811_vm0, %v3803_v37, %v3819_v44  ;;  %v5617_v37 = vld [vmem:[%s7068_s9 + $0x10] sm:$0xff]  ;;  %vm4599_vm0 = vcmask 785408  }
 0xb1d   :  { %v3831_v3 = vpack.c.bf16 %v3827_v21, %v3826_v47 }
 0xb1f   :  { %3836 = vmatpush.bf16.msrb.mxu1 %v3831_v3 }
 0xb23   :  { %3837 = vmatpush.bf16.msrb.mxu1 %v3830_v24 }
 0xb27   :  { %3838 = vmatpush.bf16.msrb.mxu1 %v3829_v13 }
 0xb2b   :  { %3839 = vmatpush.bf16.msrb.mxu1 %v3828_v11  ;;  %v4563_v11 = vld [vmem:[#allocation15 + $0x30] sm:$0xff] }
 0xb2c   :  { %4578 = vmatpush.msra.mxu2 %v4563_v11  ;;  %v5643_v11 = vld [vmem:[#allocation12 + $0x28] sm:$0xff] }
 0xb2e   :  { %5249 = vmatmul.msk.bf16.vlgmr.msrb.gmra.mxu1 %vm1894_vm10, %v5594_v16 }
 0xb2f   :  { %4088 = vmatpush.msra.mxu1 %v5593_v50 }
 0xb31   :  { %4089 = vmatpush.msra.mxu1 %v5595_v14 }
 0xb33   :  { %4150 = vmatpush.msrb.mxu1 %v5596_v55 }
 0xb35   :  { %4151 = vmatpush.msrb.mxu1 %v5597_v19 }
 0xb3e   :  { %5250 = vmatmul.msk.bf16.gmra.mxu1 %vm1894_vm10, %v5598_v30 }
 0xb4e   :  { %5251 = vmatmul.msk.bf16.gmra.mxu1 %vm1894_vm10, %v5599_v61 }
 0xb5e   :  { %5252 = vmatmul.msk.bf16.gmra.mxu1 %vm1894_vm10, %v5600_v35 }
 0xb6e   :  { %5253 = vmatmul.msk.bf16.gmra.mxu1 %vm1894_vm10, %v5601_v2 }
 0xb7e   :  { %5254 = vmatmul.msk.bf16.gmra.mxu1 %vm1894_vm10, %v5602_v46 }
 0xb8e   :  { %5255 = vmatmul.msk.bf16.gmra.mxu1 %vm1894_vm10, %v5603_v39 }
 0xb9e   :  { %5256 = vmatmul.msk.bf16.gmra.mxu1 %vm1894_vm10, %v5604_v42 }
 0xbab   :  { %v3841_v45 = vpop.f32.mrf.mxu1 }
 0xbae   :  { %5257 = vmatmul.msk.bf16.gmra.mxu1 %vm1894_vm10, %v5605_v40 }
 0xbb3   :  { %v3843_v12 = vpop.f32.mrf.mxu1 }
 0xbbb   :  { %v3846_v6 = vpop.f32.mrf.mxu1 }
 0xbbc   :  { %5258 = vmatmul.msk.f32.vlgmr.msrb.gmra.mxu0 %vm1994_vm11, %v3846_v6 }
 0xbbd   :  { %3964 = vmatpush.msrb.mxu0 %v5606_v27 }
 0xbbf   :  { %3965 = vmatpush.msrb.mxu0 %v5607_v32  ;;  %v5620_v32 = vld [vmem:[%s7070_s11 + $0x1] ss:$0 sm:$0xff] }
 0xbc3   :  { %v3848_v58 = vpop.f32.mrf.mxu1 }
 0xbc4   :  { %5259 = vmatmul.msk.f32.gmra.mxu0 %vm1994_vm11, %v3848_v58 }
 0xbcb   :  { %v3851_v56 = vpop.f32.mrf.mxu1 }
 0xbcc   :  { %5260 = vmatmul.msk.f32.vlgmr.msra.gmra.mxu0 %vm1994_vm11, %v3841_v45 }
 0xbcd   :  { %3995 = vmatpush.msra.mxu0 %v5608_v36 }
 0xbcf   :  { %3996 = vmatpush.msra.mxu0 %v5609_v10 }
 0xbd3   :  { %v3853_v7 = vpop.f32.mrf.mxu1 }
 0xbd4   :  { %5261 = vmatmul.msk.f32.gmra.mxu0 %vm1994_vm11, %v3843_v12 }
 0xbdb   :  { %v3856_v34 = vpop.f32.mrf.mxu1 }
 0xbdc   :  { %5262 = vmatmul.msk.f32.vlgmr.msrb.gmra.mxu0 %vm1994_vm11, %v3851_v56 }
 0xbdd   :  { %4026 = vmatpush.msrb.mxu0 %v5610_v33 }
 0xbdf   :  { %4027 = vmatpush.msrb.mxu0 %v5611_v43 }
 0xbe3   :  { %v3858_v22 = vpop.f32.mrf.mxu1 }
 0xbe4   :  { %5263 = vmatmul.msk.f32.gmra.mxu0 %vm1994_vm11, %v3853_v7 }
 0xbeb   :  { %v3861_v54 = vpop.f32.mrf.mxu1 }
 0xbec   :  { %5264 = vmatmul.msk.f32.vlgmr.msra.gmra.mxu0 %vm1994_vm11, %v3856_v34 }
 0xbed   :  { %4057 = vmatpush.msra.mxu0 %v5612_v15  ;;  %v5622_v15 = vld [vmem:[#allocation8] sm:$0xff] }
 0xbef   :  { %4058 = vmatpush.msra.mxu0 %v5613_v25  ;;  %v5623_v25 = vld [vmem:[#allocation12] sm:$0xff] }
 0xbf3   :  { %v3863_v49 = vpop.f32.mrf.mxu1 }
 0xbf4   :  { %5265 = vmatmul.msk.f32.gmra.mxu0 %vm1994_vm11, %v3858_v22 }
 0xbfb   :  { %v3866_v52 = vpop.f32.mrf.mxu1 }
 0xbfc   :  { %5266 = vmatmul.msk.f32.vlgmr.msrb.gmra.mxu0 %vm1994_vm11, %v3861_v54  ;;  %v5621_v54 = vld [vmem:[#allocation12 + $0x8] sm:$0xff] }
 0xbfd   :  { %4119 = vmatpush.msrb.mxu0 %v5614_v20  ;;  %v4562_v20 = vld [vmem:[#allocation15 + $0x28] sm:$0xff] }
 0xbfe   :  { %4579 = vmatpush.msra.mxu2 %v4562_v20 }
 0xbff   :  { %4120 = vmatpush.msrb.mxu0 %v5615_v41  ;;  %v5626_v41 = vld [vmem:[#allocation8 + $0x18] sm:$0xff] }
 0xc03   :  { %v3868_v23 = vpop.f32.mrf.mxu1 }
 0xc04   :  { %5267 = vmatmul.msk.f32.gmra.mxu0 %vm1994_vm11, %v3863_v49  ;;  %v5624_v49 = vld [vmem:[#allocation8 + $0x8] sm:$0xff] }
 0xc0b   :  { %v3871_v0 = vpop.f32.mrf.mxu1 }
 0xc0c   :  { %5268 = vmatmul.msk.f32.vlgmr.msra.gmra.mxu0 %vm1994_vm11, %v3866_v52  ;;  %5270 = vmatmul.msk.f32.vlgmr.msra.gmra.mxu1 %vm1994_vm11, %v3871_v0  ;;  %v5625_v52 = vld [vmem:[#allocation8 + $0x10] sm:$0xff] }
 0xc0d   :  { %4220 = vmatpush.msra.mxu1 %v5616_v57  ;;  %v4561_v0 = vld [vmem:[#allocation15 + $0x20] sm:$0xff] }
 0xc0e   :  { %4580 = vmatpush.msra.mxu2 %v4561_v0 }
 0xc0f   :  { %4221 = vmatpush.msra.mxu1 %v5617_v37  ;;  %v5627_v37 = vld [vmem:[%s7068_s9 + $0x28] sm:$0xff] }
 0xc13   :  { %v3873_v29 = vpop.f32.mrf.mxu1 }
 0xc14   :  { %5269 = vmatmul.msk.f32.gmra.mxu0 %vm1994_vm11, %v3868_v23  ;;  %5271 = vmatmul.msk.f32.gmra.mxu1 %vm1994_vm11, %v3873_v29  ;;  %v5628_v29 = vld [vmem:[%s7068_s9 + $0x20] sm:$0xff] }
 0xc1b   :  { %v3876_v48 = vpop.f32.mrf.mxu1 }
 0xc1c   :  { %5272 = vmatmul.msk.f32.vlgmr.msrb.gmra.mxu0 %vm1994_vm11, %v3876_v48 }
 0xc23   :  { %v3878_v5 = vpop.f32.mrf.mxu1 }
 0xc24   :  { %5273 = vmatmul.msk.f32.gmra.mxu0 %vm1994_vm11, %v3878_v5  ;;  %v5630_v5 = vld [vmem:[%s7068_s9 + $0x30] sm:$0xff] }
 0xc2b   :  { %v3881_v44 = vpop.f32.mrf.mxu1 }
 0xc2c   :  { %5274 = vmatmul.msk.f32.vlgmr.msrb.gmra.mxu1 %vm1994_vm11, %v3881_v44 }
 0xc2d   :  { %4243 = vmatpush.msrb.mxu1 %v5618_v4  ;;  %v5631_v4 = vld [vmem:[%s7068_s9 + $0x48] sm:$0xff] }
 0xc2f   :  { %4244 = vmatpush.msrb.mxu1 %v5619_v8  ;;  %v5632_v8 = vld [vmem:[%s7068_s9 + $0x40] sm:$0xff] }
 0xc33   :  { %v3883_v47 = vpop.f32.mrf.mxu1 }
 0xc34   :  { %5275 = vmatmul.msk.f32.gmra.mxu1 %vm1994_vm11, %v3883_v47 }
 0xc39   :  { %v3909_v21 = vpop.f32.mrf.mxu0 }
 0xc41   :  { %v3912_v3 = vpop.f32.mrf.mxu0 }
 0xc49   :  { %v3938_v62 = vpop.f32.mrf.mxu0 }
 0xc4a   :  { %v3939_v60 = vadd.f32 %v3938_v62, %v3909_v21  ;;  %v5633_v21 = vld [vmem:[%s7068_s9 + $0x58] sm:$0xff] }
 0xc51   :  { %v3941_v26 = vpop.f32.mrf.mxu0 }
 0xc52   :  { %v3942_v14 = vadd.f32 %v3941_v26, %v3912_v3  ;;  %v5634_v3 = vld [vmem:[%s7068_s9 + $0x50] sm:$0xff]  ;;  %v4560_v26 = vld [vmem:[#allocation15 + $0x18] sm:$0xff] }
 0xc53   :  { %4581 = vmatpush.msra.mxu2 %v4560_v26  ;;  %v4613_v26 = vld [vmem:[#allocation17 + $0x60] sm:$0xff] }
 0xc59   :  { %v3967_v53 = vpop.f32.mrf.mxu0 }
 0xc5a   :  { %v3973_v38 = vadd.f32 %v3967_v53, %v3939_v60  ;;  %v5635_v53 = vld [vmem:[%s7068_s9 + $0x68] sm:$0xff]  ;;  %v5642_v60 = vld [vmem:[#allocation12 + $0x10] sm:$0xff] }
 0xc61   :  { %v3970_v31 = vpop.f32.mrf.mxu0 }
 0xc62   :  { %v3974_v30 = vadd.f32 %v3970_v31, %v3942_v14  ;;  %v5636_v31 = vld [vmem:[%s7068_s9 + $0x60] sm:$0xff] }
 0xc69   :  { %v3998_v9 = vpop.f32.mrf.mxu0 }
 0xc6a   :  { %v4004_v50 = vadd.f32 %v3998_v9, %v3973_v38  ;;  %v5637_v9 = vld [vmem:[%s7068_s9 + $0x78] sm:$0xff] }
 0xc71   :  { %v4001_v24 = vpop.f32.mrf.mxu0 }
 0xc72   :  { %v4005_v35 = vadd.f32 %v4001_v24, %v3974_v30  ;;  %v5638_v24 = vld [vmem:[%s7068_s9 + $0x70] sm:$0xff] }
 0xc79   :  { %v4029_v1 = vpop.f32.mrf.mxu0 }
 0xc7a   :  { %v4035_v55 = vadd.f32 %v4029_v1, %v4004_v50  ;;  %v5644_v50 = vld [vmem:[#allocation12 + $0x20] sm:$0xff] }
 0xc81   :  { %v4032_v18 = vpop.f32.mrf.mxu0 }
 0xc82   :  { %v4036_v2 = vadd.f32 %v4032_v18, %v4005_v35  ;;  %v5639_v18 = vld [vmem:[%s7068_s9 + $0x88] sm:$0xff] }
 0xc89   :  { %v4060_v17 = vpop.f32.mrf.mxu0  ;;  %v4091_v28 = vpop.f32.mrf.mxu1 }
 0xc8a   :  { %v4066_v61 = vadd.f32 %v4060_v17, %v4035_v55  ;;  %v5640_v17 = vld [vmem:[%s7068_s9 + $0x80] sm:$0xff]  ;;  %v4559_v55 = vld [vmem:[#allocation15 + $0x10] sm:$0xff] }
 0xc8b   :  { %4582 = vmatpush.msra.mxu2 %v4559_v55  ;;  %v4603_v55 = vld [vmem:[#allocation17 + $0x10] sm:$0xff] }
 0xc8c   :  { %v4097_v46 = vadd.f32 %v4091_v28, %v4066_v61 }
 0xc91   :  { %v4063_v13 = vpop.f32.mrf.mxu0  ;;  %v4094_v16 = vpop.f32.mrf.mxu1 }
 0xc92   :  { %v4067_v42 = vadd.f32 %v4063_v13, %v4036_v2  ;;  %v5641_v13 = vld [vmem:[#allocation12 + $0x18] sm:$0xff]  ;;  %v4528_v2 = vld [vmem:[#allocation14 + $0x10] sm:$0xff] }
 0xc94   :  { %v4098_v6 = vadd.f32 %v4094_v16, %v4067_v42 }
 0xc99   :  { %v4122_v19 = vpop.f32.mrf.mxu0 }
 0xc9a   :  { %v4128_v45 = vadd.f32 %v4122_v19, %v4097_v46  ;;  %v4527_v46 = vld [vmem:[#allocation14 + $0x8] sm:$0xff] }
 0xca1   :  { %v4125_v12 = vpop.f32.mrf.mxu0 }
 0xca2   :  { %v4129_v27 = vadd.f32 %v4125_v12, %v4098_v6 }
 0xca9   :  { %v4153_v39 = vpop.f32.mrf.mxu1 }
 0xcaa   :  { %v4159_v40 = vadd.f32 %v4153_v39, %v4128_v45  ;;  %v4526_v39 = vld [vmem:[#allocation14] sm:$0xff] }
 0xcab   :  { %v4558_v45 = vld [vmem:[#allocation15 + $0x8] sm:$0xff] }
 0xcac   :  { %v4161_v58 = vadd.f32 %v5620_v32, %v4159_v40  ;;  %v4557_v40 = vld [vmem:[#allocation15] sm:$0xff]  ;;  %4583 = vmatpush.msra.mxu2 %v4558_v45 }
 0xcad   :  { %v5571_v45 = vld [vmem:[%s7070_s11 + $0x6] ss:$0 sm:$0xff] }
 0xcae   :  { %v4165_v10 = vmul.f32 0.2, %v4161_v58  ;;  %vm4163_vm7 = vcmp.ge.f32.partialorder %v4161_v58, 0.0  ;;  %4584 = vmatpush.msra.mxu2 %v4557_v40 }
 0xcb0   :  { %v4167_v33 = vsel %vm4163_vm7, %v4161_v58, %v4165_v10 }
 0xcb1   :  { %v4156_v56 = vpop.f32.mrf.mxu1 }
 0xcb2   :  { %v4160_v36 = vadd.f32 %v4156_v56, %v4129_v27 }
 0xcb4   :  { %v4162_v7 = vadd.f32 %v5620_v32, %v4160_v36 }
 0xcb6   :  { %vm4164_vm8 = vcmp.ge.f32.partialorder %v4162_v7, 0.0  ;;  %v4166_v34 = vmul.f32 0.2, %v4162_v7 }
 0xcb8   :  { %v4168_v43 = vsel %vm4164_vm8, %v4162_v7, %v4166_v34 }
 0xcb9   :  { %v4169_v22 = vpack.c.bf16 %v4168_v43, %v4167_v33  ;;  %v5645_v33 = vld [vmem:[%s7070_s11 + $0x2] ss:$0 sm:$0xff] }
 0xcbb   :  { %4177 = vmatpush.bf16.msra.mxu0 %v4169_v22 }
 0xcbe   :  { %5276 = vmatmul.msk.bf16.vlgmr.msra.gmra.mxu0 %vm1994_vm11, %v5622_v15 }
 0xcbf   :  { %4461 = vmatpush.msrb.mxu0 %v5621_v54 }
 0xcc1   :  { %4462 = vmatpush.msrb.mxu0 %v5623_v25 }
 0xcc3   :  { %4547 = vmatpush.msra.mxu0 %v4528_v2 }
 0xcc5   :  { %4548 = vmatpush.msra.mxu0 %v4527_v46 }
 0xcc7   :  { %4549 = vmatpush.msra.mxu0 %v4526_v39 }
 0xcce   :  { %5277 = vmatmul.msk.bf16.gmra.mxu0 %vm1994_vm11, %v5624_v49  ;;  %v4525_v49 = vld [vmem:[%s7060_s1] sm:$0x3] }
 0xcde   :  { %5278 = vmatmul.msk.bf16.gmra.mxu0 %vm1994_vm11, %v5625_v52 }
 0xcee   :  { %5279 = vmatmul.msk.bf16.gmra.mxu0 %vm1994_vm11, %v5626_v41 }
 0xcfe   :  { %5280 = vmatmul.msk.bf16.gmra.mxu0 %vm1994_vm11, %v6513_v51  ;;  %v5629_v51 = vld [vmem:[%s7068_s9 + $0x38] sm:$0xff] }
 0xd3b   :  { %v4179_v23 = vpop.f32.mrf.mxu0 }
 0xd43   :  { %v4181_v57 = vpop.f32.mrf.mxu0 }
 0xd44   :  { %5281 = vmatmul.msk.f32.vlgmr.msra.gmra.mxu1 %vm1994_vm11, %v4181_v57 }
 0xd45   :  { %4266 = vmatpush.msra.mxu1 %v5627_v37 }
 0xd47   :  { %4267 = vmatpush.msra.mxu1 %v5628_v29 }
 0xd4b   :  { %v4184_v48 = vpop.f32.mrf.mxu0 }
 0xd4c   :  { %5282 = vmatmul.msk.f32.vlgmr.msrb.gmra.mxu1 %vm1994_vm11, %v4179_v23  ;;  %v5568_v23 = vld [vmem:[%s7070_s11 + $0x4] ss:$0 sm:$0xff] }
 0xd4d   :  { %4290 = vmatpush.msrb.mxu1 %v5629_v51 }
 0xd4f   :  { %4291 = vmatpush.msrb.mxu1 %v5630_v5 }
 0xd53   :  { %v4186_v44 = vpop.f32.mrf.mxu0 }
 0xd54   :  { %5283 = vmatmul.msk.f32.vlgmr.msra.gmra.mxu1 %vm1994_vm11, %v4184_v48 }
 0xd55   :  { %4314 = vmatpush.msra.mxu1 %v5631_v4 }
 0xd57   :  { %4315 = vmatpush.msra.mxu1 %v5632_v8 }
 0xd5b   :  { %v4189_v47 = vpop.f32.mrf.mxu0 }
 0xd5c   :  { %5284 = vmatmul.msk.f32.vlgmr.msrb.gmra.mxu1 %vm1994_vm11, %v4186_v44 }
 0xd5d   :  { %4338 = vmatpush.msrb.mxu1 %v5633_v21  ;;  %v4616_v21 = vld [vmem:[#allocation17 + $0x78] sm:$0xff] }
 0xd5f   :  { %4339 = vmatpush.msrb.mxu1 %v5634_v3  ;;  %v4615_v3 = vld [vmem:[#allocation17 + $0x70] sm:$0xff] }
 0xd63   :  { %v4191_v62 = vpop.f32.mrf.mxu0 }
 0xd64   :  { %5285 = vmatmul.msk.f32.vlgmr.msra.gmra.mxu1 %vm1994_vm11, %v4189_v47 }
 0xd65   :  { %4362 = vmatpush.msra.mxu1 %v5635_v53  ;;  %v4612_v53 = vld [vmem:[#allocation17 + $0x58] sm:$0xff] }
 0xd67   :  { %4363 = vmatpush.msra.mxu1 %v5636_v31  ;;  %v4611_v31 = vld [vmem:[#allocation17 + $0x50] sm:$0xff] }
 0xd6b   :  { %v4194_v59 = vpop.f32.mrf.mxu0 }
 0xd6c   :  { %5286 = vmatmul.msk.f32.vlgmr.msrb.gmra.mxu1 %vm1994_vm11, %v4191_v62  ;;  %v4614_v62 = vld [vmem:[#allocation17 + $0x68] sm:$0xff] }
 0xd6d   :  { %4386 = vmatpush.msrb.mxu1 %v5637_v9  ;;  %v4609_v9 = vld [vmem:[#allocation17 + $0x40] sm:$0xff] }
 0xd6f   :  { %4387 = vmatpush.msrb.mxu1 %v5638_v24  ;;  %v4608_v24 = vld [vmem:[#allocation17 + $0x38] sm:$0xff] }
 0xd73   :  { %v4196_v1 = vpop.f32.mrf.mxu0 }
 0xd74   :  { %5287 = vmatmul.msk.f32.vlgmr.msra.gmra.mxu1 %vm1994_vm11, %v4194_v59  ;;  %v4610_v59 = vld [vmem:[#allocation17 + $0x48] sm:$0xff] }
 0xd75   :  { %4410 = vmatpush.msra.mxu1 %v5639_v18  ;;  %v4606_v18 = vld [vmem:[#allocation17 + $0x28] sm:$0xff] }
 0xd77   :  { %4411 = vmatpush.msra.mxu1 %v5640_v17  ;;  %v5570_v17 = vld [vmem:[%s7070_s11 + $0x3] ss:$0 sm:$0xff] }
 0xd7b   :  { %v4199_v28 = vpop.f32.mrf.mxu0 }
 0xd7c   :  { %5288 = vmatmul.msk.f32.vlgmr.msrb.gmra.mxu1 %vm1994_vm11, %v4196_v1  ;;  %v4607_v1 = vld [vmem:[#allocation17 + $0x30] sm:$0xff] }
 0xd7d   :  { %4439 = vmatpush.msrb.mxu1 %v5641_v13 }
 0xd7f   :  { %4440 = vmatpush.msrb.mxu1 %v5642_v60 }
 0xd83   :  { %v4201_v38 = vpop.f32.mrf.mxu0 }
 0xd84   :  { %5289 = vmatmul.msk.f32.vlgmr.msra.gmra.mxu1 %vm1994_vm11, %v4199_v28 }
 0xd85   :  { %4484 = vmatpush.msra.mxu1 %v5643_v11 }
 0xd87   :  { %4485 = vmatpush.msra.mxu1 %v5644_v50  ;;  %v195_v50 = vld [vmem:[%s7061_s2] sm:$0x3] }
 0xdc1   :  { %v4223_v16 = vpop.f32.mrf.mxu1 }
 0xdc9   :  { %v4246_v14 = vpop.f32.mrf.mxu1 }
 0xdca   :  { %v4247_v12 = vadd.f32 %v4246_v14, %v4223_v16  ;;  %v4605_v16 = vld [vmem:[#allocation17 + $0x20] sm:$0xff]  ;;  %v4604_v14 = vld [vmem:[#allocation17 + $0x18] sm:$0xff] }
 0xdd1   :  { %v4269_v19 = vpop.f32.mrf.mxu1 }
 0xdd2   :  { %v4272_v6 = vadd.f32 %v4269_v19, %v4247_v12  ;;  %v4602_v19 = vld [vmem:[#allocation17 + $0x8] sm:$0xff] }
 0xdd9   :  { %v4293_v30 = vpop.f32.mrf.mxu1 }
 0xdda   :  { %v4296_v27 = vadd.f32 %v4293_v30, %v4272_v6  ;;  %v4601_v30 = vld [vmem:[#allocation17] sm:$0xff] }
 0xde1   :  { %v4317_v61 = vpop.f32.mrf.mxu1 }
 0xde2   :  { %v4320_v58 = vadd.f32 %v4317_v61, %v4296_v27 }
 0xde9   :  { %v4341_v35 = vpop.f32.mrf.mxu1 }
 0xdea   :  { %v4344_v56 = vadd.f32 %v4341_v35, %v4320_v58 }
 0xdf1   :  { %v4365_v42 = vpop.f32.mrf.mxu1 }
 0xdf2   :  { %v4368_v36 = vadd.f32 %v4365_v42, %v4344_v56  ;;  %v198_v42 = vld [vmem:[%s7062_s3] sm:$0x3] }
 0xdf9   :  { %v4389_v32 = vpop.f32.mrf.mxu1 }
 0xdfa   :  { %v4392_v10 = vadd.f32 %v4389_v32, %v4368_v36 }
 0xe01   :  { %v4413_v7 = vpop.f32.mrf.mxu1 }
 0xe02   :  { %v4416_v34 = vadd.f32 %v4413_v7, %v4392_v10 }
 0xe04   :  { %v4417_v43 = vadd.f32 %v5645_v33, %v4416_v34 }
 0xe06   :  { %vm4418_vm9 = vcmp.ge.f32.partialorder %v4417_v43, 0.0  ;;  %v4419_v22 = vmul.f32 0.2, %v4417_v43 }
 0xe08   :  { %v4420_v54 = vsel %vm4418_vm9, %v4417_v43, %v4419_v22 }
 0xe09   :  { %v4422_v15 = vrot.slane %v4420_v54, 1  ;;  %v4491_v25 = vrot.slane %v4420_v54, 3  ;;  %5291 = vmatmul.msk.f32.vlgmr.msrb.gmra.mxu0 %vm1994_vm11, %v4420_v54  ;;  %v4467_v52 = vrot.slane %v4420_v54, 2 }
 0xe0b   :  { %5290 = vmatmul.msk.f32.vlgmr.msrb.gmra.mxu1 %vm1994_vm11, %v4422_v15  ;;  %5293 = vmatmul.msk.f32.vlgmr.msra.gmra.mxu3 %vm1994_vm11, %v4491_v25 }
 0xe0c   :  { %4618 = vmatpush.msrb.mxu1 %v4616_v21 }
 0xe0e   :  { %4619 = vmatpush.msrb.mxu1 %v4615_v3 }
 0xe10   :  { %4620 = vmatpush.msrb.mxu1 %v4614_v62 }
 0xe11   :  { %5294 = vmatmul.msk.f32.vlgmr.msra.gmra.mxu0 %vm4530_vm12, %v4525_v49 }
 0xe12   :  { %4621 = vmatpush.msrb.mxu1 %v4613_v26 }
 0xe13   :  { %5292 = vmatmul.msk.f32.vlgmr.msra.gmra.mxu1 %vm1994_vm11, %v4467_v52  ;;  %vm196_vm11 = vcmask 254976  }
 0xe14   :  { %4622 = vmatpush.msrb.mxu1 %v4612_v53  ;;  %197 = vst.msk [vmem:[#allocation2] sm:$0x3] %vm196_vm11, %v195_v50 }
 0xe15   :  { %199 = vst.msk [vmem:[#allocation3] sm:$0x3] %vm196_vm11, %v198_v42 }
 0xe16   :  { %4623 = vmatpush.msrb.mxu1 %v4611_v31 }
 0xe18   :  { %4624 = vmatpush.msrb.mxu1 %v4610_v59 }
 0xe1a   :  { %4625 = vmatpush.msrb.mxu1 %v4609_v9 }
 0xe1b   :  { %v200_v35 = vld [vmem:[#allocation2] sm:$0x3] }
 0xe1c   :  { %4626 = vmatpush.msrb.mxu1 %v4608_v24  ;;  %v201_v27 = vld [vmem:[#allocation3] sm:$0x3] }
 0xe1e   :  { %4627 = vmatpush.msrb.mxu1 %v4607_v1 }
 0xe20   :  { %4628 = vmatpush.msrb.mxu1 %v4606_v18 }
 0xe22   :  { %4629 = vmatpush.msrb.mxu1 %v4605_v16 }
 0xe24   :  { %4630 = vmatpush.msrb.mxu1 %v4604_v14 }
 0xe26   :  { %4631 = vmatpush.msrb.mxu1 %v4603_v55 }
 0xe28   :  { %4632 = vmatpush.msrb.mxu1 %v4602_v19 }
 0xe2a   :  { %4633 = vmatpush.msrb.mxu1 %v4601_v30 }
 0xe86   :  { %v4464_v20 = vpop.f32.mrf.mxu0 }
 0xe88   :  { %v4442_v41 = vpop.f32.mrf.mxu1 }
 0xe89   :  { %v4465_v57 = vadd.f32 %v4464_v20, %v4442_v41 }
 0xe8e   :  { %v4551_v0 = vpop.f32.mrf.mxu0  ;;  %v4511_v5 = vpop.f32.mrf.mxu3 }
 0xe8f   :  { %v4552_v37 = vadd.f32 %v5568_v23, %v4551_v0 }
 0xe90   :  { %v4487_v29 = vpop.f32.mrf.mxu1 }
 0xe91   :  { %vm4554_vm13 = vcmp.ge.f32.partialorder %v4552_v37, 0.0  ;;  %v4555_v48 = vmul.f32 0.2, %v4552_v37  ;;  %v4490_v51 = vadd.f32 %v4487_v29, %v4465_v57 }
 0xe93   :  { %v4556_v44 = vsel %vm4554_vm13, %v4552_v37, %v4555_v48  ;;  %v4514_v4 = vadd.f32 %v4511_v5, %v4490_v51 }
 0xe94   :  { %5295 = vmatmul.msk.f32.vlgmr.msra.gmra.mxu2 %vm1894_vm10, %v4556_v44 }
 0xe95   :  { %v4516_v8 = vrot.slane %v4514_v4, 7 }
 0xe97   :  { %v4519_v47 = vsel %vm4518_vm14, %v6638_v63, %v4516_v8  ;;  %v5569_v63 = vld [vmem:[%s7070_s11 + $0x5] ss:$0 sm:$0xff] }
 0xe98   :  { %v4521_v60 = vadd.f32 %v5570_v17, %v4519_v47 }
 0xe9a   :  { %v4523_v38 = vmul.f32 0.2, %v4521_v60  ;;  %vm4522_vm10 = vcmp.ge.f32.partialorder %v4521_v60, 0.0 }
 0xe9c   :  { %v4524_v11 = vsel %vm4522_vm10, %v4521_v60, %v4523_v38 }
 0xf17   :  { %v4586_v28 = vpop.f32.mrf.mxu2 }
 0xf18   :  { %v4587_v13 = vadd.f32 %v5569_v63, %v4586_v28 }
 0xf1a   :  { %4590 = vrot.lane.b32.xlu1 %v4587_v13, %s5885_s12 }
 0xf22   :  { %4594 = vrot.lane.b32.xlu1 %v4524_v11, %s5886_s27 }
 0xf8c   :  { %v4591_v61 = vpop.permute.xlu1 %4590 }
 0xf8d   :  { %v4598_v2 = vsel %vm4597_vm15, %v200_v35, %v4591_v61 }
 0xf94   :  { %v4595_v46 = vpop.permute.xlu1 %4594 }
 0xf95   :  { %v4600_v39 = vsel %vm4599_vm0, %v4598_v2, %v4595_v46 }
 0xf96   :  { %4634 = vmatmul.f32.vlgmr.msrb.gmra.mxu1 %v4600_v39 }
0x1013   :  { %v4635_v40 = vpop.f32.mrf.mxu1 }
0x1014   :  { %v4636_v12 = vadd.f32 %v5571_v45, %v4635_v40 }
0x1016   :  { %5572 = vtanh.f32 %v4636_v12  ;;  %v5296_v32 = vmul.f32 -1.442695, %v4636_v12 }
0x1018   :  { %5574 = vpow2.f32 %v5296_v32 }
0x101c   :  { %v5573_v6 = vpop.eup %5572 }
0x101d   :  { %4664 = vrot.lane.b32.xlu2 %v5573_v6, %s5885_s12 }
0x101e   :  { %v5575_v58 = vpop.eup %5574 }
0x101f   :  { %v4641_v56 = vadd.f32 1.0, %v5575_v58 }
0x1021   :  { %5576 = vrcp.f32 %v4641_v56  ;;  %v4653_v43 = vand.u32 2147483648, %v4641_v56  ;;  %vm4647_vm2 = vweird.f32 %v4641_v56  ;;  %v4651_v22 = vand.u32 2147483647, %v4641_v56 }
0x1023   :  { %v4654_v15 = vor.u32 1.1754944e-38, %v4653_v43  ;;  %vm4652_vm4 = vcmp.eq.f32.partialorder %v4651_v22, 8.507059e+37 }
0x1025   :  { %4659 = vrot.lane.b32.xlu2 %v201_v27, %s5885_s12 }
0x1027   :  { %v5577_v36 = vpop.eup %5576 }
0x1028   :  { %v4643_v10 = vmul.f32 %v5577_v36, %v4641_v56  ;;  %vm4648_vm1 = vweird.f32 %v5577_v36 }
0x1029   :  { %vm4649_vm3 = vmor %vm4647_vm2, %vm4648_vm1 }
0x102a   :  { %v4644_v7 = vsub.f32 1.0, %v4643_v10 }
0x102c   :  { %v4645_v34 = vmul.f32 %v5577_v36, %v4644_v7 }
0x102e   :  { %v4646_v33 = vadd.f32 %v5577_v36, %v4645_v34 }
0x1030   :  { %v4650_v54 = vsel %vm4649_vm3, %v5577_v36, %v4646_v33 }
0x1031   :  { %v4655_v49 = vsel %vm4652_vm4, %v4654_v15, %v4650_v54 }
0x1077   :  { %v4665_v25 = vpop.permute.xlu2 %4664 }
0x1078   :  { %v4667_v52 = vmul.f32 %v4665_v25, %v4655_v49 }
0x107a   :  { %4669 = vrot.lane.b32.xlu1 %v4667_v52, %s5885_s12 }
0x107f   :  { %v4660_v20 = vpop.permute.xlu2 %4659 }
0x1080   :  { %v4662_v41 = vmul.f32 %v4660_v20, %v4655_v49 }
0x10ec   :  { %v4670_v23 = vpop.permute.xlu1 %4669 }
0x10ed   :  { %v4672_v0 = vadd.f32 %v4670_v23, %v4662_v41 }
0x10ef   :  { %5578 = vtanh.f32 %v4672_v0 }
0x10f5   :  { %v5579_v57 = vpop.eup %5578 }
0x10f6   :  { %4675 = vrot.lane.b32.xlu2 %v5579_v57, %s5885_s12 }
0x10fe   :  { %4686 = vrot.lane.b32.xlu2 %v4672_v0, %s5886_s27 }
0x1150   :  { %v4676_v37 = vpop.permute.xlu2 %4675 }
0x1151   :  { %v4678_v29 = vmul.f32 %v4676_v37, %v4655_v49 }
0x1153   :  { %4680 = vrot.lane.b32.xlu1 %v4678_v29, %s5873_s26 }
0x1158   :  { %v4687_v48 = vpop.permute.xlu2 %4686 }
0x1159   :  { %4689 = vst.msk [vmem:[#allocation3] sm:$0x3] %vm196_vm11, %v4687_v48 }
0x11c5   :  { %v4681_v51 = vpop.permute.xlu1 %4680 }
0x11c6   :  { %4684 = vst.msk [vmem:[#allocation2] sm:$0x3] %vm196_vm11, %v4681_v51  ;;  %v4690_v5 = vsel %vm4597_vm15, %v4681_v51, %v4672_v0 }
0x11c7   :  { %4692 = vst.msk [vmem:[%s7074_s15] sm:$0x3] %vm4691_vm5, %v4690_v5 }
0x11c8   :  { %4697 = vsyncpa [#allocation5], 1 }
0x11c9   :  { %4698 = vsyncpa [#allocation7], 1 }
0x11ca   :  { %4699 = vsyncpa [#allocation10], 1 }
0x11cb   :  { %4700 = vsyncpa [#allocation13], 1 }
0x11cc   :  { %4701 = vsyncpa [#allocation16], 1 }

</bundles_post_ra>
